<compile_context>
chip_gen: v5e
topology: v5e:2x2
jax: 0.10.0
libtpu: 0.0.40
codegen_flags: <defaults>
</compile_context>

<pallas_src>
import functools
import math

import jax
import jax.numpy as jnp
from jax.experimental import pallas as pl
from jax.experimental.pallas import tpu as pltpu

_BN_EPS = 1e-5
_MM_TM = 1024            # max M tile for matmuls
_MM_TK_MAX = 2304        # single-shot K if padded K <= this
_VMEM_LIMIT = 48 * 1024 * 1024   # < v7x 64 MiB physical, > v5e/v6e default scoped limit


def _round_up(n, m):
    return ((n + m - 1) // m) * m


def _choose_tk(Kp):
    # Kp is a multiple of 128; only layer4's 3x3 conv (K=4608) takes this path.
    for tk in (2304, 2048, 1536, 1152, 1024, 768, 512, 384, 256):
        if Kp % tk == 0:
            return tk
    return 128  # unreachable for ResNet-101 shapes (kept per v5e vst-slot concern)


# ---------------------------------------------------------------------------
# Matmul kernel: optional fused per-K BN(+ReLU) on A, optional bias, optional BN stats output.
# ---------------------------------------------------------------------------
def _make_mm_kernel(*, multi_k, fuse_bn, has_bias, emit_stats, m_total, tm):
    mask_rows = fuse_bn and emit_stats and (m_total % tm != 0)

    def kernel(*refs):
        idx = 0
        a_ref = refs[idx]; idx += 1
        b_ref = refs[idx]; idx += 1
        if fuse_bn:
            sc_ref = refs[idx]; idx += 1
            sh_ref = refs[idx]; idx += 1
        if has_bias:
            bias_ref = refs[idx]; idx += 1
        o_ref = refs[idx]; idx += 1
        if emit_stats:
            stats_ref = refs[idx]; idx += 1
        acc_ref = refs[idx] if multi_k else None

        a = a_ref[...]
        if fuse_bn:
            # previous conv's BN(+ReLU) applied to the raw bf16 activation tile on the fly
            an = a.astype(jnp.float32) * sc_ref[...] + sh_ref[...]
            an = jnp.maximum(an, 0.0)
            if mask_rows:
                # zero out padded rows so they do not pollute the BN statistics
                rows = jax.lax.broadcasted_iota(jnp.int32, an.shape, 0)
                valid = m_total - pl.program_id(0) * tm
                an = jnp.where(rows < valid, an, 0.0)
            a = an.astype(jnp.bfloat16)

        part = jnp.dot(a, b_ref[...], preferred_element_type=jnp.float32)

        def epilogue(acc):
            if has_bias:
                out = acc + bias_ref[...]
            else:
                out = acc
            o_ref[...] = out.astype(o_ref.dtype)
            if emit_stats:
                # per-channel partial sum / sum-of-squares over this M tile (padded rows are 0)
                s1 = jnp.sum(acc, axis=0, keepdims=True)
                s2 = jnp.sum(acc * acc, axis=0, keepdims=True)
                row = jax.lax.broadcasted_iota(jnp.int32, stats_ref.shape[1:], 0)
                stats = jnp.where(row == 0, s1, jnp.where(row == 1, s2, 0.0))
                stats_ref[...] = stats[None]

        if multi_k:
            k = pl.program_id(2)

            @pl.when(k == 0)
            def _():
                acc_ref[...] = jnp.zeros_like(acc_ref)

            acc_ref[...] += part

            @pl.when(k == pl.num_programs(2) - 1)
            def _():
                epilogue(acc_ref[...])
        else:
            epilogue(part)

    return kernel


def _mm(a, b, *, bias=None, a_scale=None, a_shift=None,
        emit_stats=False, out_dtype=jnp.bfloat16):
    """(M, K) @ (K, N) on the MXU (bf16 inputs, f32 accumulation)."""
    M, K = a.shape
    N = b.shape[1]
    fuse_bn = a_scale is not None

    # ----- tile selection ---------------------------------------------------
    Mp = _round_up(M, 8)
    if Mp <= _MM_TM:
        tm = Mp
    else:
        tm = _MM_TM
        Mp = _round_up(M, tm)
    gm = Mp // tm

    Kp = _round_up(K, 128)
    tk = Kp if Kp <= _MM_TK_MAX else _choose_tk(Kp)
    gk = Kp // tk

    if N < 8:
        tn = Np = 128                       # degenerate N (reduce1d) padded to a full lane
    elif N < 128:
        tn = Np = N                         # full-extent lane dim (e.g. Cout = 64), no pad/slice
    else:
        cap = 512 if gm > 1 else 256        # gm==1: keep gn >= 2 for the v7x megacore
        tn = min(cap, _round_up(N, 128))
        Np = _round_up(N, tn)
    gn = Np // tn

    # ----- operands -----------------------------------------------------------
    a = a.astype(jnp.bfloat16)
    b = b.astype(jnp.bfloat16)
    if (Mp, Kp) != (M, K):
        a = jnp.pad(a, ((0, Mp - M), (0, Kp - K)))
    if (Kp, Np) != (K, N):
        b = jnp.pad(b, ((0, Kp - K), (0, Np - N)))

    inputs = [a, b]
    in_specs = [pl.BlockSpec((tm, tk), lambda i, j, k: (i, k)),
                pl.BlockSpec((tk, tn), lambda i, j, k: (k, j))]
    if fuse_bn:
        sc = a_scale.astype(jnp.float32).reshape(1, K)
        sh = a_shift.astype(jnp.float32).reshape(1, K)
        if Kp != K:
            sc = jnp.pad(sc, ((0, 0), (0, Kp - K)))
            sh = jnp.pad(sh, ((0, 0), (0, Kp - K)))
        inputs += [sc, sh]
        in_specs += [pl.BlockSpec((1, tk), lambda i, j, k: (0, k)),
                     pl.BlockSpec((1, tk), lambda i, j, k: (0, k))]
    if bias is not None:
        bias2 = bias.astype(jnp.float32).reshape(1, N)
        if Np != N:
            bias2 = jnp.pad(bias2, ((0, 0), (0, Np - N)))
        inputs.append(bias2)
        in_specs.append(pl.BlockSpec((1, tn), lambda i, j, k: (0, j)))

    out_shapes = [jax.ShapeDtypeStruct((Mp, Np), out_dtype)]
    out_specs = [pl.BlockSpec((tm, tn), lambda i, j, k: (i, j))]
    if emit_stats:
        out_shapes.append(jax.ShapeDtypeStruct((gm, 8, Np), jnp.float32))
        out_specs.append(pl.BlockSpec((1, 8, tn), lambda i, j, k: (i, 0, j)))

    scratch = [pltpu.VMEM((tm, tn), jnp.float32)] if gk > 1 else []

    out_bytes = jnp.dtype(out_dtype).itemsize
    cost = pl.CostEstimate(
        flops=2 * M * N * K,
        transcendentals=0,
        bytes_accessed=int(Mp * Kp * 2 * gn + Kp * Np * 2 * gm + Mp * Np * out_bytes))

    res = pl.pallas_call(
        _make_mm_kernel(multi_k=gk > 1, fuse_bn=fuse_bn, has_bias=bias is not None,
                        emit_stats=emit_stats, m_total=M, tm=tm),
        out_shape=tuple(out_shapes) if emit_stats else out_shapes[0],
        grid_spec=pltpu.PrefetchScalarGridSpec(
            num_scalar_prefetch=0,
            grid=(gm, gn, gk),
            in_specs=in_specs,
            out_specs=out_specs if emit_stats else out_specs[0],
            scratch_shapes=scratch),
        compiler_params=pltpu.CompilerParams(
            dimension_semantics=("parallel", "parallel", "arbitrary"),
            vmem_limit_bytes=_VMEM_LIMIT),
        cost_estimate=cost,
    )(*inputs)

    if emit_stats:
        out, stats = res
    else:
        out = res
    if (Mp, Np) != (M, N):
        out = out[:M, :N]
    if emit_stats:
        s = jnp.sum(stats, axis=0)                 # combine per-M-tile partials
        return out, s[0, :N], s[1, :N]
    return out


def _bn_scale_shift(sum_c, sumsq_c, gamma, beta, count):
    # Note: E[x^2]-E[x]^2 in f32 can cancel for very large counts; fine at these sizes because
    # the inputs are themselves BN-normalised (O(1) mean/variance).
    mean = sum_c / count
    var = jnp.maximum(sumsq_c / count - mean * mean, 0.0)
    scale = gamma * jax.lax.rsqrt(var + _BN_EPS)
    shift = beta - mean * scale
    return scale, shift


# ---------------------------------------------------------------------------
# Tiled elementwise kernels: fused BN + residual add + ReLU, and 9-way max (maxpool).
# ---------------------------------------------------------------------------
def _bn_add_relu_kernel(x_ref, r_ref, s_ref, t_ref, o_ref):
    y = (x_ref[...].astype(jnp.float32) * s_ref[...] + t_ref[...]
         + r_ref[...].astype(jnp.float32))
    o_ref[...] = jnp.maximum(y, 0.0).astype(o_ref.dtype)


def _bn2_add_relu_kernel(x_ref, r_ref, sx_ref, tx_ref, sr_ref, tr_ref, o_ref):
    y = (x_ref[...].astype(jnp.float32) * sx_ref[...] + tx_ref[...]
         + r_ref[...].astype(jnp.float32) * sr_ref[...] + tr_ref[...])
    o_ref[...] = jnp.maximum(y, 0.0).astype(o_ref.dtype)


def _max9_kernel(*refs):
    o_ref = refs[-1]
    m = refs[0][...]
    for r in refs[1:-1]:
        m = jnp.maximum(m, r[...])
    o_ref[...] = m


def _ew_tiles(M, C):
    base = 256 if C >= 1024 else 512     # keep wide-C double-buffered tiles inside v5e VMEM
    Mp = _round_up(M, 8)
    if Mp <= base:
        return Mp, Mp
    Mp = _round_up(M, base)
    return base, Mp


def _ew_call(kernel, row_inputs, vec_inputs, M, C):
    tm, Mp = _ew_tiles(M, C)
    if Mp != M:
        row_inputs = [jnp.pad(x, ((0, Mp - M), (0, 0))) for x in row_inputs]
    in_specs = ([pl.BlockSpec((tm, C), lambda i: (i, 0))] * len(row_inputs)
                + [pl.BlockSpec((1, C), lambda i: (0, 0))] * len(vec_inputs))
    out = pl.pallas_call(
        kernel,
        out_shape=jax.ShapeDtypeStruct((Mp, C), jnp.bfloat16),
        grid_spec=pltpu.PrefetchScalarGridSpec(
            num_scalar_prefetch=0,
            grid=(Mp // tm,),
            in_specs=in_specs,
            out_specs=pl.BlockSpec((tm, C), lambda i: (i, 0))),
        compiler_params=pltpu.CompilerParams(dimension_semantics=("parallel",)),
    )(*row_inputs, *[v.reshape(1, C) for v in vec_inputs])
    return out[:M] if Mp != M else out


def _maxpool_3x3_s2(x):
    """3x3 / stride-2 / pad-1 max pool of a post-ReLU activation (zero padding is exact
    because every input value is >= 0)."""
    B, H, W, C = x.shape
    k, s, pad = 3, 2, 1
    Ho = (H + 2 * pad - k) // s + 1
    Wo = (W + 2 * pad - k) // s + 1
    M = B * Ho * Wo
    xp = jnp.pad(x, ((0, 0), (pad, pad), (pad, pad), (0, 0)))
    taps = [xp[:, i:i + s * (Ho - 1) + 1:s, j:j + s * (Wo - 1) + 1:s, :].reshape(M, C)
            for i in range(k) for j in range(k)]
    # lane-dense view for narrow C (conv1 output has C=64): fold rows into lanes.
    f = 1
    if C < 128 and 128 % C == 0 and M % (128 // C) == 0:
        f = 128 // C
    taps = [t.reshape(M // f, C * f) for t in taps]
    out = _ew_call(_max9_kernel, taps, [], M // f, C * f)
    return out.reshape(B, Ho, Wo, C)


def _global_mean_kernel(x_ref, o_ref):
    o_ref[...] = jnp.mean(x_ref[...].astype(jnp.float32), axis=1, keepdims=True)


def _global_avgpool(x):
    B, H, W, C = x.shape
    HW = H * W
    out = pl.pallas_call(
        _global_mean_kernel,
        out_shape=jax.ShapeDtypeStruct((B, 1, C), jnp.float32),
        grid_spec=pltpu.PrefetchScalarGridSpec(
            num_scalar_prefetch=0,
            grid=(B,),
            in_specs=[pl.BlockSpec((1, HW, C), lambda b: (b, 0, 0))],
            out_specs=pl.BlockSpec((1, 1, C), lambda b: (b, 0, 0))),
        compiler_params=pltpu.CompilerParams(dimension_semantics=("parallel",)),
    )(x.reshape(B, HW, C))
    return out.reshape(B, C)


# ---------------------------------------------------------------------------
# im2col helper (XLA glue).
# ---------------------------------------------------------------------------
def _im2col(x, kh, kw, stride, pad):
    # TODO(synk): taps are still materialized in HBM by XLA; a direct-conv kernel with the
    # taps on the K grid axis would remove this traffic.
    B, H, W, C = x.shape
    if pad:
        x = jnp.pad(x, ((0, 0), (pad, pad), (pad, pad), (0, 0)))
    Hp, Wp = H + 2 * pad, W + 2 * pad
    Ho = (Hp - kh) // stride + 1
    Wo = (Wp - kw) // stride + 1
    cols = [x[:, i:i + stride * (Ho - 1) + 1:stride,
              j:j + stride * (Wo - 1) + 1:stride, :]
            for i in range(kh) for j in range(kw)]
    return jnp.concatenate(cols, axis=-1), Ho, Wo


# ---------------------------------------------------------------------------
# Network stages (jit-cached per unique shape/config so the 33 bottlenecks share ~8 compiles).
# ---------------------------------------------------------------------------
@functools.lru_cache(maxsize=None)
def _stem_fn(B, H, W):
    def f(x, w, gamma, beta):
        patches, ho, wo = _im2col(x, 7, 7, 2, 3)
        m = B * ho * wo
        r, s, q = _mm(patches.reshape(m, 7 * 7 * 3), w.reshape(7 * 7 * 3, 64),
                      emit_stats=True)
        sc, sh = _bn_scale_shift(s, q, gamma, beta, float(m))
        # bn1+ReLU as XLA elementwise: fuses into the maxpool tap slices.
        xn = jnp.maximum(r.astype(jnp.float32) * sc + sh, 0.0).astype(jnp.bfloat16)
        return _maxpool_3x3_s2(xn.reshape(B, ho, wo, 64))
    return jax.jit(f)


@functools.lru_cache(maxsize=None)
def _bottleneck_fn(B, H, W, inplanes, planes, stride, has_ds):
    cout = planes * 4

    def f(x, p):
        m_in = B * H * W
        # conv1 (1x1): input is already normalized at the block boundary; emit BN1 stats.
        r1, s1, q1 = _mm(x.reshape(m_in, inplanes),
                         p['w1'].reshape(inplanes, planes), emit_stats=True)
        sc1, sh1 = _bn_scale_shift(s1, q1, p['g1'], p['b1'], float(m_in))
        # bn1+ReLU as plain XLA elementwise: fuses into the im2col pad/slice producers and
        # keeps conv2's zero spatial padding exact.
        h1 = jnp.maximum(r1.astype(jnp.float32) * sc1 + sh1, 0.0).astype(jnp.bfloat16)
        patches, ho, wo = _im2col(h1.reshape(B, H, W, planes), 3, 3, stride, 1)
        m2 = B * ho * wo
        # conv2 (3x3, stride): emit BN2 stats.
        r2, s2, q2 = _mm(patches.reshape(m2, 9 * planes),
                         p['w2'].reshape(9 * planes, planes), emit_stats=True)
        sc2, sh2 = _bn_scale_shift(s2, q2, p['g2'], p['b2'], float(m2))
        # conv3 (1x1) with BN2+ReLU fused onto its A tiles (no HBM round-trip for h2).
        r3, s3, q3 = _mm(r2, p['w3'].reshape(planes, cout),
                         a_scale=sc2, a_shift=sh2, emit_stats=True)
        sc3, sh3 = _bn_scale_shift(s3, q3, p['g3'], p['b3'], float(m2))
        if has_ds:
            xs = x if stride == 1 else x[:, ::stride, ::stride, :]
            rd, sd, qd = _mm(xs.reshape(m2, inplanes),
                             p['wd'].reshape(inplanes, cout), emit_stats=True)
            scd, shd = _bn_scale_shift(sd, qd, p['gd'], p['bd'], float(m2))
            out = _ew_call(_bn2_add_relu_kernel, [r3, rd],
                           [sc3, sh3, scd, shd], m2, cout)
        else:
            out = _ew_call(_bn_add_relu_kernel, [r3, x.reshape(m2, cout)],
                           [sc3, sh3], m2, cout)
        return out.reshape(B, ho, wo, cout)

    return jax.jit(f)


@functools.lru_cache(maxsize=None)
def _reduce_fn(B, H, W, cin, cout):
    def f(x, w):
        m = B * H * W
        out = _mm(x.reshape(m, cin), w.reshape(cin, cout), out_dtype=jnp.float32)
        return out.reshape(B, H, W, cout)
    return jax.jit(f)


@functools.lru_cache(maxsize=None)
def _head_fn(B, H, W):
    def f(x, fc_w, fc_b, r1d_w, r1d_b):
        t = _global_avgpool(x)                                  # (B, 2048) f32
        t = _mm(t, fc_w, bias=fc_b, out_dtype=jnp.float32)      # fc      (2048 -> 1000)
        t = _mm(t, r1d_w, bias=r1d_b, out_dtype=jnp.float32)    # reduce1d (1000 -> 1)
        return t
    return jax.jit(f)


# ---------------------------------------------------------------------------
# Parameters (deterministic synthetic init; conv/linear weights stored in bf16).
# ---------------------------------------------------------------------------
class KeyGen:
    def __init__(self, key):
        self.key = key

    def __call__(self):
        self.key, sub = jax.random.split(self.key)
        return sub


def _kaiming(kg, kh, kw, cin, cout):
    # kaiming_normal_(mode='fan_out', nonlinearity='relu'): std = sqrt(2 / (cout*kh*kw))
    std = math.sqrt(2.0 / (cout * kh * kw))
    w = std * jax.random.normal(kg(), (kh, kw, cin, cout), jnp.float32)
    return w.astype(jnp.bfloat16)


def _make_bottleneck_params(kg, inplanes, planes, has_ds):
    p = {'w1': _kaiming(kg, 1, 1, inplanes, planes),
         'g1': jnp.ones((planes,), jnp.float32), 'b1': jnp.zeros((planes,), jnp.float32),
         'w2': _kaiming(kg, 3, 3, planes, planes),
         'g2': jnp.ones((planes,), jnp.float32), 'b2': jnp.zeros((planes,), jnp.float32),
         'w3': _kaiming(kg, 1, 1, planes, planes * 4),
         'g3': jnp.ones((planes * 4,), jnp.float32),
         'b3': jnp.zeros((planes * 4,), jnp.float32)}
    if has_ds:
        p['wd'] = _kaiming(kg, 1, 1, inplanes, planes * 4)
        p['gd'] = jnp.ones((planes * 4,), jnp.float32)
        p['bd'] = jnp.zeros((planes * 4,), jnp.float32)
    return p


_RESNET101_LAYERS = (('layer1', 64, 3, 1), ('layer2', 128, 4, 2),
                     ('layer3', 256, 23, 2), ('layer4', 512, 3, 2))


def build_params(key):
    # TODO(synk): torch.load of the pretrained resnet101/deeplabv3 checkpoint has no Pallas
    # equivalent; deterministic kaiming-style synthetic init instead.
    kg = KeyGen(key)
    p = {'conv1_w': _kaiming(kg, 7, 7, 3, 64),
         'bn1_g': jnp.ones((64,), jnp.float32), 'bn1_b': jnp.zeros((64,), jnp.float32)}
    inplanes = 64
    for name, planes, blocks, stride in _RESNET101_LAYERS:
        blks = []
        for b in range(blocks):
            s = stride if b == 0 else 1
            has_ds = (b == 0) and (s != 1 or inplanes != planes * 4)
            blks.append(_make_bottleneck_params(kg, inplanes, planes, has_ds))
            inplanes = planes * 4
        p[name] = blks
    p['reduce1_w'] = _kaiming(kg, 1, 1, 1024, 512)
    p['reduce2_w'] = _kaiming(kg, 1, 1, 2048, 512)
    p['fc_w'] = (jax.random.normal(kg(), (2048, 1000), jnp.float32)
                 / math.sqrt(2048.0)).astype(jnp.bfloat16)
    p['fc_b'] = 0.01 * jax.random.normal(kg(), (1000,), jnp.float32)
    p['r1d_w'] = (jax.random.normal(kg(), (1000, 1), jnp.float32)
                  / math.sqrt(1000.0)).astype(jnp.bfloat16)
    p['r1d_b'] = 0.01 * jax.random.normal(kg(), (1,), jnp.float32)
    return p


# ---------------------------------------------------------------------------
# Forward pass (mirrors Res101Encoder.forward).
# ---------------------------------------------------------------------------
def res101_encoder_forward(params, x_nchw):
    B, _, H, W = x_nchw.shape
    x = jnp.transpose(x_nchw, (0, 2, 3, 1)).astype(jnp.bfloat16)     # NCHW -> NHWC bf16
    x = _stem_fn(B, H, W)(x, params['conv1_w'], params['bn1_g'], params['bn1_b'])

    features = {}
    inplanes = 64
    for name, planes, blocks, stride in _RESNET101_LAYERS:
        for b in range(blocks):
            s = stride if b == 0 else 1
            has_ds = (b == 0) and (s != 1 or inplanes != planes * 4)
            Bc, Hc, Wc, Cc = x.shape
            x = _bottleneck_fn(Bc, Hc, Wc, Cc, planes, s, has_ds)(x, params[name][b])
            inplanes = planes * 4
        if name == 'layer3':
            d2 = _reduce_fn(*x.shape, 512)(x, params['reduce1_w'])    # reduce1 (1024 -> 512)
            features['down2'] = jnp.transpose(d2, (0, 3, 1, 2))       # back to NCHW f32
    d3 = _reduce_fn(*x.shape, 512)(x, params['reduce2_w'])            # reduce2 (2048 -> 512)
    features['down3'] = jnp.transpose(d3, (0, 3, 1, 2))
    t = _head_fn(*x.shape[:3])(x, params['fc_w'], params['fc_b'],
                               params['r1d_w'], params['r1d_b'])      # avgpool+fc+reduce1d
    return features, t


if __name__ == "__main__":
    root = jax.random.PRNGKey(0)
    pkey, xkey = jax.random.split(root)
    params = build_params(pkey)
    # small deterministic input, NCHW like PyTorch: (batch=2, C=3, H=64, W=64)
    x = jax.random.normal(xkey, (2, 3, 64, 64), jnp.float32)

    features, t = res101_encoder_forward(params, x)
    (features, t) = jax.block_until_ready((features, t))

    assert features['down2'].shape == (2, 512, 4, 4)
    assert features['down3'].shape == (2, 512, 2, 2)
    assert t.shape == (2, 1)
    assert bool(jnp.all(jnp.isfinite(features['down2'])))
    assert bool(jnp.all(jnp.isfinite(features['down3'])))
    assert bool(jnp.all(jnp.isfinite(t)))
    print("KERNEL_OK")
</pallas_src>

<mosaic_0001>
module attributes {stable_mosaic.version = 11 : i64} {
  func.func @kernel(%arg0: i32, %arg1: i32, %arg2: i32, %arg3: memref<1024x256xbf16, #tpu.memory_space<vmem>>, %arg4: memref<256x64xbf16, #tpu.memory_space<vmem>>, %arg5: memref<1024x64xbf16, #tpu.memory_space<vmem>>, %arg6: memref<1x8x64xf32, #tpu.memory_space<vmem>>) attributes {dimension_semantics = [#tpu.dimension_semantics<parallel>, #tpu.dimension_semantics<parallel>, #tpu.dimension_semantics<arbitrary>], iteration_bounds = array<i64: 2, 1, 1>, scalar_prefetch = 0 : i64, scratch_operands = 0 : i64, tpu.core_type = #tpu.core_type<tc>, window_params = [{transform_indices = @transform_0, window_bounds = array<i64: 1024, 256>}, {transform_indices = @transform_1, window_bounds = array<i64: 256, 64>}, {transform_indices = @transform_2, window_bounds = array<i64: 1024, 64>}, {transform_indices = @transform_3, window_bounds = array<i64: 1, 8, 64>}]} {
    %c0 = arith.constant 0 : index
    %c0_0 = arith.constant 0 : index
    %0 = vector.load %arg3[%c0, %c0_0] : memref<1024x256xbf16, #tpu.memory_space<vmem>>, vector<1024x256xbf16>
    %c0_1 = arith.constant 0 : index
    %c0_2 = arith.constant 0 : index
    %1 = vector.load %arg4[%c0_1, %c0_2] : memref<256x64xbf16, #tpu.memory_space<vmem>>, vector<256x64xbf16>
    %cst = arith.constant dense<0.000000e+00> : vector<1024x64xf32>
    %2 = tpu.matmul %0, %1, %cst {dimension_numbers = #tpu.dot_dimension_numbers<[1], [0], [0], [1], [0, 0, 1, 1], [], []>} : vector<1024x256xbf16>, vector<256x64xbf16>, vector<1024x64xf32> -> vector<1024x64xf32>
    %3 = arith.truncf %2 : vector<1024x64xf32> to vector<1024x64xbf16>
    %c0_3 = arith.constant 0 : index
    %c0_4 = arith.constant 0 : index
    %4 = vector.load %arg5[%c0_3, %c0_4] : memref<1024x64xbf16, #tpu.memory_space<vmem>>, vector<1024x64xbf16>
    tpu.vector_store %arg5[%c0_3, %c0_4], %3 {strides = array<i32>} : memref<1024x64xbf16, #tpu.memory_space<vmem>>, vector<1024x64xbf16>,
    %cst_5 = arith.constant dense<0.000000e+00> : vector<64xf32>
    %5 = vector.multi_reduction <add>, %2, %cst_5 [0] : vector<1024x64xf32> to vector<64xf32>
    %6 = vector.shape_cast %5 : vector<64xf32> to vector<1x64xf32>
    %7 = arith.mulf %2, %2 : vector<1024x64xf32>
    %cst_6 = arith.constant dense<0.000000e+00> : vector<64xf32>
    %8 = vector.multi_reduction <add>, %7, %cst_6 [0] : vector<1024x64xf32> to vector<64xf32>
    %9 = vector.shape_cast %8 : vector<64xf32> to vector<1x64xf32>
    %10 = tpu.iota {dimensions = array<i32: 0>} : vector<8x64xi32>
    %c0_i32 = arith.constant 0 : i32
    %11 = vector.broadcast %c0_i32 : i32 to vector<8x64xi32>
    %12 = arith.cmpi eq, %10, %11 : vector<8x64xi32>
    %c1_i32 = arith.constant 1 : i32
    %13 = vector.broadcast %c1_i32 : i32 to vector<8x64xi32>
    %14 = arith.cmpi eq, %10, %13 : vector<8x64xi32>
    %cst_7 = arith.constant 0.000000e+00 : f32
    %15 = vector.shape_cast %9 : vector<1x64xf32> to vector<1x64xf32>
    %16 = vector.broadcast %15 : vector<1x64xf32> to vector<8x64xf32>
    %17 = vector.broadcast %cst_7 : f32 to vector<8x64xf32>
    %18 = arith.select %14, %16, %17 : vector<8x64xi1>, vector<8x64xf32>
    %19 = vector.shape_cast %6 : vector<1x64xf32> to vector<1x64xf32>
    %20 = vector.broadcast %19 : vector<1x64xf32> to vector<8x64xf32>
    %21 = arith.select %12, %20, %18 : vector<8x64xi1>, vector<8x64xf32>
    %22 = vector.shape_cast %21 : vector<8x64xf32> to vector<1x8x64xf32>
    %c0_8 = arith.constant 0 : index
    %c0_9 = arith.constant 0 : index
    %c0_10 = arith.constant 0 : index
    %23 = vector.load %arg6[%c0_8, %c0_9, %c0_10] : memref<1x8x64xf32, #tpu.memory_space<vmem>>, vector<1x8x64xf32>
    tpu.vector_store %arg6[%c0_8, %c0_9, %c0_10], %22 {strides = array<i32>} : memref<1x8x64xf32, #tpu.memory_space<vmem>>, vector<1x8x64xf32>,
    return
  }
  func.func @transform_0(%arg0: i32, %arg1: i32, %arg2: i32) -> (i32, i32) {
    %c0_i32 = arith.constant 0 : i32
    return %arg0, %arg2 : i32, i32
  }
  func.func @transform_1(%arg0: i32, %arg1: i32, %arg2: i32) -> (i32, i32) {
    %c0_i32 = arith.constant 0 : i32
    return %arg2, %arg1 : i32, i32
  }
  func.func @transform_2(%arg0: i32, %arg1: i32, %arg2: i32) -> (i32, i32) {
    %c0_i32 = arith.constant 0 : i32
    return %arg0, %arg1 : i32, i32
  }
  func.func @transform_3(%arg0: i32, %arg1: i32, %arg2: i32) -> (i32, i32, i32) {
    %c0_i32 = arith.constant 0 : i32
    %c0_i32_0 = arith.constant 0 : i32
    return %arg0, %c0_i32, %arg1 : i32, i32, i32
  }
}

module attributes {stable_mosaic.version = 11 : i64} {
  func.func @_max9_kernel(%arg0: i32, %arg1: memref<256x128xbf16, #tpu.memory_space<vmem>>, %arg2: memref<256x128xbf16, #tpu.memory_space<vmem>>, %arg3: memref<256x128xbf16, #tpu.memory_space<vmem>>, %arg4: memref<256x128xbf16, #tpu.memory_space<vmem>>, %arg5: memref<256x128xbf16, #tpu.memory_space<vmem>>, %arg6: memref<256x128xbf16, #tpu.memory_space<vmem>>, %arg7: memref<256x128xbf16, #tpu.memory_space<vmem>>, %arg8: memref<256x128xbf16, #tpu.memory_space<vmem>>, %arg9: memref<256x128xbf16, #tpu.memory_space<vmem>>, %arg10: memref<256x128xbf16, #tpu.memory_space<vmem>>) attributes {dimension_semantics = [#tpu.dimension_semantics<parallel>], iteration_bounds = array<i64: 1>, scalar_prefetch = 0 : i64, scratch_operands = 0 : i64, tpu.core_type = #tpu.core_type<tc>, window_params = [{transform_indices = @transform_0, window_bounds = array<i64: 256, 128>}, {transform_indices = @transform_1, window_bounds = array<i64: 256, 128>}, {transform_indices = @transform_2, window_bounds = array<i64: 256, 128>}, {transform_indices = @transform_3, window_bounds = array<i64: 256, 128>}, {transform_indices = @transform_4, window_bounds = array<i64: 256, 128>}, {transform_indices = @transform_5, window_bounds = array<i64: 256, 128>}, {transform_indices = @transform_6, window_bounds = array<i64: 256, 128>}, {transform_indices = @transform_7, window_bounds = array<i64: 256, 128>}, {transform_indices = @transform_8, window_bounds = array<i64: 256, 128>}, {transform_indices = @transform_9, window_bounds = array<i64: 256, 128>}]} {
    %c0 = arith.constant 0 : index
    %c0_0 = arith.constant 0 : index
    %0 = vector.load %arg1[%c0, %c0_0] : memref<256x128xbf16, #tpu.memory_space<vmem>>, vector<256x128xbf16>
    %c0_1 = arith.constant 0 : index
    %c0_2 = arith.constant 0 : index
    %1 = vector.load %arg2[%c0_1, %c0_2] : memref<256x128xbf16, #tpu.memory_space<vmem>>, vector<256x128xbf16>
    %2 = arith.maximumf %0, %1 : vector<256x128xbf16>
    %c0_3 = arith.constant 0 : index
    %c0_4 = arith.constant 0 : index
    %3 = vector.load %arg3[%c0_3, %c0_4] : memref<256x128xbf16, #tpu.memory_space<vmem>>, vector<256x128xbf16>
    %4 = arith.maximumf %2, %3 : vector<256x128xbf16>
    %c0_5 = arith.constant 0 : index
    %c0_6 = arith.constant 0 : index
    %5 = vector.load %arg4[%c0_5, %c0_6] : memref<256x128xbf16, #tpu.memory_space<vmem>>, vector<256x128xbf16>
    %6 = arith.maximumf %4, %5 : vector<256x128xbf16>
    %c0_7 = arith.constant 0 : index
    %c0_8 = arith.constant 0 : index
    %7 = vector.load %arg5[%c0_7, %c0_8] : memref<256x128xbf16, #tpu.memory_space<vmem>>, vector<256x128xbf16>
    %8 = arith.maximumf %6, %7 : vector<256x128xbf16>
    %c0_9 = arith.constant 0 : index
    %c0_10 = arith.constant 0 : index
    %9 = vector.load %arg6[%c0_9, %c0_10] : memref<256x128xbf16, #tpu.memory_space<vmem>>, vector<256x128xbf16>
    %10 = arith.maximumf %8, %9 : vector<256x128xbf16>
    %c0_11 = arith.constant 0 : index
    %c0_12 = arith.constant 0 : index
    %11 = vector.load %arg7[%c0_11, %c0_12] : memref<256x128xbf16, #tpu.memory_space<vmem>>, vector<256x128xbf16>
    %12 = arith.maximumf %10, %11 : vector<256x128xbf16>
    %c0_13 = arith.constant 0 : index
    %c0_14 = arith.constant 0 : index
    %13 = vector.load %arg8[%c0_13, %c0_14] : memref<256x128xbf16, #tpu.memory_space<vmem>>, vector<256x128xbf16>
    %14 = arith.maximumf %12, %13 : vector<256x128xbf16>
    %c0_15 = arith.constant 0 : index
    %c0_16 = arith.constant 0 : index
    %15 = vector.load %arg9[%c0_15, %c0_16] : memref<256x128xbf16, #tpu.memory_space<vmem>>, vector<256x128xbf16>
    %16 = arith.maximumf %14, %15 : vector<256x128xbf16>
    %c0_17 = arith.constant 0 : index
    %c0_18 = arith.constant 0 : index
    %17 = vector.load %arg10[%c0_17, %c0_18] : memref<256x128xbf16, #tpu.memory_space<vmem>>, vector<256x128xbf16>
    tpu.vector_store %arg10[%c0_17, %c0_18], %16 {strides = array<i32>} : memref<256x128xbf16, #tpu.memory_space<vmem>>, vector<256x128xbf16>,
    return
  }
  func.func @transform_0(%arg0: i32) -> (i32, i32) {
    %c0_i32 = arith.constant 0 : i32
    %c0_i32_0 = arith.constant 0 : i32
    return %arg0, %c0_i32 : i32, i32
  }
  func.func @transform_1(%arg0: i32) -> (i32, i32) {
    %c0_i32 = arith.constant 0 : i32
    %c0_i32_0 = arith.constant 0 : i32
    return %arg0, %c0_i32 : i32, i32
  }
  func.func @transform_2(%arg0: i32) -> (i32, i32) {
    %c0_i32 = arith.constant 0 : i32
    %c0_i32_0 = arith.constant 0 : i32
    return %arg0, %c0_i32 : i32, i32
  }
  func.func @transform_3(%arg0: i32) -> (i32, i32) {
    %c0_i32 = arith.constant 0 : i32
    %c0_i32_0 = arith.constant 0 : i32
    return %arg0, %c0_i32 : i32, i32
  }
  func.func @transform_4(%arg0: i32) -> (i32, i32) {
    %c0_i32 = arith.constant 0 : i32
    %c0_i32_0 = arith.constant 0 : i32
    return %arg0, %c0_i32 : i32, i32
  }
  func.func @transform_5(%arg0: i32) -> (i32, i32) {
    %c0_i32 = arith.constant 0 : i32
    %c0_i32_0 = arith.constant 0 : i32
    return %arg0, %c0_i32 : i32, i32
  }
  func.func @transform_6(%arg0: i32) -> (i32, i32) {
    %c0_i32 = arith.constant 0 : i32
    %c0_i32_0 = arith.constant 0 : i32
    return %arg0, %c0_i32 : i32, i32
  }
  func.func @transform_7(%arg0: i32) -> (i32, i32) {
    %c0_i32 = arith.constant 0 : i32
    %c0_i32_0 = arith.constant 0 : i32
    return %arg0, %c0_i32 : i32, i32
  }
  func.func @transform_8(%arg0: i32) -> (i32, i32) {
    %c0_i32 = arith.constant 0 : i32
    %c0_i32_0 = arith.constant 0 : i32
    return %arg0, %c0_i32 : i32, i32
  }
  func.func @transform_9(%arg0: i32) -> (i32, i32) {
    %c0_i32 = arith.constant 0 : i32
    %c0_i32_0 = arith.constant 0 : i32
    return %arg0, %c0_i32 : i32, i32
  }
}

</mosaic_0001>

<bundles_post_ra>
// kernel: f.2
= control target key start
LH: loop header
LB: loop body
LE: loop exit
PB: predicated region body
PF: predicated region fallthrough
CT: control target
= control target key end

     0   :  { %s3703_s12 = smov 0   ;;  %s3705_s13 = smov 0   ;;  %s5051_s0 = inlined_call_operand.vmem [shape: bf16[2048,256], index: 0, kind: input, shape index: {}]   ;;  %s5052_s1 = inlined_call_operand.vmem [shape: bf16[256,64], index: 1, kind: input, shape index: {}]   ;;  %s5053_s2 = inlined_call_operand.vmem [shape: bf16[2048,64], index: 2, kind: output, shape index: {0}]   ;;  %s5054_s3 = inlined_call_operand.vmem [shape: f32[2,8,64], index: 3, kind: output, shape index: {1}]  }
   0x1   :  { %s3707_s14 = smov 0  }
   0x2 LB: > { %s33_s15 = sadd.s32 1, %s3677_s13  ;;  %p2889_p0 = scmp.ge.s32.totalorder %s3681_s14, 1  ;;  %s3681_s14 = sphi %s3707_s14, %s14_s14   ;;  %s3677_s13 = sphi %s3705_s13, %s5116_s13   ;;  %s3673_s12 = sphi %s3703_s12, %s5115_s12  }
   0x3   : > { %p35_p1 = scmp.ge.s32.totalorder %s33_s15, 2  ;;  %p188_p2 = scmp.lt.s32.totalorder %s3681_s14, 3 }
   0x5   : > { %s5118_s15 = smov (%p35_p1, %s33_s15), 0  ;;  %p189_p3 = pnand %p2889_p0, %p188_p2 }
   0x7   : > { %192 = sbr.rel (%p189_p3) target bundleno = 825 (0x339), region = 28 }
   0xc   : > { %v3610_v0 = vld [vmem:[%s5052_s1 + $0x38] sm:$0xff]  ;;  %v3609_v2 = vld [vmem:[%s5052_s1 + $0x30] sm:$0xff]  ;;  %v3608_v4 = vld [vmem:[%s5052_s1 + $0x28] sm:$0xff]  ;;  %s2890_s28 = sshll.u32 %s3673_s12, 7  ;;  %vm1954_vm0 = vcmask 519168   ;;  %vm2083_vm1 = vcmask 523264  }
   0xd   : > { %v3618_v1 = vld [vmem:[%s5052_s1 + $0x78] sm:$0xff]  ;;  %1168 = vmatpush.bf16.msra.mxu0 %v3610_v0  ;;  %v3617_v3 = vld [vmem:[%s5052_s1 + $0x70] sm:$0xff]  ;;  %3619 = vmatpush.bf16.msra.mxu2 %v3610_v0  ;;  %v3616_v5 = vld [vmem:[%s5052_s1 + $0x68] sm:$0xff]  ;;  %p237_p4 = scmp.lt.s32.totalorder %s2890_s28, 255  ;;  %p265_p5 = scmp.lt.s32.totalorder %s3673_s12, 1 }
   0xe   : > { %1497 = vmatpush.bf16.msra.mxu1 %v3618_v1  ;;  %3627 = vmatpush.bf16.msra.mxu3 %v3618_v1  ;;  %v3607_v6 = vld [vmem:[%s5052_s1 + $0x20] sm:$0xff]  ;;  %v3606_v8 = vld [vmem:[%s5052_s1 + $0x18] sm:$0xff]  ;;  %v3605_v10 = vld [vmem:[%s5052_s1 + $0x10] sm:$0xff] }
   0xf   : > { %v3615_v7 = vld [vmem:[%s5052_s1 + $0x60] sm:$0xff]  ;;  %v3614_v9 = vld [vmem:[%s5052_s1 + $0x58] sm:$0xff]  ;;  %s5120_s28 = smov (!%p237_p4, %s2890_s28), 255  ;;  %v3613_v11 = vld [vmem:[%s5052_s1 + $0x50] sm:$0xff]  ;;  %s5122_s12 = smov (!%p265_p5, %s3673_s12), 1 }
  0x10   : > { %s3474_s18 = sshll.u32 %s5120_s28, 3  ;;  %v3604_v12 = vld [vmem:[%s5052_s1 + $0x8] sm:$0xff]  ;;  %v3603_v14 = vld [vmem:[%s5052_s1] sm:$0xff]  ;;  %s2894_s4 = sshll.u32 %s5120_s28, 2 }
  0x11   : > { %1169 = vmatpush.bf16.msra.mxu0 %v3609_v2  ;;  %3620 = vmatpush.bf16.msra.mxu2 %v3609_v2  ;;  %v3612_v13 = vld [vmem:[%s5052_s1 + $0x48] sm:$0xff]  ;;  %s3772_s25 = scalar_lea.vmem %s5051_s0, %s3474_s18  ;;  %v3611_v15 = vld [vmem:[%s5052_s1 + $0x40] sm:$0xff]  ;;  %s3832_s7 = scalar_lea.vmem %s5053_s2, %s2894_s4 }
  0x12   : > { %1498 = vmatpush.bf16.msra.mxu1 %v3617_v3  ;;  %3628 = vmatpush.bf16.msra.mxu3 %v3617_v3  ;;  %v2898_v16 = vld [vmem:[%s3772_s25] sm:$0xf]  ;;  %v3476_v17 = vld [vmem:[%s3772_s25 + $0x4] sm:$0xf0]  ;;  %v3475_v18 = vld [vmem:[%s3772_s25 + $0x4] sm:$0xf] }
  0x13   : > { %v2900_v19 = vld [vmem:[%s3772_s25 + $0x8] sm:$0xf0]  ;;  %v2899_v20 = vor.u32 %v3476_v17, %v2898_v16  ;;  %v2906_v22 = vld [vmem:[%s3772_s25 + $0x10] sm:$0xf]  ;;  %v3478_v23 = vld [vmem:[%s3772_s25 + $0x14] sm:$0xf0] }
  0x14   : > { %v2903_v21 = vor.u32 %v3475_v18, %v2900_v19  ;;  %v3477_v24 = vld [vmem:[%s3772_s25 + $0x14] sm:$0xf]  ;;  %v2908_v25 = vld [vmem:[%s3772_s25 + $0x18] sm:$0xf0]  ;;  %v2907_v26 = vor.u32 %v3478_v23, %v2906_v22  ;;  %v2914_v28 = vld [vmem:[%s3772_s25 + $0x20] sm:$0xf] }
  0x15   : > { %1170 = vmatpush.bf16.msra.mxu0 %v3608_v4  ;;  %3621 = vmatpush.bf16.msra.mxu2 %v3608_v4  ;;  %v2911_v27 = vor.u32 %v3477_v24, %v2908_v25  ;;  %v3480_v29 = vld [vmem:[%s3772_s25 + $0x24] sm:$0xf0]  ;;  %v3479_v30 = vld [vmem:[%s3772_s25 + $0x24] sm:$0xf]  ;;  %v2916_v31 = vld [vmem:[%s3772_s25 + $0x28] sm:$0xf0] }
  0x16   : > { %1499 = vmatpush.bf16.msra.mxu1 %v3616_v5  ;;  %3629 = vmatpush.bf16.msra.mxu3 %v3616_v5  ;;  %v2915_v32 = vor.u32 %v3480_v29, %v2914_v28  ;;  %v2919_v33 = vor.u32 %v3479_v30, %v2916_v31  ;;  %v2922_v34 = vld [vmem:[%s3772_s25 + $0x30] sm:$0xf]  ;;  %v3482_v35 = vld [vmem:[%s3772_s25 + $0x34] sm:$0xf0]  ;;  %v3481_v36 = vld [vmem:[%s3772_s25 + $0x34] sm:$0xf] }
  0x17   : > { %v2924_v37 = vld [vmem:[%s3772_s25 + $0x38] sm:$0xf0]  ;;  %v2923_v38 = vor.u32 %v3482_v35, %v2922_v34  ;;  %v2930_v40 = vld [vmem:[%s3772_s25 + $0x40] sm:$0xf]  ;;  %v3484_v41 = vld [vmem:[%s3772_s25 + $0x44] sm:$0xf0] }
  0x18   : > { %v2927_v39 = vor.u32 %v3481_v36, %v2924_v37  ;;  %v3483_v42 = vld [vmem:[%s3772_s25 + $0x44] sm:$0xf]  ;;  %v2932_v43 = vld [vmem:[%s3772_s25 + $0x48] sm:$0xf0]  ;;  %v2931_v44 = vor.u32 %v3484_v41, %v2930_v40  ;;  %v2938_v46 = vld [vmem:[%s3772_s25 + $0x50] sm:$0xf] }
  0x19   : > { %1171 = vmatpush.bf16.msra.mxu0 %v3607_v6  ;;  %3622 = vmatpush.bf16.msra.mxu2 %v3607_v6  ;;  %v2935_v45 = vor.u32 %v3483_v42, %v2932_v43  ;;  %v3486_v47 = vld [vmem:[%s3772_s25 + $0x54] sm:$0xf0]  ;;  %v3485_v48 = vld [vmem:[%s3772_s25 + $0x54] sm:$0xf]  ;;  %v2940_v49 = vld [vmem:[%s3772_s25 + $0x58] sm:$0xf0] }
  0x1a   : > { %1500 = vmatpush.bf16.msra.mxu1 %v3615_v7  ;;  %3630 = vmatpush.bf16.msra.mxu3 %v3615_v7  ;;  %v2939_v50 = vor.u32 %v3486_v47, %v2938_v46  ;;  %v2943_v51 = vor.u32 %v3485_v48, %v2940_v49  ;;  %v3154_v52 = vld [vmem:[%s3772_s25 + $0x200] sm:$0xf]  ;;  %v3540_v53 = vld [vmem:[%s3772_s25 + $0x204] sm:$0xf0]  ;;  %v3539_v54 = vld [vmem:[%s3772_s25 + $0x204] sm:$0xf] }
  0x1b   : > { %v3155_v55 = vor.u32 %v3540_v53, %v3154_v52  ;;  %v3156_v56 = vld [vmem:[%s3772_s25 + $0x208] sm:$0xf0]  ;;  %v2946_v58 = vld [vmem:[%s3772_s25 + $0x60] sm:$0xf]  ;;  %v3488_v59 = vld [vmem:[%s3772_s25 + $0x64] sm:$0xf0] }
  0x1c   : > { %v3159_v57 = vor.u32 %v3539_v54, %v3156_v56  ;;  %v3487_v60 = vld [vmem:[%s3772_s25 + $0x64] sm:$0xf]  ;;  %v2948_v61 = vld [vmem:[%s3772_s25 + $0x68] sm:$0xf0]  ;;  %v2947_v62 = vor.u32 %v3488_v59, %v2946_v58  ;;  %v3162_v0 = vld [vmem:[%s3772_s25 + $0x210] sm:$0xf] }
  0x1d   : > { %1172 = vmatpush.bf16.msra.mxu0 %v3606_v8  ;;  %3623 = vmatpush.bf16.msra.mxu2 %v3606_v8  ;;  %v2951_v63 = vor.u32 %v3487_v60, %v2948_v61  ;;  %v3542_v1 = vld [vmem:[%s3772_s25 + $0x214] sm:$0xf0]  ;;  %v3541_v3 = vld [vmem:[%s3772_s25 + $0x214] sm:$0xf]  ;;  %v3164_v4 = vld [vmem:[%s3772_s25 + $0x218] sm:$0xf0] }
  0x1e   : > { %1501 = vmatpush.bf16.msra.mxu1 %v3614_v9  ;;  %3631 = vmatpush.bf16.msra.mxu3 %v3614_v9  ;;  %v3163_v2 = vor.u32 %v3542_v1, %v3162_v0  ;;  %v3167_v5 = vor.u32 %v3541_v3, %v3164_v4  ;;  %v2954_v6 = vld [vmem:[%s3772_s25 + $0x70] sm:$0xf]  ;;  %v3490_v7 = vld [vmem:[%s3772_s25 + $0x74] sm:$0xf0]  ;;  %v3489_v8 = vld [vmem:[%s3772_s25 + $0x74] sm:$0xf] }
  0x1f   : > { %v2956_v9 = vld [vmem:[%s3772_s25 + $0x78] sm:$0xf0]  ;;  %v3172_v16 = vld [vmem:[%s3772_s25 + $0x228] sm:$0xf0]  ;;  %v2962_v18 = vld [vmem:[%s3772_s25 + $0x80] sm:$0xf] }
  0x20   : > { %v3492_v19 = vld [vmem:[%s3772_s25 + $0x84] sm:$0xf0]  ;;  %v3546_v28 = vld [vmem:[%s3772_s25 + $0x234] sm:$0xf0]  ;;  %v3545_v29 = vld [vmem:[%s3772_s25 + $0x234] sm:$0xf] }
  0x21   : > { %1173 = vmatpush.bf16.msra.mxu0 %v3605_v10  ;;  %3624 = vmatpush.bf16.msra.mxu2 %v3605_v10  ;;  %v2955_v10 = vor.u32 %v3490_v7, %v2954_v6  ;;  %v2963_v22 = vor.u32 %v3492_v19, %v2962_v18  ;;  %v2970_v42 = vld [vmem:[%s3772_s25 + $0x90] sm:$0xf]  ;;  %v2972_v46 = vld [vmem:[%s3772_s25 + $0x98] sm:$0xf0]  ;;  %v3548_v56 = vld [vmem:[%s3772_s25 + $0x244] sm:$0xf0] }
  0x22   : > { %1502 = vmatpush.bf16.msra.mxu1 %v3613_v11  ;;  %3632 = vmatpush.bf16.msra.mxu3 %v3613_v11  ;;  %v2959_v11 = vor.u32 %v3489_v8, %v2956_v9  ;;  %v2978_v9 = vld [vmem:[%s3772_s25 + $0xa0] sm:$0xf]  ;;  %s2895_s28 = sshll.u32 %s5122_s12, 3 }
  0x23   : > { %s271_s10 = scalar_lea.vmem %s5054_s3, %s2895_s28 }
  0x25   : > { %1174 = vmatpush.bf16.msra.mxu0 %v3604_v12  ;;  %3625 = vmatpush.bf16.msra.mxu2 %v3604_v12  ;;  %v3170_v12 = vld [vmem:[%s3772_s25 + $0x220] sm:$0xf] }
  0x26   : > { %1503 = vmatpush.bf16.msra.mxu1 %v3612_v13  ;;  %3633 = vmatpush.bf16.msra.mxu3 %v3612_v13  ;;  %v3544_v13 = vld [vmem:[%s3772_s25 + $0x224] sm:$0xf0] }
  0x29   : > { %1175 = vmatpush.bf16.msra.mxu0 %v3603_v14  ;;  %3626 = vmatpush.bf16.msra.mxu2 %v3603_v14  ;;  %v3543_v14 = vld [vmem:[%s3772_s25 + $0x224] sm:$0xf] }
  0x2a   : > { %1504 = vmatpush.bf16.msra.mxu1 %v3611_v15  ;;  %3634 = vmatpush.bf16.msra.mxu3 %v3611_v15  ;;  %v3171_v15 = vor.u32 %v3544_v13, %v3170_v12  ;;  %v3175_v17 = vor.u32 %v3543_v14, %v3172_v16  ;;  %v3495_v12 = vld [vmem:[%s3772_s25 + $0xa4] sm:$0xf]  ;;  %v2980_v13 = vld [vmem:[%s3772_s25 + $0xa8] sm:$0xf0] }
  0x2c   : > { %1176 = vmatmul.bf16.vlgmr.msra.gmra.mxu0 %v2899_v20  ;;  %1336 = vmatmul.bf16.vlgmr.msra.gmra.mxu2 %v3155_v55  ;;  %v3491_v20 = vld [vmem:[%s3772_s25 + $0x84] sm:$0xf]  ;;  %v3186_v55 = vld [vmem:[%s3772_s25 + $0x240] sm:$0xf] }
  0x2d   : > { %1505 = vmatmul.bf16.vlgmr.msra.gmra.mxu1 %v2903_v21  ;;  %1665 = vmatmul.bf16.vlgmr.msra.gmra.mxu3 %v3159_v57  ;;  %v2964_v21 = vld [vmem:[%s3772_s25 + $0x88] sm:$0xf0]  ;;  %v3547_v57 = vld [vmem:[%s3772_s25 + $0x244] sm:$0xf]  ;;  %v3187_v61 = vor.u32 %v3548_v56, %v3186_v55 }
  0x2e   : > { %v2967_v23 = vor.u32 %v3491_v20, %v2964_v21  ;;  %v3194_v21 = vld [vmem:[%s3772_s25 + $0x250] sm:$0xf] }
  0x3c   : > { %1181 = vmatmul.bf16.gmra.mxu0 %v2907_v26  ;;  %1341 = vmatmul.bf16.gmra.mxu2 %v3163_v2 }
  0x3d   : > { %1510 = vmatmul.bf16.gmra.mxu1 %v2911_v27  ;;  %1670 = vmatmul.bf16.gmra.mxu3 %v3167_v5  ;;  %v3178_v27 = vld [vmem:[%s3772_s25 + $0x230] sm:$0xf] }
  0x3e   : > { %v3179_v31 = vor.u32 %v3546_v28, %v3178_v27  ;;  %v3196_v28 = vld [vmem:[%s3772_s25 + $0x258] sm:$0xf0] }
  0x4c   : > { %1186 = vmatmul.bf16.gmra.mxu0 %v2915_v32  ;;  %1346 = vmatmul.bf16.gmra.mxu2 %v3171_v15  ;;  %v3180_v32 = vld [vmem:[%s3772_s25 + $0x238] sm:$0xf0] }
  0x4d   : > { %1515 = vmatmul.bf16.gmra.mxu1 %v2919_v33  ;;  %1675 = vmatmul.bf16.gmra.mxu3 %v3175_v17  ;;  %v3183_v33 = vor.u32 %v3545_v29, %v3180_v32  ;;  %v2983_v17 = vor.u32 %v3495_v12, %v2980_v13 }
  0x5c   : > { %1191 = vmatmul.bf16.gmra.mxu0 %v2923_v38  ;;  %1351 = vmatmul.bf16.gmra.mxu2 %v3179_v31 }
  0x5d   : > { %1520 = vmatmul.bf16.gmra.mxu1 %v2927_v39  ;;  %1680 = vmatmul.bf16.gmra.mxu3 %v3183_v33 }
  0x6c   : > { %1196 = vmatmul.bf16.gmra.mxu0 %v2931_v44  ;;  %v3494_v44 = vld [vmem:[%s3772_s25 + $0x94] sm:$0xf0]  ;;  %1356 = vmatmul.bf16.gmra.mxu2 %v3187_v61 }
  0x6d   : > { %1525 = vmatmul.bf16.gmra.mxu1 %v2935_v45  ;;  %v3493_v45 = vld [vmem:[%s3772_s25 + $0x94] sm:$0xf] }
  0x7c   : > { %1201 = vmatmul.bf16.gmra.mxu0 %v2939_v50  ;;  %v2971_v50 = vor.u32 %v3494_v44, %v2970_v42  ;;  %v3497_v42 = vld [vmem:[%s3772_s25 + $0xb4] sm:$0xf] }
  0x7d   : > { %1530 = vmatmul.bf16.gmra.mxu1 %v2943_v51  ;;  %v2975_v51 = vor.u32 %v3493_v45, %v2972_v46 }
  0x8c   : > { %1206 = vmatmul.bf16.gmra.mxu0 %v2947_v62  ;;  %v3188_v62 = vld [vmem:[%s3772_s25 + $0x248] sm:$0xf0] }
  0x8d   : > { %1535 = vmatmul.bf16.gmra.mxu1 %v2951_v63  ;;  %v3191_v0 = vor.u32 %v3547_v57, %v3188_v62 }
  0x8f   : > { %1685 = vmatmul.bf16.gmra.mxu3 %v3191_v0 }
  0x9c   : > { %1211 = vmatmul.bf16.gmra.mxu0 %v2955_v10 }
  0x9d   : > { %1540 = vmatmul.bf16.gmra.mxu1 %v2959_v11  ;;  %v3496_v11 = vld [vmem:[%s3772_s25 + $0xa4] sm:$0xf0] }
  0x9e   : > { %v2979_v16 = vor.u32 %v3496_v11, %v2978_v9  ;;  %v2996_v9 = vld [vmem:[%s3772_s25 + $0xc8] sm:$0xf0] }
  0xa9   : > { %v1177_v24 = vpop.f32.mrf.mxu0 }
  0xaa   : > { %v1506_v25 = vpop.f32.mrf.mxu1 }
  0xab   : > { %v1507_v26 = vadd.f32 %v1506_v25, %v1177_v24 }
  0xac   : > { %1216 = vmatmul.bf16.gmra.mxu0 %v2963_v22  ;;  %v3550_v22 = vld [vmem:[%s3772_s25 + $0x254] sm:$0xf0] }
  0xad   : > { %v1826_v30 = vpack.c.bf16 %v1507_v26, %v1507_v26  ;;  %1545 = vmatmul.bf16.gmra.mxu1 %v2967_v23  ;;  %v2345_v36 = vmul.f32 %v1507_v26, %v1507_v26  ;;  %v2084_v38 = vsel %vm2083_vm1, %v1507_v26, 0.0  ;;  %v3549_v23 = vld [vmem:[%s3772_s25 + $0x254] sm:$0xf]  ;;  %v3195_v27 = vor.u32 %v3550_v22, %v3194_v21 }
  0xaf   : > { %1955 = vst.msk [vmem:[%s3832_s7] sm:$0xf] %vm1954_vm0, %v1826_v30  ;;  %v2473_v47 = vsel %vm2083_vm1, %v2345_v36, 0.0  ;;  %v3199_v30 = vor.u32 %v3549_v23, %v3196_v28  ;;  %1361 = vmatmul.bf16.gmra.mxu2 %v3195_v27 }
  0xb1   : > { %v1179_v34 = vpop.f32.mrf.mxu0  ;;  %1690 = vmatmul.bf16.gmra.mxu3 %v3199_v30 }
  0xb2   : > { %v1508_v35 = vpop.f32.mrf.mxu1 }
  0xb3   : > { %v1509_v37 = vadd.f32 %v1508_v35, %v1179_v34 }
  0xb5   : > { %v1827_v39 = vpack.c.bf16 %v1509_v37, %v1509_v37  ;;  %v2085_v40 = vsel %vm2083_vm1, %v1509_v37, 0.0  ;;  %v2346_v41 = vmul.f32 %v1509_v37, %v1509_v37 }
  0xb6   : > { %v2086_v43 = vadd.f32 %v2085_v40, %v2084_v38 }
  0xb7   : > { %1956 = vst.msk [vmem:[%s3832_s7 + $0x4] sm:$0xf] %vm1954_vm0, %v1827_v39  ;;  %v2474_v48 = vsel %vm2083_vm1, %v2346_v41, 0.0  ;;  %v2986_v39 = vld [vmem:[%s3772_s25 + $0xb0] sm:$0xf] }
  0xb8   : > { %v2475_v49 = vadd.f32 %v2474_v48, %v2473_v47  ;;  %v3498_v41 = vld [vmem:[%s3772_s25 + $0xb4] sm:$0xf0] }
  0xb9   : > { %v1182_v52 = vpop.f32.mrf.mxu0  ;;  %v2987_v46 = vor.u32 %v3498_v41, %v2986_v39  ;;  %v3004_v39 = vld [vmem:[%s3772_s25 + $0xd8] sm:$0xf0] }
  0xba   : > { %v1511_v53 = vpop.f32.mrf.mxu1 }
  0xbb   : > { %v1512_v54 = vadd.f32 %v1511_v53, %v1182_v52  ;;  %v3552_v52 = vld [vmem:[%s3772_s25 + $0x264] sm:$0xf0]  ;;  %v3551_v53 = vld [vmem:[%s3772_s25 + $0x264] sm:$0xf] }
  0xbc   : > { %1221 = vmatmul.bf16.gmra.mxu0 %v2971_v50 }
  0xbd   : > { %v1828_v58 = vpack.c.bf16 %v1512_v54, %v1512_v54  ;;  %v2087_v59 = vsel %vm2083_vm1, %v1512_v54, 0.0  ;;  %v2347_v60 = vmul.f32 %v1512_v54, %v1512_v54  ;;  %1550 = vmatmul.bf16.gmra.mxu1 %v2975_v51  ;;  %v3202_v51 = vld [vmem:[%s3772_s25 + $0x260] sm:$0xf] }
  0xbe   : > { %v2088_v63 = vadd.f32 %v2087_v59, %v2086_v43  ;;  %v2988_v43 = vld [vmem:[%s3772_s25 + $0xb8] sm:$0xf0]  ;;  %v3203_v57 = vor.u32 %v3552_v52, %v3202_v51 }
  0xbf   : > { %1957 = vst.msk [vmem:[%s3832_s7 + $0x8] sm:$0xf] %vm1954_vm0, %v1828_v58  ;;  %v2476_v1 = vsel %vm2083_vm1, %v2347_v60, 0.0  ;;  %v2991_v47 = vor.u32 %v3497_v42, %v2988_v43  ;;  %v3204_v58 = vld [vmem:[%s3772_s25 + $0x268] sm:$0xf0] }
  0xc0   : > { %v2477_v2 = vadd.f32 %v2476_v1, %v2475_v49  ;;  %v3207_v60 = vor.u32 %v3551_v53, %v3204_v58  ;;  %1366 = vmatmul.bf16.gmra.mxu2 %v3203_v57 }
  0xc1   : > { %v1184_v3 = vpop.f32.mrf.mxu0 }
  0xc2   : > { %v1513_v4 = vpop.f32.mrf.mxu1  ;;  %1695 = vmatmul.bf16.gmra.mxu3 %v3207_v60 }
  0xc3   : > { %v1514_v5 = vadd.f32 %v1513_v4, %v1184_v3 }
  0xc5   : > { %v1829_v6 = vpack.c.bf16 %v1514_v5, %v1514_v5  ;;  %v2089_v7 = vsel %vm2083_vm1, %v1514_v5, 0.0  ;;  %v2348_v8 = vmul.f32 %v1514_v5, %v1514_v5  ;;  %v2994_v5 = vld [vmem:[%s3772_s25 + $0xc0] sm:$0xf] }
  0xc6   : > { %v2090_v10 = vadd.f32 %v2089_v7, %v2088_v63  ;;  %v3500_v7 = vld [vmem:[%s3772_s25 + $0xc4] sm:$0xf0] }
  0xc7   : > { %1958 = vst.msk [vmem:[%s3832_s7 + $0xc] sm:$0xf] %vm1954_vm0, %v1829_v6  ;;  %v2478_v14 = vsel %vm2083_vm1, %v2348_v8, 0.0  ;;  %v3499_v8 = vld [vmem:[%s3772_s25 + $0xc4] sm:$0xf]  ;;  %v2995_v12 = vor.u32 %v3500_v7, %v2994_v5 }
  0xc8   : > { %v2479_v15 = vadd.f32 %v2478_v14, %v2477_v2  ;;  %v2999_v13 = vor.u32 %v3499_v8, %v2996_v9  ;;  %v3504_v5 = vld [vmem:[%s3772_s25 + $0xe4] sm:$0xf0]  ;;  %v3012_v7 = vld [vmem:[%s3772_s25 + $0xe8] sm:$0xf0] }
  0xc9   : > { %v1187_v18 = vpop.f32.mrf.mxu0 }
  0xca   : > { %v1516_v19 = vpop.f32.mrf.mxu1 }
  0xcb   : > { %v1517_v20 = vadd.f32 %v1516_v19, %v1187_v18  ;;  %v3554_v18 = vld [vmem:[%s3772_s25 + $0x274] sm:$0xf0]  ;;  %v3553_v19 = vld [vmem:[%s3772_s25 + $0x274] sm:$0xf] }
  0xcc   : > { %1226 = vmatmul.bf16.gmra.mxu0 %v2979_v16 }
  0xcd   : > { %v1830_v24 = vpack.c.bf16 %v1517_v20, %v1517_v20  ;;  %v2091_v25 = vsel %vm2083_vm1, %v1517_v20, 0.0  ;;  %v2349_v26 = vmul.f32 %v1517_v20, %v1517_v20  ;;  %1555 = vmatmul.bf16.gmra.mxu1 %v2983_v17  ;;  %v3210_v17 = vld [vmem:[%s3772_s25 + $0x270] sm:$0xf] }
  0xce   : > { %v2092_v29 = vadd.f32 %v2091_v25, %v2090_v10  ;;  %v3211_v23 = vor.u32 %v3554_v18, %v3210_v17 }
  0xcf   : > { %1959 = vst.msk [vmem:[%s3832_s7 + $0x10] sm:$0xf] %vm1954_vm0, %v1830_v24  ;;  %v2480_v31 = vsel %vm2083_vm1, %v2349_v26, 0.0  ;;  %v3212_v24 = vld [vmem:[%s3772_s25 + $0x278] sm:$0xf0] }
  0xd0   : > { %v2481_v32 = vadd.f32 %v2480_v31, %v2479_v15  ;;  %v3215_v26 = vor.u32 %v3553_v19, %v3212_v24  ;;  %1371 = vmatmul.bf16.gmra.mxu2 %v3211_v23  ;;  %v3558_v24 = vld [vmem:[%s3772_s25 + $0x294] sm:$0xf0] }
  0xd1   : > { %v1189_v33 = vpop.f32.mrf.mxu0 }
  0xd2   : > { %v1518_v34 = vpop.f32.mrf.mxu1  ;;  %1700 = vmatmul.bf16.gmra.mxu3 %v3215_v26 }
  0xd3   : > { %v1519_v35 = vadd.f32 %v1518_v34, %v1189_v33 }
  0xd5   : > { %v1831_v36 = vpack.c.bf16 %v1519_v35, %v1519_v35  ;;  %v2093_v37 = vsel %vm2083_vm1, %v1519_v35, 0.0  ;;  %v2350_v38 = vmul.f32 %v1519_v35, %v1519_v35  ;;  %v3002_v35 = vld [vmem:[%s3772_s25 + $0xd0] sm:$0xf] }
  0xd6   : > { %v2094_v40 = vadd.f32 %v2093_v37, %v2092_v29  ;;  %v3502_v37 = vld [vmem:[%s3772_s25 + $0xd4] sm:$0xf0] }
  0xd7   : > { %1960 = vst.msk [vmem:[%s3832_s7 + $0x14] sm:$0xf] %vm1954_vm0, %v1831_v36  ;;  %v2482_v44 = vsel %vm2083_vm1, %v2350_v38, 0.0  ;;  %v3501_v38 = vld [vmem:[%s3772_s25 + $0xd4] sm:$0xf]  ;;  %v3003_v42 = vor.u32 %v3502_v37, %v3002_v35 }
  0xd8   : > { %v2483_v45 = vadd.f32 %v2482_v44, %v2481_v32  ;;  %v3007_v43 = vor.u32 %v3501_v38, %v3004_v39 }
  0xd9   : > { %v1192_v48 = vpop.f32.mrf.mxu0 }
  0xda   : > { %v1521_v49 = vpop.f32.mrf.mxu1 }
  0xdb   : > { %v1522_v50 = vadd.f32 %v1521_v49, %v1192_v48  ;;  %v3556_v48 = vld [vmem:[%s3772_s25 + $0x284] sm:$0xf0]  ;;  %v3555_v49 = vld [vmem:[%s3772_s25 + $0x284] sm:$0xf] }
  0xdc   : > { %1231 = vmatmul.bf16.gmra.mxu0 %v2987_v46 }
  0xdd   : > { %v1832_v54 = vpack.c.bf16 %v1522_v50, %v1522_v50  ;;  %v2095_v55 = vsel %vm2083_vm1, %v1522_v50, 0.0  ;;  %v2351_v56 = vmul.f32 %v1522_v50, %v1522_v50  ;;  %1560 = vmatmul.bf16.gmra.mxu1 %v2991_v47  ;;  %v3218_v47 = vld [vmem:[%s3772_s25 + $0x280] sm:$0xf] }
  0xde   : > { %v2096_v59 = vadd.f32 %v2095_v55, %v2094_v40  ;;  %v3219_v53 = vor.u32 %v3556_v48, %v3218_v47 }
  0xdf   : > { %1961 = vst.msk [vmem:[%s3832_s7 + $0x18] sm:$0xf] %vm1954_vm0, %v1832_v54  ;;  %v2484_v61 = vsel %vm2083_vm1, %v2351_v56, 0.0  ;;  %v3220_v54 = vld [vmem:[%s3772_s25 + $0x288] sm:$0xf0] }
  0xe0   : > { %v2485_v62 = vadd.f32 %v2484_v61, %v2483_v45  ;;  %v3223_v56 = vor.u32 %v3555_v49, %v3220_v54  ;;  %1376 = vmatmul.bf16.gmra.mxu2 %v3219_v53 }
  0xe1   : > { %v1194_v63 = vpop.f32.mrf.mxu0 }
  0xe2   : > { %v1523_v0 = vpop.f32.mrf.mxu1  ;;  %1705 = vmatmul.bf16.gmra.mxu3 %v3223_v56 }
  0xe3   : > { %v1524_v1 = vadd.f32 %v1523_v0, %v1194_v63  ;;  %v1666_v63 = vpop.f32.mrf.mxu3 }
  0xe5   : > { %v1833_v2 = vpack.c.bf16 %v1524_v1, %v1524_v1  ;;  %v2097_v3 = vsel %vm2083_vm1, %v1524_v1, 0.0  ;;  %v2352_v4 = vmul.f32 %v1524_v1, %v1524_v1 }
  0xe6   : > { %v2098_v6 = vadd.f32 %v2097_v3, %v2096_v59  ;;  %v3010_v3 = vld [vmem:[%s3772_s25 + $0xe0] sm:$0xf] }
  0xe7   : > { %1962 = vst.msk [vmem:[%s3832_s7 + $0x1c] sm:$0xf] %vm1954_vm0, %v1833_v2  ;;  %v2486_v10 = vsel %vm2083_vm1, %v2352_v4, 0.0 }
  0xe8   : > { %v2487_v11 = vadd.f32 %v2486_v10, %v2485_v62  ;;  %v1337_v62 = vpop.f32.mrf.mxu2 }
  0xe9   : > { %v1197_v14 = vpop.f32.mrf.mxu0  ;;  %v3930_v10 = vadd.f32 %v1666_v63, %v1337_v62  ;;  %v3560_v62 = vld [vmem:[%s3772_s25 + $0x2a4] sm:$0xf0]  ;;  %v3559_v63 = vld [vmem:[%s3772_s25 + $0x2a4] sm:$0xf] }
  0xea   : > { %v1526_v15 = vpop.f32.mrf.mxu1 }
  0xeb   : > { %v1527_v16 = vadd.f32 %v1526_v15, %v1197_v14  ;;  %v1890_v15 = vpack.c.bf16 %v3930_v10, %v3930_v10  ;;  %v1668_v18 = vpop.f32.mrf.mxu3 }
  0xec   : > { %1236 = vmatmul.bf16.gmra.mxu0 %v2995_v12 }
  0xed   : > { %v1834_v20 = vpack.c.bf16 %v1527_v16, %v1527_v16  ;;  %v2099_v21 = vsel %vm2083_vm1, %v1527_v16, 0.0  ;;  %v2353_v22 = vmul.f32 %v1527_v16, %v1527_v16  ;;  %1565 = vmatmul.bf16.gmra.mxu1 %v2999_v13  ;;  %2019 = vst.msk [vmem:[%s3832_s7 + $0x100] sm:$0xf] %vm1954_vm0, %v1890_v15 }
  0xee   : > { %v2100_v25 = vadd.f32 %v2099_v21, %v2098_v6  ;;  %v3503_v6 = vld [vmem:[%s3772_s25 + $0xe4] sm:$0xf] }
  0xef   : > { %1963 = vst.msk [vmem:[%s3832_s7 + $0x20] sm:$0xf] %vm1954_vm0, %v1834_v20  ;;  %v2488_v27 = vsel %vm2083_vm1, %v2353_v22, 0.0  ;;  %v3015_v12 = vor.u32 %v3503_v6, %v3012_v7  ;;  %v3226_v20 = vld [vmem:[%s3772_s25 + $0x290] sm:$0xf] }
  0xf0   : > { %v2489_v28 = vadd.f32 %v2488_v27, %v2487_v11  ;;  %v3011_v11 = vor.u32 %v3504_v5, %v3010_v3  ;;  %v1339_v17 = vpop.f32.mrf.mxu2 }
  0xf1   : > { %v1199_v29 = vpop.f32.mrf.mxu0  ;;  %v3936_v19 = vadd.f32 %v1668_v18, %v1339_v17  ;;  %v3508_v18 = vld [vmem:[%s3772_s25 + $0x104] sm:$0xf0] }
  0xf2   : > { %v1528_v30 = vpop.f32.mrf.mxu1 }
  0xf3   : > { %v1529_v31 = vadd.f32 %v1528_v30, %v1199_v29  ;;  %v1891_v27 = vpack.c.bf16 %v3936_v19, %v3936_v19  ;;  %v3227_v30 = vor.u32 %v3558_v24, %v3226_v20  ;;  %v1671_v37 = vpop.f32.mrf.mxu3  ;;  %v3507_v20 = vld [vmem:[%s3772_s25 + $0x104] sm:$0xf] }
  0xf5   : > { %v1835_v32 = vpack.c.bf16 %v1529_v31, %v1529_v31  ;;  %v2101_v33 = vsel %vm2083_vm1, %v1529_v31, 0.0  ;;  %v2354_v34 = vmul.f32 %v1529_v31, %v1529_v31  ;;  %2020 = vst.msk [vmem:[%s3832_s7 + $0x104] sm:$0xf] %vm1954_vm0, %v1891_v27  ;;  %1381 = vmatmul.bf16.gmra.mxu2 %v3227_v30 }
  0xf6   : > { %v2102_v36 = vadd.f32 %v2101_v33, %v2100_v25  ;;  %v3557_v25 = vld [vmem:[%s3772_s25 + $0x294] sm:$0xf] }
  0xf7   : > { %1964 = vst.msk [vmem:[%s3832_s7 + $0x24] sm:$0xf] %vm1954_vm0, %v1835_v32  ;;  %v2490_v40 = vsel %vm2083_vm1, %v2354_v34, 0.0 }
  0xf8   : > { %v2491_v41 = vadd.f32 %v2490_v40, %v2489_v28  ;;  %v3228_v28 = vld [vmem:[%s3772_s25 + $0x298] sm:$0xf0] }
  0xf9   : > { %v1202_v44 = vpop.f32.mrf.mxu0  ;;  %v3231_v31 = vor.u32 %v3557_v25, %v3228_v28 }
  0xfa   : > { %v1531_v45 = vpop.f32.mrf.mxu1 }
  0xfb   : > { %v1532_v46 = vadd.f32 %v1531_v45, %v1202_v44  ;;  %1710 = vmatmul.bf16.gmra.mxu3 %v3231_v31  ;;  %v3505_v44 = vld [vmem:[%s3772_s25 + $0xf4] sm:$0xf]  ;;  %v3020_v45 = vld [vmem:[%s3772_s25 + $0xf8] sm:$0xf0]  ;;  %v1673_v56 = vpop.f32.mrf.mxu3 }
  0xfc   : > { %1241 = vmatmul.bf16.gmra.mxu0 %v3003_v42 }
  0xfd   : > { %v1836_v50 = vpack.c.bf16 %v1532_v46, %v1532_v46  ;;  %v2103_v51 = vsel %vm2083_vm1, %v1532_v46, 0.0  ;;  %v2355_v52 = vmul.f32 %v1532_v46, %v1532_v46  ;;  %1570 = vmatmul.bf16.gmra.mxu1 %v3007_v43  ;;  %v3506_v43 = vld [vmem:[%s3772_s25 + $0xf4] sm:$0xf0] }
  0xfe   : > { %v2104_v55 = vadd.f32 %v2103_v51, %v2102_v36  ;;  %v1342_v36 = vpop.f32.mrf.mxu2 }
  0xff   : > { %1965 = vst.msk [vmem:[%s3832_s7 + $0x28] sm:$0xf] %vm1954_vm0, %v1836_v50  ;;  %v2492_v57 = vsel %vm2083_vm1, %v2355_v52, 0.0  ;;  %v3958_v48 = vadd.f32 %v1671_v37, %v1342_v36  ;;  %v3023_v50 = vor.u32 %v3505_v44, %v3020_v45 }
 0x100   : > { %v2493_v58 = vadd.f32 %v2492_v57, %v2491_v41  ;;  %v3018_v41 = vld [vmem:[%s3772_s25 + $0xf0] sm:$0xf] }
 0x101   : > { %v1204_v59 = vpop.f32.mrf.mxu0  ;;  %v3019_v49 = vor.u32 %v3506_v43, %v3018_v41  ;;  %v1892_v53 = vpack.c.bf16 %v3958_v48, %v3958_v48 }
 0x102   : > { %v1533_v60 = vpop.f32.mrf.mxu1 }
 0x103   : > { %v1534_v61 = vadd.f32 %v1533_v60, %v1204_v59  ;;  %2021 = vst.msk [vmem:[%s3832_s7 + $0x108] sm:$0xf] %vm1954_vm0, %v1892_v53 }
 0x105   : > { %v1837_v0 = vpack.c.bf16 %v1534_v61, %v1534_v61  ;;  %v2105_v1 = vsel %vm2083_vm1, %v1534_v61, 0.0  ;;  %v2356_v2 = vmul.f32 %v1534_v61, %v1534_v61 }
 0x106   : > { %v2106_v4 = vadd.f32 %v2105_v1, %v2104_v55  ;;  %v1344_v55 = vpop.f32.mrf.mxu2 }
 0x107   : > { %1966 = vst.msk [vmem:[%s3832_s7 + $0x2c] sm:$0xf] %vm1954_vm0, %v1837_v0  ;;  %v2494_v8 = vsel %vm2083_vm1, %v2356_v2, 0.0  ;;  %v3964_v57 = vadd.f32 %v1673_v56, %v1344_v55  ;;  %v3236_v2 = vld [vmem:[%s3772_s25 + $0x2a8] sm:$0xf0] }
 0x108   : > { %v2495_v9 = vadd.f32 %v2494_v8, %v2493_v58  ;;  %v3234_v58 = vld [vmem:[%s3772_s25 + $0x2a0] sm:$0xf]  ;;  %v3239_v5 = vor.u32 %v3559_v63, %v3236_v2  ;;  %v3034_v56 = vld [vmem:[%s3772_s25 + $0x110] sm:$0xf] }
 0x109   : > { %v1207_v13 = vpop.f32.mrf.mxu0  ;;  %v1893_v1 = vpack.c.bf16 %v3964_v57, %v3964_v57 }
 0x10a   : > { %v1536_v14 = vpop.f32.mrf.mxu1 }
 0x10b   : > { %v1537_v16 = vadd.f32 %v1536_v14, %v1207_v13  ;;  %2022 = vst.msk [vmem:[%s3832_s7 + $0x10c] sm:$0xf] %vm1954_vm0, %v1893_v1  ;;  %1715 = vmatmul.bf16.gmra.mxu3 %v3239_v5 }
 0x10c   : > { %1246 = vmatmul.bf16.gmra.mxu0 %v3011_v11 }
 0x10d   : > { %v1838_v21 = vpack.c.bf16 %v1537_v16, %v1537_v16  ;;  %v2107_v22 = vsel %vm2083_vm1, %v1537_v16, 0.0  ;;  %v2357_v23 = vmul.f32 %v1537_v16, %v1537_v16  ;;  %1575 = vmatmul.bf16.gmra.mxu1 %v3015_v12  ;;  %v1676_v12 = vpop.f32.mrf.mxu3  ;;  %v3026_v16 = vld [vmem:[%s3772_s25 + $0x100] sm:$0xf] }
 0x10e   : > { %v2108_v26 = vadd.f32 %v2107_v22, %v2106_v4  ;;  %v3235_v4 = vor.u32 %v3560_v62, %v3234_v58  ;;  %v1347_v11 = vpop.f32.mrf.mxu2  ;;  %v3027_v25 = vor.u32 %v3508_v18, %v3026_v16  ;;  %v3563_v16 = vld [vmem:[%s3772_s25 + $0x2c4] sm:$0xf] }
 0x10f   : > { %1967 = vst.msk [vmem:[%s3832_s7 + $0x30] sm:$0xf] %vm1954_vm0, %v1838_v21  ;;  %v2496_v29 = vsel %vm2083_vm1, %v2357_v23, 0.0  ;;  %v3028_v21 = vld [vmem:[%s3772_s25 + $0x108] sm:$0xf0]  ;;  %v3986_v24 = vadd.f32 %v1676_v12, %v1347_v11 }
 0x110   : > { %v2497_v32 = vadd.f32 %v2496_v29, %v2495_v9  ;;  %1386 = vmatmul.bf16.gmra.mxu2 %v3235_v4  ;;  %v3250_v11 = vld [vmem:[%s3772_s25 + $0x2c0] sm:$0xf] }
 0x111   : > { %v1209_v33 = vpop.f32.mrf.mxu0  ;;  %v1894_v29 = vpack.c.bf16 %v3986_v24, %v3986_v24 }
 0x112   : > { %v1538_v34 = vpop.f32.mrf.mxu1 }
 0x113   : > { %v1539_v35 = vadd.f32 %v1538_v34, %v1209_v33  ;;  %2023 = vst.msk [vmem:[%s3832_s7 + $0x110] sm:$0xf] %vm1954_vm0, %v1894_v29  ;;  %v3242_v34 = vld [vmem:[%s3772_s25 + $0x2b0] sm:$0xf] }
 0x115   : > { %v1839_v38 = vpack.c.bf16 %v1539_v35, %v1539_v35  ;;  %v2109_v39 = vsel %vm2083_vm1, %v1539_v35, 0.0  ;;  %v2358_v40 = vmul.f32 %v1539_v35, %v1539_v35 }
 0x116   : > { %v2110_v42 = vadd.f32 %v2109_v39, %v2108_v26  ;;  %v3031_v26 = vor.u32 %v3507_v20, %v3028_v21  ;;  %v1349_v31 = vpop.f32.mrf.mxu2  ;;  %v3561_v39 = vld [vmem:[%s3772_s25 + $0x2b4] sm:$0xf]  ;;  %v3252_v20 = vld [vmem:[%s3772_s25 + $0x2c8] sm:$0xf0] }
 0x117   : > { %1968 = vst.msk [vmem:[%s3832_s7 + $0x34] sm:$0xf] %vm1954_vm0, %v1839_v38  ;;  %v2498_v46 = vsel %vm2083_vm1, %v2358_v40, 0.0  ;;  %v3562_v38 = vld [vmem:[%s3772_s25 + $0x2b4] sm:$0xf0] }
 0x118   : > { %v2499_v47 = vadd.f32 %v2498_v46, %v2497_v32  ;;  %v1678_v32 = vpop.f32.mrf.mxu3  ;;  %v3243_v44 = vor.u32 %v3562_v38, %v3242_v34  ;;  %v3511_v38 = vld [vmem:[%s3772_s25 + $0x124] sm:$0xf] }
 0x119   : > { %v1212_v51 = vpop.f32.mrf.mxu0  ;;  %v3992_v33 = vadd.f32 %v1678_v32, %v1349_v31 }
 0x11a   : > { %v1541_v52 = vpop.f32.mrf.mxu1 }
 0x11b   : > { %v1542_v54 = vadd.f32 %v1541_v52, %v1212_v51  ;;  %v1895_v41 = vpack.c.bf16 %v3992_v33, %v3992_v33 }
 0x11c   : > { %1251 = vmatmul.bf16.gmra.mxu0 %v3019_v49 }
 0x11d   : > { %v1840_v59 = vpack.c.bf16 %v1542_v54, %v1542_v54  ;;  %v2111_v60 = vsel %vm2083_vm1, %v1542_v54, 0.0  ;;  %v2359_v61 = vmul.f32 %v1542_v54, %v1542_v54  ;;  %1580 = vmatmul.bf16.gmra.mxu1 %v3023_v50  ;;  %2024 = vst.msk [vmem:[%s3832_s7 + $0x114] sm:$0xf] %vm1954_vm0, %v1895_v41 }
 0x11e   : > { %v2112_v0 = vadd.f32 %v2111_v60, %v2110_v42  ;;  %v3244_v42 = vld [vmem:[%s3772_s25 + $0x2b8] sm:$0xf0]  ;;  %v1352_v51 = vpop.f32.mrf.mxu2  ;;  %v3509_v60 = vld [vmem:[%s3772_s25 + $0x114] sm:$0xf] }
 0x11f   : > { %1969 = vst.msk [vmem:[%s3832_s7 + $0x38] sm:$0xf] %vm1954_vm0, %v1840_v59  ;;  %v2500_v3 = vsel %vm2083_vm1, %v2359_v61, 0.0  ;;  %v3247_v45 = vor.u32 %v3561_v39, %v3244_v42  ;;  %v3510_v59 = vld [vmem:[%s3772_s25 + $0x114] sm:$0xf0] }
 0x120   : > { %v2501_v6 = vadd.f32 %v2500_v3, %v2499_v47  ;;  %1391 = vmatmul.bf16.gmra.mxu2 %v3243_v44  ;;  %v1681_v52 = vpop.f32.mrf.mxu3  ;;  %v3036_v61 = vld [vmem:[%s3772_s25 + $0x118] sm:$0xf0]  ;;  %v3035_v1 = vor.u32 %v3510_v59, %v3034_v56  ;;  %v3044_v39 = vld [vmem:[%s3772_s25 + $0x128] sm:$0xf0]  ;;  %v3565_v59 = vld [vmem:[%s3772_s25 + $0x2d4] sm:$0xf] }
 0x121   : > { %v1214_v7 = vpop.f32.mrf.mxu0  ;;  %1720 = vmatmul.bf16.gmra.mxu3 %v3247_v45  ;;  %v3039_v2 = vor.u32 %v3509_v60, %v3036_v61  ;;  %v3047_v44 = vor.u32 %v3511_v38, %v3044_v39  ;;  %v3568_v38 = vld [vmem:[%s3772_s25 + $0x2e4] sm:$0xf0]  ;;  %v3567_v39 = vld [vmem:[%s3772_s25 + $0x2e4] sm:$0xf] }
 0x122   : > { %v1543_v8 = vpop.f32.mrf.mxu1 }
 0x123   : > { %v1544_v9 = vadd.f32 %v1543_v8, %v1214_v7 }
 0x125   : > { %v1841_v13 = vpack.c.bf16 %v1544_v9, %v1544_v9  ;;  %v2113_v14 = vsel %vm2083_vm1, %v1544_v9, 0.0  ;;  %v2360_v15 = vmul.f32 %v1544_v9, %v1544_v9 }
 0x126   : > { %v2114_v17 = vadd.f32 %v2113_v14, %v2112_v0  ;;  %v4014_v0 = vadd.f32 %v1681_v52, %v1352_v51  ;;  %v1354_v7 = vpop.f32.mrf.mxu2 }
 0x127   : > { %1970 = vst.msk [vmem:[%s3832_s7 + $0x3c] sm:$0xf] %vm1954_vm0, %v1841_v13  ;;  %v2502_v22 = vsel %vm2083_vm1, %v2360_v15, 0.0  ;;  %v3564_v15 = vld [vmem:[%s3772_s25 + $0x2c4] sm:$0xf0] }
 0x128   : > { %v2503_v23 = vadd.f32 %v2502_v22, %v2501_v6  ;;  %v1896_v5 = vpack.c.bf16 %v4014_v0, %v4014_v0  ;;  %v1683_v8 = vpop.f32.mrf.mxu3  ;;  %v3251_v22 = vor.u32 %v3564_v15, %v3250_v11 }
 0x129   : > { %v1217_v27 = vpop.f32.mrf.mxu0  ;;  %v4020_v9 = vadd.f32 %v1683_v8, %v1354_v7 }
 0x12a   : > { %v1546_v28 = vpop.f32.mrf.mxu1  ;;  %2025 = vst.msk [vmem:[%s3832_s7 + $0x118] sm:$0xf] %vm1954_vm0, %v1896_v5 }
 0x12b   : > { %v1547_v30 = vadd.f32 %v1546_v28, %v1217_v27  ;;  %v1897_v18 = vpack.c.bf16 %v4020_v9, %v4020_v9 }
 0x12c   : > { %1256 = vmatmul.bf16.gmra.mxu0 %v3027_v25 }
 0x12d   : > { %v1842_v35 = vpack.c.bf16 %v1547_v30, %v1547_v30  ;;  %v2115_v36 = vsel %vm2083_vm1, %v1547_v30, 0.0  ;;  %v2361_v37 = vmul.f32 %v1547_v30, %v1547_v30  ;;  %1585 = vmatmul.bf16.gmra.mxu1 %v3031_v26  ;;  %2026 = vst.msk [vmem:[%s3832_s7 + $0x11c] sm:$0xf] %vm1954_vm0, %v1897_v18  ;;  %v3052_v18 = vld [vmem:[%s3772_s25 + $0x138] sm:$0xf0] }
 0x12e   : > { %v2116_v40 = vadd.f32 %v2115_v36, %v2114_v17  ;;  %v1357_v29 = vpop.f32.mrf.mxu2 }
 0x12f   : > { %1971 = vst.msk [vmem:[%s3832_s7 + $0x40] sm:$0xf] %vm1954_vm0, %v1842_v35  ;;  %v2504_v43 = vsel %vm2083_vm1, %v2361_v37, 0.0  ;;  %v3042_v35 = vld [vmem:[%s3772_s25 + $0x120] sm:$0xf] }
 0x130   : > { %v2505_v46 = vadd.f32 %v2504_v43, %v2503_v23  ;;  %v3255_v23 = vor.u32 %v3563_v16, %v3252_v20  ;;  %1396 = vmatmul.bf16.gmra.mxu2 %v3251_v22  ;;  %v1686_v30 = vpop.f32.mrf.mxu3  ;;  %v3512_v37 = vld [vmem:[%s3772_s25 + $0x124] sm:$0xf0]  ;;  %v3514_v16 = vld [vmem:[%s3772_s25 + $0x134] sm:$0xf0] }
 0x131   : > { %v1219_v47 = vpop.f32.mrf.mxu0  ;;  %v4042_v42 = vadd.f32 %v1686_v30, %v1357_v29  ;;  %v3043_v43 = vor.u32 %v3512_v37, %v3042_v35 }
 0x132   : > { %v1548_v49 = vpop.f32.mrf.mxu1  ;;  %1725 = vmatmul.bf16.gmra.mxu3 %v3255_v23 }
 0x133   : > { %v1549_v50 = vadd.f32 %v1548_v49, %v1219_v47  ;;  %v1898_v47 = vpack.c.bf16 %v4042_v42, %v4042_v42 }
 0x135   : > { %v1843_v53 = vpack.c.bf16 %v1549_v50, %v1549_v50  ;;  %v2117_v54 = vsel %vm2083_vm1, %v1549_v50, 0.0  ;;  %v2362_v55 = vmul.f32 %v1549_v50, %v1549_v50  ;;  %2027 = vst.msk [vmem:[%s3832_s7 + $0x120] sm:$0xf] %vm1954_vm0, %v1898_v47 }
 0x136   : > { %v2118_v58 = vadd.f32 %v2117_v54, %v2116_v40  ;;  %v1359_v50 = vpop.f32.mrf.mxu2 }
 0x137   : > { %1972 = vst.msk [vmem:[%s3832_s7 + $0x44] sm:$0xf] %vm1954_vm0, %v1843_v53  ;;  %v2506_v62 = vsel %vm2083_vm1, %v2362_v55, 0.0  ;;  %v3258_v53 = vld [vmem:[%s3772_s25 + $0x2d0] sm:$0xf] }
 0x138   : > { %v2507_v63 = vadd.f32 %v2506_v62, %v2505_v46  ;;  %v1688_v51 = vpop.f32.mrf.mxu3  ;;  %v3260_v62 = vld [vmem:[%s3772_s25 + $0x2d8] sm:$0xf0] }
 0x139   : > { %v1222_v3 = vpop.f32.mrf.mxu0  ;;  %v4048_v52 = vadd.f32 %v1688_v51, %v1359_v50 }
 0x13a   : > { %v1551_v4 = vpop.f32.mrf.mxu1 }
 0x13b   : > { %v1552_v6 = vadd.f32 %v1551_v4, %v1222_v3  ;;  %v1899_v61 = vpack.c.bf16 %v4048_v52, %v4048_v52 }
 0x13c   : > { %1261 = vmatmul.bf16.gmra.mxu0 %v3035_v1 }
 0x13d   : > { %v1844_v12 = vpack.c.bf16 %v1552_v6, %v1552_v6  ;;  %v2119_v13 = vsel %vm2083_vm1, %v1552_v6, 0.0  ;;  %v2363_v14 = vmul.f32 %v1552_v6, %v1552_v6  ;;  %1590 = vmatmul.bf16.gmra.mxu1 %v3039_v2  ;;  %v3263_v2 = vor.u32 %v3565_v59, %v3260_v62  ;;  %2028 = vst.msk [vmem:[%s3832_s7 + $0x124] sm:$0xf] %vm1954_vm0, %v1899_v61  ;;  %v3058_v59 = vld [vmem:[%s3772_s25 + $0x140] sm:$0xf] }
 0x13e   : > { %v2120_v17 = vadd.f32 %v2119_v13, %v2118_v58  ;;  %v3566_v58 = vld [vmem:[%s3772_s25 + $0x2d4] sm:$0xf0]  ;;  %v1362_v7 = vpop.f32.mrf.mxu2  ;;  %v3516_v61 = vld [vmem:[%s3772_s25 + $0x144] sm:$0xf0]  ;;  %v3515_v62 = vld [vmem:[%s3772_s25 + $0x144] sm:$0xf] }
 0x13f   : > { %1973 = vst.msk [vmem:[%s3832_s7 + $0x48] sm:$0xf] %vm1954_vm0, %v1844_v12  ;;  %v2508_v21 = vsel %vm2083_vm1, %v2363_v14, 0.0  ;;  %v3259_v1 = vor.u32 %v3566_v58, %v3258_v53  ;;  %v3050_v14 = vld [vmem:[%s3772_s25 + $0x130] sm:$0xf] }
 0x140   : > { %v2509_v25 = vadd.f32 %v2508_v21, %v2507_v63  ;;  %v1691_v8 = vpop.f32.mrf.mxu3  ;;  %v3051_v23 = vor.u32 %v3514_v16, %v3050_v14 }
 0x141   : > { %v1224_v26 = vpop.f32.mrf.mxu0  ;;  %1401 = vmatmul.bf16.gmra.mxu2 %v3259_v1  ;;  %v4070_v22 = vadd.f32 %v1691_v8, %v1362_v7 }
 0x142   : > { %v1553_v27 = vpop.f32.mrf.mxu1  ;;  %1730 = vmatmul.bf16.gmra.mxu3 %v3263_v2 }
 0x143   : > { %v1554_v28 = vadd.f32 %v1553_v27, %v1224_v26 }
 0x145   : > { %v1845_v31 = vpack.c.bf16 %v1554_v28, %v1554_v28  ;;  %v2121_v32 = vsel %vm2083_vm1, %v1554_v28, 0.0  ;;  %v2364_v34 = vmul.f32 %v1554_v28, %v1554_v28  ;;  %v1900_v28 = vpack.c.bf16 %v4070_v22, %v4070_v22 }
 0x146   : > { %v2122_v36 = vadd.f32 %v2121_v32, %v2120_v17  ;;  %v3513_v17 = vld [vmem:[%s3772_s25 + $0x134] sm:$0xf]  ;;  %v1364_v30 = vpop.f32.mrf.mxu2 }
 0x147   : > { %1974 = vst.msk [vmem:[%s3832_s7 + $0x4c] sm:$0xf] %vm1954_vm0, %v1845_v31  ;;  %v2510_v40 = vsel %vm2083_vm1, %v2364_v34, 0.0  ;;  %v3266_v34 = vld [vmem:[%s3772_s25 + $0x2e0] sm:$0xf] }
 0x148   : > { %v2511_v41 = vadd.f32 %v2510_v40, %v2509_v25  ;;  %v3055_v25 = vor.u32 %v3513_v17, %v3052_v18  ;;  %v1693_v31 = vpop.f32.mrf.mxu3  ;;  %2029 = vst.msk [vmem:[%s3832_s7 + $0x128] sm:$0xf] %vm1954_vm0, %v1900_v28 }
 0x149   : > { %v1227_v45 = vpop.f32.mrf.mxu0  ;;  %v4076_v32 = vadd.f32 %v1693_v31, %v1364_v30 }
 0x14a   : > { %v1556_v46 = vpop.f32.mrf.mxu1 }
 0x14b   : > { %v1557_v49 = vadd.f32 %v1556_v46, %v1227_v45  ;;  %v3267_v45 = vor.u32 %v3568_v38, %v3266_v34 }
 0x14c   : > { %1266 = vmatmul.bf16.gmra.mxu0 %v3043_v43  ;;  %v3268_v43 = vld [vmem:[%s3772_s25 + $0x2e8] sm:$0xf0] }
 0x14d   : > { %v1846_v54 = vpack.c.bf16 %v1557_v49, %v1557_v49  ;;  %v2123_v55 = vsel %vm2083_vm1, %v1557_v49, 0.0  ;;  %v2365_v56 = vmul.f32 %v1557_v49, %v1557_v49  ;;  %1595 = vmatmul.bf16.gmra.mxu1 %v3047_v44  ;;  %v3271_v46 = vor.u32 %v3567_v39, %v3268_v43 }
 0x14e   : > { %v2124_v60 = vadd.f32 %v2123_v55, %v2122_v36  ;;  %v1367_v53 = vpop.f32.mrf.mxu2 }
 0x14f   : > { %1975 = vst.msk [vmem:[%s3832_s7 + $0x50] sm:$0xf] %vm1954_vm0, %v1846_v54  ;;  %v2512_v63 = vsel %vm2083_vm1, %v2365_v56, 0.0 }
 0x150   : > { %v2513_v3 = vadd.f32 %v2512_v63, %v2511_v41  ;;  %v1901_v41 = vpack.c.bf16 %v4076_v32, %v4076_v32  ;;  %v1696_v54 = vpop.f32.mrf.mxu3  ;;  %v3060_v63 = vld [vmem:[%s3772_s25 + $0x148] sm:$0xf0] }
 0x151   : > { %v1229_v4 = vpop.f32.mrf.mxu0  ;;  %1406 = vmatmul.bf16.gmra.mxu2 %v3267_v45  ;;  %v3517_v45 = vld [vmem:[%s3772_s25 + $0x154] sm:$0xf] }
 0x152   : > { %v1558_v5 = vpop.f32.mrf.mxu1  ;;  %2030 = vst.msk [vmem:[%s3832_s7 + $0x12c] sm:$0xf] %vm1954_vm0, %v1901_v41  ;;  %1735 = vmatmul.bf16.gmra.mxu3 %v3271_v46  ;;  %v3066_v41 = vld [vmem:[%s3772_s25 + $0x150] sm:$0xf]  ;;  %v3068_v46 = vld [vmem:[%s3772_s25 + $0x158] sm:$0xf0] }
 0x153   : > { %v1559_v6 = vadd.f32 %v1558_v5, %v1229_v4  ;;  %v3059_v4 = vor.u32 %v3516_v61, %v3058_v59  ;;  %v3063_v5 = vor.u32 %v3515_v62, %v3060_v63  ;;  %v3282_v62 = vld [vmem:[%s3772_s25 + $0x300] sm:$0xf] }
 0x155   : > { %v1847_v11 = vpack.c.bf16 %v1559_v6, %v1559_v6  ;;  %v2125_v12 = vsel %vm2083_vm1, %v1559_v6, 0.0  ;;  %v2366_v13 = vmul.f32 %v1559_v6, %v1559_v6 }
 0x156   : > { %v2126_v15 = vadd.f32 %v2125_v12, %v2124_v60  ;;  %v1369_v12 = vpop.f32.mrf.mxu2 }
 0x157   : > { %1976 = vst.msk [vmem:[%s3832_s7 + $0x54] sm:$0xf] %vm1954_vm0, %v1847_v11  ;;  %v2514_v20 = vsel %vm2083_vm1, %v2366_v13, 0.0 }
 0x158   : > { %v2515_v21 = vadd.f32 %v2514_v20, %v2513_v3  ;;  %v4098_v3 = vadd.f32 %v1696_v54, %v1367_v53  ;;  %v1698_v13 = vpop.f32.mrf.mxu3  ;;  %v3570_v20 = vld [vmem:[%s3772_s25 + $0x2f4] sm:$0xf0]  ;;  %v3071_v53 = vor.u32 %v3517_v45, %v3068_v46 }
 0x159   : > { %v1232_v26 = vpop.f32.mrf.mxu0  ;;  %v4104_v14 = vadd.f32 %v1698_v13, %v1369_v12 }
 0x15a   : > { %v1561_v27 = vpop.f32.mrf.mxu1  ;;  %v1902_v8 = vpack.c.bf16 %v4098_v3, %v4098_v3 }
 0x15b   : > { %v1562_v29 = vadd.f32 %v1561_v27, %v1232_v26  ;;  %v3276_v26 = vld [vmem:[%s3772_s25 + $0x2f8] sm:$0xf0] }
 0x15c   : > { %1271 = vmatmul.bf16.gmra.mxu0 %v3051_v23  ;;  %2031 = vst.msk [vmem:[%s3832_s7 + $0x130] sm:$0xf] %vm1954_vm0, %v1902_v8  ;;  %v3284_v8 = vld [vmem:[%s3772_s25 + $0x308] sm:$0xf0] }
 0x15d   : > { %v1848_v35 = vpack.c.bf16 %v1562_v29, %v1562_v29  ;;  %v2127_v36 = vsel %vm2083_vm1, %v1562_v29, 0.0  ;;  %v2367_v37 = vmul.f32 %v1562_v29, %v1562_v29  ;;  %1600 = vmatmul.bf16.gmra.mxu1 %v3055_v25  ;;  %v1903_v25 = vpack.c.bf16 %v4104_v14, %v4104_v14 }
 0x15e   : > { %v2128_v40 = vadd.f32 %v2127_v36, %v2126_v15  ;;  %v3274_v15 = vld [vmem:[%s3772_s25 + $0x2f0] sm:$0xf]  ;;  %v1372_v36 = vpop.f32.mrf.mxu2 }
 0x15f   : > { %1977 = vst.msk [vmem:[%s3832_s7 + $0x58] sm:$0xf] %vm1954_vm0, %v1848_v35  ;;  %v2516_v44 = vsel %vm2083_vm1, %v2367_v37, 0.0  ;;  %v3275_v28 = vor.u32 %v3570_v20, %v3274_v15 }
 0x160   : > { %v2517_v47 = vadd.f32 %v2516_v44, %v2515_v21  ;;  %v3569_v21 = vld [vmem:[%s3772_s25 + $0x2f4] sm:$0xf]  ;;  %2032 = vst.msk [vmem:[%s3832_s7 + $0x134] sm:$0xf] %vm1954_vm0, %v1903_v25  ;;  %v1701_v37 = vpop.f32.mrf.mxu3  ;;  %v3518_v44 = vld [vmem:[%s3772_s25 + $0x154] sm:$0xf0] }
 0x161   : > { %v1234_v49 = vpop.f32.mrf.mxu0  ;;  %v3279_v29 = vor.u32 %v3569_v21, %v3276_v26  ;;  %1411 = vmatmul.bf16.gmra.mxu2 %v3275_v28 }
 0x162   : > { %v1563_v50 = vpop.f32.mrf.mxu1 }
 0x163   : > { %v1564_v51 = vadd.f32 %v1563_v50, %v1234_v49  ;;  %1740 = vmatmul.bf16.gmra.mxu3 %v3279_v29  ;;  %v4126_v50 = vadd.f32 %v1701_v37, %v1372_v36  ;;  %v3520_v29 = vld [vmem:[%s3772_s25 + $0x164] sm:$0xf0] }
 0x165   : > { %v1849_v55 = vpack.c.bf16 %v1564_v51, %v1564_v51  ;;  %v2129_v56 = vsel %vm2083_vm1, %v1564_v51, 0.0  ;;  %v2368_v58 = vmul.f32 %v1564_v51, %v1564_v51  ;;  %v3067_v51 = vor.u32 %v3518_v44, %v3066_v41 }
 0x166   : > { %v2130_v60 = vadd.f32 %v2129_v56, %v2128_v40  ;;  %v1904_v56 = vpack.c.bf16 %v4126_v50, %v4126_v50  ;;  %v1374_v59 = vpop.f32.mrf.mxu2 }
 0x167   : > { %1978 = vst.msk [vmem:[%s3832_s7 + $0x5c] sm:$0xf] %vm1954_vm0, %v1849_v55  ;;  %v2518_v1 = vsel %vm2083_vm1, %v2368_v58, 0.0 }
 0x168   : > { %v2519_v2 = vadd.f32 %v2518_v1, %v2517_v47  ;;  %2033 = vst.msk [vmem:[%s3832_s7 + $0x138] sm:$0xf] %vm1954_vm0, %v1904_v56 }
 0x169   : > { %v1237_v6 = vpop.f32.mrf.mxu0 }
 0x16a   : > { %v1566_v7 = vpop.f32.mrf.mxu1 }
 0x16b   : > { %v1567_v11 = vadd.f32 %v1566_v7, %v1237_v6 }
 0x16c   : > { %1276 = vmatmul.bf16.gmra.mxu0 %v3059_v4  ;;  %v3572_v4 = vld [vmem:[%s3772_s25 + $0x304] sm:$0xf0] }
 0x16d   : > { %v1850_v16 = vpack.c.bf16 %v1567_v11, %v1567_v11  ;;  %v2131_v17 = vsel %vm2083_vm1, %v1567_v11, 0.0  ;;  %v2369_v18 = vmul.f32 %v1567_v11, %v1567_v11  ;;  %1605 = vmatmul.bf16.gmra.mxu1 %v3063_v5  ;;  %v3571_v5 = vld [vmem:[%s3772_s25 + $0x304] sm:$0xf]  ;;  %v3283_v12 = vor.u32 %v3572_v4, %v3282_v62 }
 0x16e   : > { %v2132_v23 = vadd.f32 %v2131_v17, %v2130_v60  ;;  %v1703_v60 = vpop.f32.mrf.mxu3  ;;  %v3287_v13 = vor.u32 %v3571_v5, %v3284_v8  ;;  %v1377_v20 = vpop.f32.mrf.mxu2 }
 0x16f   : > { %1979 = vst.msk [vmem:[%s3832_s7 + $0x60] sm:$0xf] %vm1954_vm0, %v1850_v16  ;;  %v2520_v27 = vsel %vm2083_vm1, %v2369_v18, 0.0  ;;  %v4132_v61 = vadd.f32 %v1703_v60, %v1374_v59  ;;  %v3292_v59 = vld [vmem:[%s3772_s25 + $0x318] sm:$0xf0] }
 0x170   : > { %v2521_v30 = vadd.f32 %v2520_v27, %v2519_v2  ;;  %v3074_v27 = vld [vmem:[%s3772_s25 + $0x160] sm:$0xf] }
 0x171   : > { %v1239_v31 = vpop.f32.mrf.mxu0  ;;  %v1905_v7 = vpack.c.bf16 %v4132_v61, %v4132_v61  ;;  %1416 = vmatmul.bf16.gmra.mxu2 %v3283_v12  ;;  %v3075_v37 = vor.u32 %v3520_v29, %v3074_v27 }
 0x172   : > { %v1568_v34 = vpop.f32.mrf.mxu1 }
 0x173   : > { %v1569_v35 = vadd.f32 %v1568_v34, %v1239_v31  ;;  %2034 = vst.msk [vmem:[%s3832_s7 + $0x13c] sm:$0xf] %vm1954_vm0, %v1905_v7  ;;  %1745 = vmatmul.bf16.gmra.mxu3 %v3287_v13  ;;  %v3076_v31 = vld [vmem:[%s3772_s25 + $0x168] sm:$0xf0]  ;;  %v3082_v13 = vld [vmem:[%s3772_s25 + $0x170] sm:$0xf] }
 0x175   : > { %v1851_v38 = vpack.c.bf16 %v1569_v35, %v1569_v35  ;;  %v2133_v39 = vsel %vm2083_vm1, %v1569_v35, 0.0  ;;  %v2370_v40 = vmul.f32 %v1569_v35, %v1569_v35 }
 0x176   : > { %v2134_v43 = vadd.f32 %v2133_v39, %v2132_v23  ;;  %v1706_v21 = vpop.f32.mrf.mxu3  ;;  %v1379_v44 = vpop.f32.mrf.mxu2 }
 0x177   : > { %1980 = vst.msk [vmem:[%s3832_s7 + $0x64] sm:$0xf] %vm1954_vm0, %v1851_v38  ;;  %v2522_v47 = vsel %vm2083_vm1, %v2370_v40, 0.0  ;;  %v4154_v36 = vadd.f32 %v1706_v21, %v1377_v20 }
 0x178   : > { %v2523_v49 = vadd.f32 %v2522_v47, %v2521_v30  ;;  %v3519_v30 = vld [vmem:[%s3772_s25 + $0x164] sm:$0xf]  ;;  %v3290_v47 = vld [vmem:[%s3772_s25 + $0x310] sm:$0xf] }
 0x179   : > { %v1242_v54 = vpop.f32.mrf.mxu0  ;;  %v3079_v38 = vor.u32 %v3519_v30, %v3076_v31  ;;  %v1906_v41 = vpack.c.bf16 %v4154_v36, %v4154_v36 }
 0x17a   : > { %v1571_v55 = vpop.f32.mrf.mxu1 }
 0x17b   : > { %v1572_v58 = vadd.f32 %v1571_v55, %v1242_v54  ;;  %2035 = vst.msk [vmem:[%s3832_s7 + $0x140] sm:$0xf] %vm1954_vm0, %v1906_v41  ;;  %v3574_v54 = vld [vmem:[%s3772_s25 + $0x314] sm:$0xf0]  ;;  %v3573_v55 = vld [vmem:[%s3772_s25 + $0x314] sm:$0xf] }
 0x17c   : > { %1281 = vmatmul.bf16.gmra.mxu0 %v3067_v51  ;;  %v3291_v62 = vor.u32 %v3574_v54, %v3290_v47  ;;  %v3576_v41 = vld [vmem:[%s3772_s25 + $0x324] sm:$0xf0]  ;;  %v3300_v47 = vld [vmem:[%s3772_s25 + $0x328] sm:$0xf0] }
 0x17d   : > { %v1852_v63 = vpack.c.bf16 %v1572_v58, %v1572_v58  ;;  %v2135_v1 = vsel %vm2083_vm1, %v1572_v58, 0.0  ;;  %v2371_v2 = vmul.f32 %v1572_v58, %v1572_v58  ;;  %1610 = vmatmul.bf16.gmra.mxu1 %v3071_v53 }
 0x17e   : > { %v2136_v6 = vadd.f32 %v2135_v1, %v2134_v43  ;;  %v1708_v45 = vpop.f32.mrf.mxu3 }
 0x17f   : > { %1981 = vst.msk [vmem:[%s3832_s7 + $0x68] sm:$0xf] %vm1954_vm0, %v1852_v63  ;;  %v2524_v11 = vsel %vm2083_vm1, %v2371_v2, 0.0  ;;  %v4160_v46 = vadd.f32 %v1708_v45, %v1379_v44  ;;  %v3295_v63 = vor.u32 %v3573_v55, %v3292_v59 }
 0x180   : > { %v2525_v15 = vadd.f32 %v2524_v11, %v2523_v49 }
 0x181   : > { %v1244_v16 = vpop.f32.mrf.mxu0  ;;  %v1907_v58 = vpack.c.bf16 %v4160_v46, %v4160_v46  ;;  %1421 = vmatmul.bf16.gmra.mxu2 %v3291_v62 }
 0x182   : > { %v1573_v17 = vpop.f32.mrf.mxu1 }
 0x183   : > { %v1574_v18 = vadd.f32 %v1573_v17, %v1244_v16  ;;  %2036 = vst.msk [vmem:[%s3832_s7 + $0x144] sm:$0xf] %vm1954_vm0, %v1907_v58  ;;  %1750 = vmatmul.bf16.gmra.mxu3 %v3295_v63  ;;  %v3522_v16 = vld [vmem:[%s3772_s25 + $0x174] sm:$0xf0]  ;;  %v3521_v17 = vld [vmem:[%s3772_s25 + $0x174] sm:$0xf] }
 0x185   : > { %v1853_v23 = vpack.c.bf16 %v1574_v18, %v1574_v18  ;;  %v2137_v25 = vsel %vm2083_vm1, %v1574_v18, 0.0  ;;  %v2372_v26 = vmul.f32 %v1574_v18, %v1574_v18  ;;  %v3084_v18 = vld [vmem:[%s3772_s25 + $0x178] sm:$0xf0] }
 0x186   : > { %v2138_v28 = vadd.f32 %v2137_v25, %v2136_v6  ;;  %v1382_v6 = vpop.f32.mrf.mxu2  ;;  %v1711_v7 = vpop.f32.mrf.mxu3  ;;  %v3083_v25 = vor.u32 %v3522_v16, %v3082_v13 }
 0x187   : > { %1982 = vst.msk [vmem:[%s3832_s7 + $0x6c] sm:$0xf] %vm1954_vm0, %v1853_v23  ;;  %v2526_v34 = vsel %vm2083_vm1, %v2372_v26, 0.0  ;;  %v4182_v23 = vadd.f32 %v1711_v7, %v1382_v6  ;;  %v3087_v26 = vor.u32 %v3521_v17, %v3084_v18  ;;  %v3523_v6 = vld [vmem:[%s3772_s25 + $0x184] sm:$0xf] }
 0x188   : > { %v2527_v35 = vadd.f32 %v2526_v34, %v2525_v15  ;;  %v3092_v7 = vld [vmem:[%s3772_s25 + $0x188] sm:$0xf0] }
 0x189   : > { %v1247_v39 = vpop.f32.mrf.mxu0  ;;  %v1908_v29 = vpack.c.bf16 %v4182_v23, %v4182_v23 }
 0x18a   : > { %v1576_v40 = vpop.f32.mrf.mxu1 }
 0x18b   : > { %v1577_v43 = vadd.f32 %v1576_v40, %v1247_v39  ;;  %2037 = vst.msk [vmem:[%s3832_s7 + $0x148] sm:$0xf] %vm1954_vm0, %v1908_v29 }
 0x18c   : > { %1286 = vmatmul.bf16.gmra.mxu0 %v3075_v37 }
 0x18d   : > { %v1854_v49 = vpack.c.bf16 %v1577_v43, %v1577_v43  ;;  %v2139_v51 = vsel %vm2083_vm1, %v1577_v43, 0.0  ;;  %v2373_v53 = vmul.f32 %v1577_v43, %v1577_v43  ;;  %1615 = vmatmul.bf16.gmra.mxu1 %v3079_v38  ;;  %v3575_v43 = vld [vmem:[%s3772_s25 + $0x324] sm:$0xf] }
 0x18e   : > { %v2140_v56 = vadd.f32 %v2139_v51, %v2138_v28  ;;  %v1384_v31 = vpop.f32.mrf.mxu2  ;;  %v1713_v34 = vpop.f32.mrf.mxu3  ;;  %v3303_v54 = vor.u32 %v3575_v43, %v3300_v47 }
 0x18f   : > { %1983 = vst.msk [vmem:[%s3832_s7 + $0x70] sm:$0xf] %vm1954_vm0, %v1854_v49  ;;  %v2528_v60 = vsel %vm2083_vm1, %v2373_v53, 0.0  ;;  %v4190_v40 = vadd.f32 %v1713_v34, %v1384_v31  ;;  %v3578_v31 = vld [vmem:[%s3772_s25 + $0x334] sm:$0xf0] }
 0x190   : > { %v2529_v1 = vadd.f32 %v2528_v60, %v2527_v35  ;;  %v3298_v35 = vld [vmem:[%s3772_s25 + $0x320] sm:$0xf]  ;;  %v3577_v34 = vld [vmem:[%s3772_s25 + $0x334] sm:$0xf] }
 0x191   : > { %v1249_v2 = vpop.f32.mrf.mxu0  ;;  %v3299_v45 = vor.u32 %v3576_v41, %v3298_v35  ;;  %v1909_v51 = vpack.c.bf16 %v4190_v40, %v4190_v40 }
 0x192   : > { %v1578_v4 = vpop.f32.mrf.mxu1 }
 0x193   : > { %v1579_v5 = vadd.f32 %v1578_v4, %v1249_v2  ;;  %2038 = vst.msk [vmem:[%s3832_s7 + $0x14c] sm:$0xf] %vm1954_vm0, %v1909_v51  ;;  %1426 = vmatmul.bf16.gmra.mxu2 %v3299_v45  ;;  %1755 = vmatmul.bf16.gmra.mxu3 %v3303_v54  ;;  %v3090_v2 = vld [vmem:[%s3772_s25 + $0x180] sm:$0xf] }
 0x195   : > { %v1855_v8 = vpack.c.bf16 %v1579_v5, %v1579_v5  ;;  %v2141_v11 = vsel %vm2083_vm1, %v1579_v5, 0.0  ;;  %v2374_v12 = vmul.f32 %v1579_v5, %v1579_v5  ;;  %v3524_v5 = vld [vmem:[%s3772_s25 + $0x184] sm:$0xf0] }
 0x196   : > { %v2142_v15 = vadd.f32 %v2141_v11, %v2140_v56  ;;  %v1387_v59 = vpop.f32.mrf.mxu2  ;;  %v1716_v60 = vpop.f32.mrf.mxu3  ;;  %v3091_v13 = vor.u32 %v3524_v5, %v3090_v2 }
 0x197   : > { %1984 = vst.msk [vmem:[%s3832_s7 + $0x74] sm:$0xf] %vm1954_vm0, %v1855_v8  ;;  %v2530_v20 = vsel %vm2083_vm1, %v2374_v12, 0.0  ;;  %v4210_v12 = vadd.f32 %v1716_v60, %v1387_v59  ;;  %v3526_v60 = vld [vmem:[%s3772_s25 + $0x194] sm:$0xf0] }
 0x198   : > { %v2531_v21 = vadd.f32 %v2530_v20, %v2529_v1 }
 0x199   : > { %v1252_v27 = vpop.f32.mrf.mxu0  ;;  %v1910_v18 = vpack.c.bf16 %v4210_v12, %v4210_v12 }
 0x19a   : > { %v1581_v28 = vpop.f32.mrf.mxu1 }
 0x19b   : > { %v1582_v30 = vadd.f32 %v1581_v28, %v1252_v27  ;;  %2039 = vst.msk [vmem:[%s3832_s7 + $0x150] sm:$0xf] %vm1954_vm0, %v1910_v18 }
 0x19c   : > { %1291 = vmatmul.bf16.gmra.mxu0 %v3083_v25 }
 0x19d   : > { %v1856_v37 = vpack.c.bf16 %v1582_v30, %v1582_v30  ;;  %v2143_v38 = vsel %vm2083_vm1, %v1582_v30, 0.0  ;;  %v2375_v39 = vmul.f32 %v1582_v30, %v1582_v30  ;;  %1620 = vmatmul.bf16.gmra.mxu1 %v3087_v26  ;;  %v3306_v26 = vld [vmem:[%s3772_s25 + $0x330] sm:$0xf] }
 0x19e   : > { %v2144_v44 = vadd.f32 %v2143_v38, %v2142_v15  ;;  %v3095_v15 = vor.u32 %v3523_v6, %v3092_v7  ;;  %v1718_v25 = vpop.f32.mrf.mxu3  ;;  %v3308_v38 = vld [vmem:[%s3772_s25 + $0x338] sm:$0xf0] }
 0x19f   : > { %1985 = vst.msk [vmem:[%s3832_s7 + $0x78] sm:$0xf] %vm1954_vm0, %v1856_v37  ;;  %v2532_v49 = vsel %vm2083_vm1, %v2375_v39, 0.0  ;;  %v3307_v37 = vor.u32 %v3578_v31, %v3306_v26  ;;  %v3580_v26 = vld [vmem:[%s3772_s25 + $0x344] sm:$0xf0] }
 0x1a0   : > { %v2533_v53 = vadd.f32 %v2532_v49, %v2531_v21  ;;  %v1389_v21 = vpop.f32.mrf.mxu2  ;;  %v3316_v31 = vld [vmem:[%s3772_s25 + $0x348] sm:$0xf0] }
 0x1a1   : > { %v1254_v55 = vpop.f32.mrf.mxu0  ;;  %v4218_v30 = vadd.f32 %v1718_v25, %v1389_v21 }
 0x1a2   : > { %v1583_v56 = vpop.f32.mrf.mxu1 }
 0x1a3   : > { %v1584_v58 = vadd.f32 %v1583_v56, %v1254_v55  ;;  %v1911_v41 = vpack.c.bf16 %v4218_v30, %v4218_v30  ;;  %1431 = vmatmul.bf16.gmra.mxu2 %v3307_v37 }
 0x1a5   : > { %v1857_v62 = vpack.c.bf16 %v1584_v58, %v1584_v58  ;;  %v2145_v63 = vsel %vm2083_vm1, %v1584_v58, 0.0  ;;  %v2376_v1 = vmul.f32 %v1584_v58, %v1584_v58  ;;  %2040 = vst.msk [vmem:[%s3832_s7 + $0x154] sm:$0xf] %vm1954_vm0, %v1911_v41  ;;  %v3098_v58 = vld [vmem:[%s3772_s25 + $0x190] sm:$0xf] }
 0x1a6   : > { %v2146_v4 = vadd.f32 %v2145_v63, %v2144_v44  ;;  %v3311_v44 = vor.u32 %v3577_v34, %v3308_v38  ;;  %v3100_v63 = vld [vmem:[%s3772_s25 + $0x198] sm:$0xf0]  ;;  %v3099_v5 = vor.u32 %v3526_v60, %v3098_v58  ;;  %v3108_v58 = vld [vmem:[%s3772_s25 + $0x1a8] sm:$0xf0] }
 0x1a7   : > { %1986 = vst.msk [vmem:[%s3832_s7 + $0x7c] sm:$0xf] %vm1954_vm0, %v1857_v62  ;;  %v2534_v8 = vsel %vm2083_vm1, %v2376_v1, 0.0  ;;  %v3525_v62 = vld [vmem:[%s3772_s25 + $0x194] sm:$0xf] }
 0x1a8   : > { %v2535_v11 = vadd.f32 %v2534_v8, %v2533_v53  ;;  %1760 = vmatmul.bf16.gmra.mxu3 %v3311_v44  ;;  %v1392_v51 = vpop.f32.mrf.mxu2  ;;  %v1721_v53 = vpop.f32.mrf.mxu3  ;;  %v3103_v6 = vor.u32 %v3525_v62, %v3100_v63 }
 0x1a9   : > { %v1257_v16 = vpop.f32.mrf.mxu0 }
 0x1aa   : > { %v1586_v17 = vpop.f32.mrf.mxu1 }
 0x1ab   : > { %v1587_v20 = vadd.f32 %v1586_v17, %v1257_v16  ;;  %v3314_v17 = vld [vmem:[%s3772_s25 + $0x340] sm:$0xf] }
 0x1ac   : > { %1296 = vmatmul.bf16.gmra.mxu0 %v3091_v13 }
 0x1ad   : > { %v1858_v27 = vpack.c.bf16 %v1587_v20, %v1587_v20  ;;  %v2147_v28 = vsel %vm2083_vm1, %v1587_v20, 0.0  ;;  %v2377_v29 = vmul.f32 %v1587_v20, %v1587_v20  ;;  %1625 = vmatmul.bf16.gmra.mxu1 %v3095_v15 }
 0x1ae   : > { %v2148_v35 = vadd.f32 %v2147_v28, %v2146_v4  ;;  %v4238_v4 = vadd.f32 %v1721_v53, %v1392_v51  ;;  %v3106_v53 = vld [vmem:[%s3772_s25 + $0x1a0] sm:$0xf] }
 0x1af   : > { %1987 = vst.msk [vmem:[%s3832_s7 + $0x80] sm:$0xf] %vm1954_vm0, %v1858_v27  ;;  %v2536_v39 = vsel %vm2083_vm1, %v2377_v29, 0.0  ;;  %v3579_v27 = vld [vmem:[%s3772_s25 + $0x344] sm:$0xf]  ;;  %v3315_v29 = vor.u32 %v3580_v26, %v3314_v17 }
 0x1b0   : > { %v2537_v43 = vadd.f32 %v2536_v39, %v2535_v11  ;;  %v1912_v11 = vpack.c.bf16 %v4238_v4, %v4238_v4  ;;  %v1394_v15 = vpop.f32.mrf.mxu2  ;;  %v1723_v16 = vpop.f32.mrf.mxu3  ;;  %v3319_v38 = vor.u32 %v3579_v27, %v3316_v31 }
 0x1b1   : > { %v1259_v45 = vpop.f32.mrf.mxu0  ;;  %v4246_v25 = vadd.f32 %v1723_v16, %v1394_v15 }
 0x1b2   : > { %v1588_v47 = vpop.f32.mrf.mxu1  ;;  %2041 = vst.msk [vmem:[%s3832_s7 + $0x158] sm:$0xf] %vm1954_vm0, %v1912_v11 }
 0x1b3   : > { %v1589_v49 = vadd.f32 %v1588_v47, %v1259_v45  ;;  %1436 = vmatmul.bf16.gmra.mxu2 %v3315_v29 }
 0x1b5   : > { %v1859_v54 = vpack.c.bf16 %v1589_v49, %v1589_v49  ;;  %v2149_v55 = vsel %vm2083_vm1, %v1589_v49, 0.0  ;;  %v2378_v56 = vmul.f32 %v1589_v49, %v1589_v49 }
 0x1b6   : > { %v2150_v59 = vadd.f32 %v2149_v55, %v2148_v35  ;;  %v1913_v35 = vpack.c.bf16 %v4246_v25, %v4246_v25  ;;  %v3528_v55 = vld [vmem:[%s3772_s25 + $0x1a4] sm:$0xf0] }
 0x1b7   : > { %1988 = vst.msk [vmem:[%s3832_s7 + $0x84] sm:$0xf] %vm1954_vm0, %v1859_v54  ;;  %v2538_v1 = vsel %vm2083_vm1, %v2378_v56, 0.0  ;;  %v3527_v56 = vld [vmem:[%s3772_s25 + $0x1a4] sm:$0xf]  ;;  %v3107_v63 = vor.u32 %v3528_v55, %v3106_v53 }
 0x1b8   : > { %v2539_v2 = vadd.f32 %v2538_v1, %v2537_v43  ;;  %2042 = vst.msk [vmem:[%s3832_s7 + $0x15c] sm:$0xf] %vm1954_vm0, %v1913_v35  ;;  %1765 = vmatmul.bf16.gmra.mxu3 %v3319_v38  ;;  %v1397_v44 = vpop.f32.mrf.mxu2  ;;  %v1726_v45 = vpop.f32.mrf.mxu3  ;;  %v3111_v1 = vor.u32 %v3527_v56, %v3108_v58  ;;  %v3530_v53 = vld [vmem:[%s3772_s25 + $0x1b4] sm:$0xf0]  ;;  %v3116_v55 = vld [vmem:[%s3772_s25 + $0x1b8] sm:$0xf0] }
 0x1b9   : > { %v1262_v7 = vpop.f32.mrf.mxu0  ;;  %v4266_v62 = vadd.f32 %v1726_v45, %v1397_v44 }
 0x1ba   : > { %v1591_v8 = vpop.f32.mrf.mxu1 }
 0x1bb   : > { %v1592_v13 = vadd.f32 %v1591_v8, %v1262_v7 }
 0x1bc   : > { %1301 = vmatmul.bf16.gmra.mxu0 %v3099_v5 }
 0x1bd   : > { %v1860_v18 = vpack.c.bf16 %v1592_v13, %v1592_v13  ;;  %v2151_v20 = vsel %vm2083_vm1, %v1592_v13, 0.0  ;;  %v2379_v21 = vmul.f32 %v1592_v13, %v1592_v13  ;;  %1630 = vmatmul.bf16.gmra.mxu1 %v3103_v6  ;;  %v1914_v6 = vpack.c.bf16 %v4266_v62, %v4266_v62  ;;  %v3322_v13 = vld [vmem:[%s3772_s25 + $0x350] sm:$0xf] }
 0x1be   : > { %v2152_v28 = vadd.f32 %v2151_v20, %v2150_v59  ;;  %v3582_v20 = vld [vmem:[%s3772_s25 + $0x354] sm:$0xf0] }
 0x1bf   : > { %1989 = vst.msk [vmem:[%s3832_s7 + $0x88] sm:$0xf] %vm1954_vm0, %v1860_v18  ;;  %v2540_v34 = vsel %vm2083_vm1, %v2379_v21, 0.0  ;;  %v3581_v21 = vld [vmem:[%s3772_s25 + $0x354] sm:$0xf]  ;;  %v3323_v27 = vor.u32 %v3582_v20, %v3322_v13 }
 0x1c0   : > { %v2541_v37 = vadd.f32 %v2540_v34, %v2539_v2  ;;  %2043 = vst.msk [vmem:[%s3832_s7 + $0x160] sm:$0xf] %vm1954_vm0, %v1914_v6  ;;  %v1399_v8 = vpop.f32.mrf.mxu2  ;;  %v1728_v11 = vpop.f32.mrf.mxu3  ;;  %v3584_v20 = vld [vmem:[%s3772_s25 + $0x364] sm:$0xf0] }
 0x1c1   : > { %v1264_v39 = vpop.f32.mrf.mxu0  ;;  %v4274_v18 = vadd.f32 %v1728_v11, %v1399_v8  ;;  %v3330_v11 = vld [vmem:[%s3772_s25 + $0x360] sm:$0xf] }
 0x1c2   : > { %v1593_v41 = vpop.f32.mrf.mxu1 }
 0x1c3   : > { %v1594_v43 = vadd.f32 %v1593_v41, %v1264_v39  ;;  %v1915_v31 = vpack.c.bf16 %v4274_v18, %v4274_v18  ;;  %1441 = vmatmul.bf16.gmra.mxu2 %v3323_v27  ;;  %v3331_v27 = vor.u32 %v3584_v20, %v3330_v11 }
 0x1c5   : > { %v1861_v47 = vpack.c.bf16 %v1594_v43, %v1594_v43  ;;  %v2153_v49 = vsel %vm2083_vm1, %v1594_v43, 0.0  ;;  %v2380_v51 = vmul.f32 %v1594_v43, %v1594_v43  ;;  %2044 = vst.msk [vmem:[%s3832_s7 + $0x164] sm:$0xf] %vm1954_vm0, %v1915_v31 }
 0x1c6   : > { %v2154_v54 = vadd.f32 %v2153_v49, %v2152_v28  ;;  %v3324_v28 = vld [vmem:[%s3772_s25 + $0x358] sm:$0xf0]  ;;  %v3114_v49 = vld [vmem:[%s3772_s25 + $0x1b0] sm:$0xf] }
 0x1c7   : > { %1990 = vst.msk [vmem:[%s3832_s7 + $0x8c] sm:$0xf] %vm1954_vm0, %v1861_v47  ;;  %v2542_v59 = vsel %vm2083_vm1, %v2380_v51, 0.0  ;;  %v3327_v35 = vor.u32 %v3581_v21, %v3324_v28  ;;  %v3583_v21 = vld [vmem:[%s3772_s25 + $0x364] sm:$0xf] }
 0x1c8   : > { %v2543_v60 = vadd.f32 %v2542_v59, %v2541_v37  ;;  %v1402_v41 = vpop.f32.mrf.mxu2  ;;  %v1731_v43 = vpop.f32.mrf.mxu3  ;;  %v3332_v28 = vld [vmem:[%s3772_s25 + $0x368] sm:$0xf0] }
 0x1c9   : > { %v1267_v2 = vpop.f32.mrf.mxu0  ;;  %1770 = vmatmul.bf16.gmra.mxu3 %v3327_v35  ;;  %v4294_v59 = vadd.f32 %v1731_v43, %v1402_v41  ;;  %v3335_v35 = vor.u32 %v3583_v21, %v3332_v28 }
 0x1ca   : > { %v1596_v5 = vpop.f32.mrf.mxu1 }
 0x1cb   : > { %v1597_v7 = vadd.f32 %v1596_v5, %v1267_v2  ;;  %v1916_v5 = vpack.c.bf16 %v4294_v59, %v4294_v59 }
 0x1cc   : > { %1306 = vmatmul.bf16.gmra.mxu0 %v3107_v63 }
 0x1cd   : > { %v1862_v15 = vpack.c.bf16 %v1597_v7, %v1597_v7  ;;  %v2155_v16 = vsel %vm2083_vm1, %v1597_v7, 0.0  ;;  %v2381_v17 = vmul.f32 %v1597_v7, %v1597_v7  ;;  %1635 = vmatmul.bf16.gmra.mxu1 %v3111_v1  ;;  %2045 = vst.msk [vmem:[%s3832_s7 + $0x168] sm:$0xf] %vm1954_vm0, %v1916_v5 }
 0x1ce   : > { %v2156_v26 = vadd.f32 %v2155_v16, %v2154_v54  ;;  %v3529_v54 = vld [vmem:[%s3772_s25 + $0x1b4] sm:$0xf] }
 0x1cf   : > { %1991 = vst.msk [vmem:[%s3832_s7 + $0x90] sm:$0xf] %vm1954_vm0, %v1862_v15  ;;  %v2544_v29 = vsel %vm2083_vm1, %v2381_v17, 0.0  ;;  %v3119_v63 = vor.u32 %v3529_v54, %v3116_v55  ;;  %v3531_v54 = vld [vmem:[%s3772_s25 + $0x1c4] sm:$0xf] }
 0x1d0   : > { %v2545_v34 = vadd.f32 %v2544_v29, %v2543_v60  ;;  %v3115_v60 = vor.u32 %v3530_v53, %v3114_v49  ;;  %v1404_v7 = vpop.f32.mrf.mxu2  ;;  %v1733_v8 = vpop.f32.mrf.mxu3  ;;  %v3122_v49 = vld [vmem:[%s3772_s25 + $0x1c0] sm:$0xf]  ;;  %v3532_v53 = vld [vmem:[%s3772_s25 + $0x1c4] sm:$0xf0]  ;;  %v3124_v55 = vld [vmem:[%s3772_s25 + $0x1c8] sm:$0xf0] }
 0x1d1   : > { %v1269_v37 = vpop.f32.mrf.mxu0  ;;  %v4302_v17 = vadd.f32 %v1733_v8, %v1404_v7 }
 0x1d2   : > { %v1598_v38 = vpop.f32.mrf.mxu1 }
 0x1d3   : > { %v1599_v39 = vadd.f32 %v1598_v38, %v1269_v37  ;;  %v1917_v31 = vpack.c.bf16 %v4302_v17, %v4302_v17  ;;  %1446 = vmatmul.bf16.gmra.mxu2 %v3331_v27  ;;  %v3585_v27 = vld [vmem:[%s3772_s25 + $0x374] sm:$0xf] }
 0x1d5   : > { %v1863_v44 = vpack.c.bf16 %v1599_v39, %v1599_v39  ;;  %v2157_v45 = vsel %vm2083_vm1, %v1599_v39, 0.0  ;;  %v2382_v47 = vmul.f32 %v1599_v39, %v1599_v39  ;;  %2046 = vst.msk [vmem:[%s3832_s7 + $0x16c] sm:$0xf] %vm1954_vm0, %v1917_v31  ;;  %v3340_v31 = vld [vmem:[%s3772_s25 + $0x378] sm:$0xf0] }
 0x1d6   : > { %v2158_v51 = vadd.f32 %v2157_v45, %v2156_v26 }
 0x1d7   : > { %1992 = vst.msk [vmem:[%s3832_s7 + $0x94] sm:$0xf] %vm1954_vm0, %v1863_v44  ;;  %v2546_v56 = vsel %vm2083_vm1, %v2382_v47, 0.0 }
 0x1d8   : > { %v2547_v58 = vadd.f32 %v2546_v56, %v2545_v34  ;;  %v1407_v41 = vpop.f32.mrf.mxu2  ;;  %v1736_v43 = vpop.f32.mrf.mxu3 }
 0x1d9   : > { %v1272_v1 = vpop.f32.mrf.mxu0  ;;  %1775 = vmatmul.bf16.gmra.mxu3 %v3335_v35 }
 0x1da   : > { %v1601_v2 = vpop.f32.mrf.mxu1 }
 0x1db   : > { %v1602_v6 = vadd.f32 %v1601_v2, %v1272_v1  ;;  %v3127_v1 = vor.u32 %v3531_v54, %v3124_v55  ;;  %v3534_v55 = vld [vmem:[%s3772_s25 + $0x1d4] sm:$0xf0] }
 0x1dc   : > { %1311 = vmatmul.bf16.gmra.mxu0 %v3115_v60  ;;  %v4322_v60 = vadd.f32 %v1736_v43, %v1407_v41 }
 0x1dd   : > { %v1864_v13 = vpack.c.bf16 %v1602_v6, %v1602_v6  ;;  %v2159_v15 = vsel %vm2083_vm1, %v1602_v6, 0.0  ;;  %v2383_v16 = vmul.f32 %v1602_v6, %v1602_v6  ;;  %1640 = vmatmul.bf16.gmra.mxu1 %v3119_v63  ;;  %v3123_v63 = vor.u32 %v3532_v53, %v3122_v49  ;;  %v3130_v53 = vld [vmem:[%s3772_s25 + $0x1d0] sm:$0xf] }
 0x1de   : > { %v2160_v26 = vadd.f32 %v2159_v15, %v2158_v51  ;;  %v1918_v6 = vpack.c.bf16 %v4322_v60, %v4322_v60 }
 0x1df   : > { %1993 = vst.msk [vmem:[%s3832_s7 + $0x98] sm:$0xf] %vm1954_vm0, %v1864_v13  ;;  %v2548_v29 = vsel %vm2083_vm1, %v2383_v16, 0.0  ;;  %v3338_v13 = vld [vmem:[%s3772_s25 + $0x370] sm:$0xf] }
 0x1e0   : > { %v2549_v34 = vadd.f32 %v2548_v29, %v2547_v58  ;;  %2047 = vst.msk [vmem:[%s3832_s7 + $0x170] sm:$0xf] %vm1954_vm0, %v1918_v6  ;;  %v1409_v8 = vpop.f32.mrf.mxu2  ;;  %v1738_v11 = vpop.f32.mrf.mxu3 }
 0x1e1   : > { %v1274_v37 = vpop.f32.mrf.mxu0  ;;  %v4330_v21 = vadd.f32 %v1738_v11, %v1409_v8 }
 0x1e2   : > { %v1603_v38 = vpop.f32.mrf.mxu1 }
 0x1e3   : > { %v1604_v39 = vadd.f32 %v1603_v38, %v1274_v37  ;;  %v1919_v35 = vpack.c.bf16 %v4330_v21, %v4330_v21  ;;  %v3343_v38 = vor.u32 %v3585_v27, %v3340_v31  ;;  %v3588_v31 = vld [vmem:[%s3772_s25 + $0x384] sm:$0xf0] }
 0x1e5   : > { %v1865_v44 = vpack.c.bf16 %v1604_v39, %v1604_v39  ;;  %v2161_v45 = vsel %vm2083_vm1, %v1604_v39, 0.0  ;;  %v2384_v47 = vmul.f32 %v1604_v39, %v1604_v39  ;;  %2048 = vst.msk [vmem:[%s3832_s7 + $0x174] sm:$0xf] %vm1954_vm0, %v1919_v35 }
 0x1e6   : > { %v2162_v51 = vadd.f32 %v2161_v45, %v2160_v26  ;;  %v3586_v26 = vld [vmem:[%s3772_s25 + $0x374] sm:$0xf0] }
 0x1e7   : > { %1994 = vst.msk [vmem:[%s3832_s7 + $0x9c] sm:$0xf] %vm1954_vm0, %v1865_v44  ;;  %v2550_v56 = vsel %vm2083_vm1, %v2384_v47, 0.0  ;;  %v3339_v29 = vor.u32 %v3586_v26, %v3338_v13 }
 0x1e8   : > { %v2551_v58 = vadd.f32 %v2550_v56, %v2549_v34  ;;  %v1412_v44 = vpop.f32.mrf.mxu2  ;;  %v1741_v45 = vpop.f32.mrf.mxu3  ;;  %v3533_v56 = vld [vmem:[%s3772_s25 + $0x1d4] sm:$0xf] }
 0x1e9   : > { %v1277_v2 = vpop.f32.mrf.mxu0  ;;  %1451 = vmatmul.bf16.gmra.mxu2 %v3339_v29  ;;  %1780 = vmatmul.bf16.gmra.mxu3 %v3343_v38  ;;  %v3348_v38 = vld [vmem:[%s3772_s25 + $0x388] sm:$0xf0] }
 0x1ea   : > { %v1606_v5 = vpop.f32.mrf.mxu1 }
 0x1eb   : > { %v1607_v7 = vadd.f32 %v1606_v5, %v1277_v2  ;;  %v4350_v2 = vadd.f32 %v1741_v45, %v1412_v44  ;;  %v3131_v5 = vor.u32 %v3534_v55, %v3130_v53 }
 0x1ec   : > { %1316 = vmatmul.bf16.gmra.mxu0 %v3123_v63 }
 0x1ed   : > { %v1866_v15 = vpack.c.bf16 %v1607_v7, %v1607_v7  ;;  %v2163_v16 = vsel %vm2083_vm1, %v1607_v7, 0.0  ;;  %v2385_v20 = vmul.f32 %v1607_v7, %v1607_v7  ;;  %1645 = vmatmul.bf16.gmra.mxu1 %v3127_v1  ;;  %v1920_v11 = vpack.c.bf16 %v4350_v2, %v4350_v2 }
 0x1ee   : > { %v2164_v28 = vadd.f32 %v2163_v16, %v2162_v51 }
 0x1ef   : > { %1995 = vst.msk [vmem:[%s3832_s7 + $0xa0] sm:$0xf] %vm1954_vm0, %v1866_v15  ;;  %v2552_v34 = vsel %vm2083_vm1, %v2385_v20, 0.0  ;;  %v3346_v20 = vld [vmem:[%s3772_s25 + $0x380] sm:$0xf] }
 0x1f0   : > { %v2553_v37 = vadd.f32 %v2552_v34, %v2551_v58  ;;  %v3132_v58 = vld [vmem:[%s3772_s25 + $0x1d8] sm:$0xf0]  ;;  %2049 = vst.msk [vmem:[%s3832_s7 + $0x178] sm:$0xf] %vm1954_vm0, %v1920_v11  ;;  %v1414_v15 = vpop.f32.mrf.mxu2  ;;  %v1743_v16 = vpop.f32.mrf.mxu3  ;;  %v3587_v34 = vld [vmem:[%s3772_s25 + $0x384] sm:$0xf] }
 0x1f1   : > { %v1279_v39 = vpop.f32.mrf.mxu0  ;;  %v3135_v6 = vor.u32 %v3533_v56, %v3132_v58  ;;  %v4358_v29 = vadd.f32 %v1743_v16, %v1414_v15  ;;  %v3351_v44 = vor.u32 %v3587_v34, %v3348_v38  ;;  %v3138_v58 = vld [vmem:[%s3772_s25 + $0x1e0] sm:$0xf]  ;;  %v3354_v34 = vld [vmem:[%s3772_s25 + $0x390] sm:$0xf] }
 0x1f2   : > { %v1608_v41 = vpop.f32.mrf.mxu1 }
 0x1f3   : > { %v1609_v43 = vadd.f32 %v1608_v41, %v1279_v39  ;;  %v1921_v41 = vpack.c.bf16 %v4358_v29, %v4358_v29 }
 0x1f5   : > { %v1867_v47 = vpack.c.bf16 %v1609_v43, %v1609_v43  ;;  %v2165_v49 = vsel %vm2083_vm1, %v1609_v43, 0.0  ;;  %v2386_v51 = vmul.f32 %v1609_v43, %v1609_v43  ;;  %2050 = vst.msk [vmem:[%s3832_s7 + $0x17c] sm:$0xf] %vm1954_vm0, %v1921_v41  ;;  %v3590_v41 = vld [vmem:[%s3772_s25 + $0x394] sm:$0xf0] }
 0x1f6   : > { %v2166_v54 = vadd.f32 %v2165_v49, %v2164_v28 }
 0x1f7   : > { %1996 = vst.msk [vmem:[%s3832_s7 + $0xa4] sm:$0xf] %vm1954_vm0, %v1867_v47  ;;  %v2554_v63 = vsel %vm2083_vm1, %v2386_v51, 0.0 }
 0x1f8   : > { %v2555_v1 = vadd.f32 %v2554_v63, %v2553_v37  ;;  %v3347_v37 = vor.u32 %v3588_v31, %v3346_v20  ;;  %v1417_v51 = vpop.f32.mrf.mxu2  ;;  %v1746_v53 = vpop.f32.mrf.mxu3 }
 0x1f9   : > { %v1282_v7 = vpop.f32.mrf.mxu0  ;;  %1785 = vmatmul.bf16.gmra.mxu3 %v3351_v44  ;;  %v4378_v11 = vadd.f32 %v1746_v53, %v1417_v51 }
 0x1fa   : > { %v1611_v8 = vpop.f32.mrf.mxu1  ;;  %1456 = vmatmul.bf16.gmra.mxu2 %v3347_v37 }
 0x1fb   : > { %v1612_v13 = vadd.f32 %v1611_v8, %v1282_v7 }
 0x1fc   : > { %1321 = vmatmul.bf16.gmra.mxu0 %v3131_v5  ;;  %v3535_v5 = vld [vmem:[%s3772_s25 + $0x1e4] sm:$0xf] }
 0x1fd   : > { %v1868_v26 = vpack.c.bf16 %v1612_v13, %v1612_v13  ;;  %v2167_v27 = vsel %vm2083_vm1, %v1612_v13, 0.0  ;;  %v2387_v28 = vmul.f32 %v1612_v13, %v1612_v13  ;;  %1650 = vmatmul.bf16.gmra.mxu1 %v3135_v6  ;;  %v3140_v6 = vld [vmem:[%s3772_s25 + $0x1e8] sm:$0xf0] }
 0x1fe   : > { %v2168_v35 = vadd.f32 %v2167_v27, %v2166_v54  ;;  %v3143_v15 = vor.u32 %v3535_v5, %v3140_v6 }
 0x1ff   : > { %1997 = vst.msk [vmem:[%s3832_s7 + $0xa8] sm:$0xf] %vm1954_vm0, %v1868_v26  ;;  %v2556_v39 = vsel %vm2083_vm1, %v2387_v28, 0.0  ;;  %v1922_v26 = vpack.c.bf16 %v4378_v11, %v4378_v11 }
 0x200   : > { %v2557_v43 = vadd.f32 %v2556_v39, %v2555_v1  ;;  %v3536_v1 = vld [vmem:[%s3772_s25 + $0x1e4] sm:$0xf0]  ;;  %v1419_v28 = vpop.f32.mrf.mxu2  ;;  %v1748_v31 = vpop.f32.mrf.mxu3 }
 0x201   : > { %v1284_v45 = vpop.f32.mrf.mxu0  ;;  %v3139_v13 = vor.u32 %v3536_v1, %v3138_v58  ;;  %2051 = vst.msk [vmem:[%s3832_s7 + $0x180] sm:$0xf] %vm1954_vm0, %v1922_v26  ;;  %v4386_v39 = vadd.f32 %v1748_v31, %v1419_v28 }
 0x202   : > { %v1613_v47 = vpop.f32.mrf.mxu1 }
 0x203   : > { %v1614_v49 = vadd.f32 %v1613_v47, %v1284_v45  ;;  %v3355_v45 = vor.u32 %v3590_v41, %v3354_v34  ;;  %v3356_v47 = vld [vmem:[%s3772_s25 + $0x398] sm:$0xf0]  ;;  %v1923_v51 = vpack.c.bf16 %v4386_v39, %v4386_v39 }
 0x205   : > { %v1869_v54 = vpack.c.bf16 %v1614_v49, %v1614_v49  ;;  %v2169_v55 = vsel %vm2083_vm1, %v1614_v49, 0.0  ;;  %v2388_v56 = vmul.f32 %v1614_v49, %v1614_v49  ;;  %2052 = vst.msk [vmem:[%s3832_s7 + $0x184] sm:$0xf] %vm1954_vm0, %v1923_v51 }
 0x206   : > { %v2170_v63 = vadd.f32 %v2169_v55, %v2168_v35 }
 0x207   : > { %1998 = vst.msk [vmem:[%s3832_s7 + $0xac] sm:$0xf] %vm1954_vm0, %v1869_v54  ;;  %v2558_v7 = vsel %vm2083_vm1, %v2388_v56, 0.0 }
 0x208   : > { %v2559_v8 = vadd.f32 %v2558_v7, %v2557_v43  ;;  %v3589_v43 = vld [vmem:[%s3772_s25 + $0x394] sm:$0xf]  ;;  %v1751_v1 = vpop.f32.mrf.mxu3 }
 0x209   : > { %v1287_v16 = vpop.f32.mrf.mxu0  ;;  %v3359_v54 = vor.u32 %v3589_v43, %v3356_v47 }
 0x20a   : > { %v1616_v20 = vpop.f32.mrf.mxu1  ;;  %1461 = vmatmul.bf16.gmra.mxu2 %v3355_v45  ;;  %v3362_v45 = vld [vmem:[%s3772_s25 + $0x3a0] sm:$0xf] }
 0x20b   : > { %v1617_v27 = vadd.f32 %v1616_v20, %v1287_v16  ;;  %1790 = vmatmul.bf16.gmra.mxu3 %v3359_v54  ;;  %v3537_v16 = vld [vmem:[%s3772_s25 + $0x1f4] sm:$0xf]  ;;  %v3148_v20 = vld [vmem:[%s3772_s25 + $0x1f8] sm:$0xf0]  ;;  %v3592_v54 = vld [vmem:[%s3772_s25 + $0x3a4] sm:$0xf0] }
 0x20c   : > { %1326 = vmatmul.bf16.gmra.mxu0 %v3139_v13  ;;  %v3146_v13 = vld [vmem:[%s3772_s25 + $0x1f0] sm:$0xf]  ;;  %v3151_v34 = vor.u32 %v3537_v16, %v3148_v20 }
 0x20d   : > { %v1870_v35 = vpack.c.bf16 %v1617_v27, %v1617_v27  ;;  %v2171_v37 = vsel %vm2083_vm1, %v1617_v27, 0.0  ;;  %v2389_v38 = vmul.f32 %v1617_v27, %v1617_v27  ;;  %1655 = vmatmul.bf16.gmra.mxu1 %v3143_v15  ;;  %v3538_v15 = vld [vmem:[%s3772_s25 + $0x1f4] sm:$0xf0] }
 0x20e   : > { %v2172_v44 = vadd.f32 %v2171_v37, %v2170_v63  ;;  %v1422_v63 = vpop.f32.mrf.mxu2  ;;  %v3147_v31 = vor.u32 %v3538_v15, %v3146_v13 }
 0x20f   : > { %1999 = vst.msk [vmem:[%s3832_s7 + $0xb0] sm:$0xf] %vm1954_vm0, %v1870_v35  ;;  %v2560_v49 = vsel %vm2083_vm1, %v2389_v38, 0.0  ;;  %v4406_v28 = vadd.f32 %v1751_v1, %v1422_v63  ;;  %v3364_v63 = vld [vmem:[%s3772_s25 + $0x3a8] sm:$0xf0] }
 0x210   : > { %v2561_v53 = vadd.f32 %v2560_v49, %v2559_v8 }
 0x211   : > { %v1289_v55 = vpop.f32.mrf.mxu0  ;;  %v1924_v38 = vpack.c.bf16 %v4406_v28, %v4406_v28 }
 0x212   : > { %v1618_v56 = vpop.f32.mrf.mxu1 }
 0x213   : > { %v1619_v58 = vadd.f32 %v1618_v56, %v1289_v55  ;;  %2053 = vst.msk [vmem:[%s3832_s7 + $0x188] sm:$0xf] %vm1954_vm0, %v1924_v38  ;;  %v3591_v55 = vld [vmem:[%s3772_s25 + $0x3a4] sm:$0xf] }
 0x215   : > { %v1871_v5 = vpack.c.bf16 %v1619_v58, %v1619_v58  ;;  %v2173_v6 = vsel %vm2083_vm1, %v1619_v58, 0.0  ;;  %v2390_v7 = vmul.f32 %v1619_v58, %v1619_v58  ;;  %v3363_v58 = vor.u32 %v3592_v54, %v3362_v45 }
 0x216   : > { %v2174_v8 = vadd.f32 %v2173_v6, %v2172_v44  ;;  %v1424_v43 = vpop.f32.mrf.mxu2  ;;  %v1753_v44 = vpop.f32.mrf.mxu3 }
 0x217   : > { %2000 = vst.msk [vmem:[%s3832_s7 + $0xb4] sm:$0xf] %vm1954_vm0, %v1871_v5  ;;  %v2562_v26 = vsel %vm2083_vm1, %v2390_v7, 0.0  ;;  %v3367_v7 = vor.u32 %v3591_v55, %v3364_v63  ;;  %v3593_v63 = vld [vmem:[%s3772_s25 + $0x3b4] sm:$0xf] }
 0x218   : > { %v2563_v27 = vadd.f32 %v2562_v26, %v2561_v53  ;;  %v4414_v53 = vadd.f32 %v1753_v44, %v1424_v43 }
 0x219   : > { %v1292_v35 = vpop.f32.mrf.mxu0 }
 0x21a   : > { %v1621_v37 = vpop.f32.mrf.mxu1  ;;  %5085 = vst [vmem:[#allocation2_spill] sm:$0xff] %v4414_v53  ;;  %v1925_v5 = vpack.c.bf16 %v4414_v53, %v4414_v53  ;;  %1466 = vmatmul.bf16.gmra.mxu2 %v3363_v58  ;;  %v3594_v58 = vld [vmem:[%s3772_s25 + $0x3b4] sm:$0xf0] }
 0x21b   : > { %v1622_v41 = vadd.f32 %v1621_v37, %v1292_v35  ;;  %1795 = vmatmul.bf16.gmra.mxu3 %v3367_v7  ;;  %v3372_v7 = vld [vmem:[%s3772_s25 + $0x3b8] sm:$0xf0] }
 0x21c   : > { %1331 = vmatmul.bf16.gmra.mxu0 %v3147_v31  ;;  %2054 = vst.msk [vmem:[%s3832_s7 + $0x18c] sm:$0xf] %vm1954_vm0, %v1925_v5 }
 0x21d   : > { %v1872_v47 = vpack.c.bf16 %v1622_v41, %v1622_v41  ;;  %v2175_v49 = vsel %vm2083_vm1, %v1622_v41, 0.0  ;;  %v2391_v51 = vmul.f32 %v1622_v41, %v1622_v41  ;;  %1660 = vmatmul.bf16.gmra.mxu1 %v3151_v34 }
 0x21e   : > { %v2176_v56 = vadd.f32 %v2175_v49, %v2174_v8  ;;  %v1427_v16 = vpop.f32.mrf.mxu2  ;;  %v1756_v34 = vpop.f32.mrf.mxu3  ;;  %v3370_v49 = vld [vmem:[%s3772_s25 + $0x3b0] sm:$0xf] }
 0x21f   : > { %2001 = vst.msk [vmem:[%s3832_s7 + $0xb8] sm:$0xf] %vm1954_vm0, %v1872_v47  ;;  %v2564_v1 = vsel %vm2083_vm1, %v2391_v51, 0.0  ;;  %v4430_v38 = vadd.f32 %v1756_v34, %v1427_v16 }
 0x220   : > { %v2565_v6 = vadd.f32 %v2564_v1, %v2563_v27 }
 0x221   : > { %v1294_v13 = vpop.f32.mrf.mxu0  ;;  %5086 = vst [vmem:[#allocation3_spill] sm:$0xff] %v4430_v38  ;;  %v1926_v44 = vpack.c.bf16 %v4430_v38, %v4430_v38 }
 0x222   : > { %v1623_v15 = vpop.f32.mrf.mxu1 }
 0x223   : > { %v1624_v8 = vadd.f32 %v1623_v15, %v1294_v13  ;;  %2055 = vst.msk [vmem:[%s3832_s7 + $0x190] sm:$0xf] %vm1954_vm0, %v1926_v44  ;;  %v3375_v15 = vor.u32 %v3593_v63, %v3372_v7 }
 0x225   : > { %v1873_v20 = vpack.c.bf16 %v1624_v8, %v1624_v8  ;;  %v2177_v26 = vsel %vm2083_vm1, %v1624_v8, 0.0  ;;  %v2392_v31 = vmul.f32 %v1624_v8, %v1624_v8 }
 0x226   : > { %v2178_v35 = vadd.f32 %v2177_v26, %v2176_v56  ;;  %v1429_v47 = vpop.f32.mrf.mxu2  ;;  %v1758_v56 = vpop.f32.mrf.mxu3 }
 0x227   : > { %2002 = vst.msk [vmem:[%s3832_s7 + $0xbc] sm:$0xf] %vm1954_vm0, %v1873_v20  ;;  %v2566_v27 = vsel %vm2083_vm1, %v2392_v31, 0.0  ;;  %v4440_v5 = vadd.f32 %v1758_v56, %v1429_v47 }
 0x228   : > { %v2567_v37 = vadd.f32 %v2566_v27, %v2565_v6  ;;  %v3371_v6 = vor.u32 %v3594_v58, %v3370_v49  ;;  %v3378_v58 = vld [vmem:[%s3772_s25 + $0x3c0] sm:$0xf] }
 0x229   : > { %v1297_v41 = vpop.f32.mrf.mxu0  ;;  %5087 = vst [vmem:[#allocation4_spill] sm:$0xff] %v4440_v5  ;;  %v1927_v16 = vpack.c.bf16 %v4440_v5, %v4440_v5 }
 0x22a   : > { %v1626_v43 = vpop.f32.mrf.mxu1  ;;  %1471 = vmatmul.bf16.gmra.mxu2 %v3371_v6 }
 0x22b   : > { %v1627_v45 = vadd.f32 %v1626_v43, %v1297_v41  ;;  %2056 = vst.msk [vmem:[%s3832_s7 + $0x194] sm:$0xf] %vm1954_vm0, %v1927_v16  ;;  %1800 = vmatmul.bf16.gmra.mxu3 %v3375_v15  ;;  %v3595_v15 = vld [vmem:[%s3772_s25 + $0x3c4] sm:$0xf] }
 0x22d   : > { %v1874_v51 = vpack.c.bf16 %v1627_v45, %v1627_v45  ;;  %v2179_v54 = vsel %vm2083_vm1, %v1627_v45, 0.0  ;;  %v2393_v55 = vmul.f32 %v1627_v45, %v1627_v45 }
 0x22e   : > { %v2180_v1 = vadd.f32 %v2179_v54, %v2178_v35  ;;  %v1432_v34 = vpop.f32.mrf.mxu2  ;;  %v1761_v43 = vpop.f32.mrf.mxu3 }
 0x22f   : > { %2003 = vst.msk [vmem:[%s3832_s7 + $0xc0] sm:$0xf] %vm1954_vm0, %v1874_v51  ;;  %v2568_v13 = vsel %vm2083_vm1, %v2393_v55, 0.0  ;;  %v4454_v47 = vadd.f32 %v1761_v43, %v1432_v34 }
 0x230   : > { %v2569_v8 = vadd.f32 %v2568_v13, %v2567_v37  ;;  %v3596_v13 = vld [vmem:[%s3772_s25 + $0x3c4] sm:$0xf0] }
 0x231   : > { %v1299_v20 = vpop.f32.mrf.mxu0  ;;  %5088 = vst [vmem:[#allocation5_spill] sm:$0xff] %v4454_v47  ;;  %v1928_v54 = vpack.c.bf16 %v4454_v47, %v4454_v47 }
 0x232   : > { %v1628_v26 = vpop.f32.mrf.mxu1 }
 0x233   : > { %v1629_v31 = vadd.f32 %v1628_v26, %v1299_v20  ;;  %2057 = vst.msk [vmem:[%s3832_s7 + $0x198] sm:$0xf] %vm1954_vm0, %v1928_v54  ;;  %v3379_v20 = vor.u32 %v3596_v13, %v3378_v58  ;;  %v3380_v26 = vld [vmem:[%s3772_s25 + $0x3c8] sm:$0xf0] }
 0x234   : > { %v3383_v34 = vor.u32 %v3595_v15, %v3380_v26 }
 0x235   : > { %v1875_v35 = vpack.c.bf16 %v1629_v31, %v1629_v31  ;;  %v2181_v27 = vsel %vm2083_vm1, %v1629_v31, 0.0  ;;  %v2394_v41 = vmul.f32 %v1629_v31, %v1629_v31 }
 0x236   : > { %v2182_v44 = vadd.f32 %v2181_v27, %v2180_v1  ;;  %v1434_v56 = vpop.f32.mrf.mxu2  ;;  %v1763_v7 = vpop.f32.mrf.mxu3 }
 0x237   : > { %2004 = vst.msk [vmem:[%s3832_s7 + $0xc4] sm:$0xf] %vm1954_vm0, %v1875_v35  ;;  %v2570_v37 = vsel %vm2083_vm1, %v2394_v41, 0.0  ;;  %v4464_v16 = vadd.f32 %v1763_v7, %v1434_v56 }
 0x238   : > { %v2571_v45 = vadd.f32 %v2570_v37, %v2569_v8 }
 0x239   : > { %v1302_v49 = vpop.f32.mrf.mxu0  ;;  %5089 = vst [vmem:[#allocation6_spill] sm:$0xff] %v4464_v16  ;;  %v1929_v27 = vpack.c.bf16 %v4464_v16, %v4464_v16 }
 0x23a   : > { %v1631_v51 = vpop.f32.mrf.mxu1  ;;  %1476 = vmatmul.bf16.gmra.mxu2 %v3379_v20 }
 0x23b   : > { %v1632_v55 = vadd.f32 %v1631_v51, %v1302_v49  ;;  %2058 = vst.msk [vmem:[%s3832_s7 + $0x19c] sm:$0xf] %vm1954_vm0, %v1929_v27  ;;  %1805 = vmatmul.bf16.gmra.mxu3 %v3383_v34  ;;  %v3597_v27 = vld [vmem:[%s3772_s25 + $0x3d4] sm:$0xf] }
 0x23d   : > { %v1876_v63 = vpack.c.bf16 %v1632_v55, %v1632_v55  ;;  %v2183_v1 = vsel %vm2083_vm1, %v1632_v55, 0.0  ;;  %v2395_v6 = vmul.f32 %v1632_v55, %v1632_v55 }
 0x23e   : > { %v2184_v8 = vadd.f32 %v2183_v1, %v2182_v44  ;;  %v1437_v37 = vpop.f32.mrf.mxu2  ;;  %v1766_v55 = vpop.f32.mrf.mxu3 }
 0x23f   : > { %2005 = vst.msk [vmem:[%s3832_s7 + $0xc8] sm:$0xf] %vm1954_vm0, %v1876_v63  ;;  %v2572_v31 = vsel %vm2083_vm1, %v2395_v6, 0.0  ;;  %v4478_v63 = vadd.f32 %v1766_v55, %v1437_v37  ;;  %v3388_v37 = vld [vmem:[%s3772_s25 + $0x3d8] sm:$0xf0] }
 0x240   : > { %v2573_v35 = vadd.f32 %v2572_v31, %v2571_v45 }
 0x241   : > { %v1304_v41 = vpop.f32.mrf.mxu0  ;;  %5090 = vst [vmem:[#allocation7_spill] sm:$0xff] %v4478_v63  ;;  %v1930_v7 = vpack.c.bf16 %v4478_v63, %v4478_v63 }
 0x242   : > { %v1633_v43 = vpop.f32.mrf.mxu1 }
 0x243   : > { %v1634_v44 = vadd.f32 %v1633_v43, %v1304_v41  ;;  %2059 = vst.msk [vmem:[%s3832_s7 + $0x1a0] sm:$0xf] %vm1954_vm0, %v1930_v7 }
 0x245   : > { %v1877_v49 = vpack.c.bf16 %v1634_v44, %v1634_v44  ;;  %v2185_v51 = vsel %vm2083_vm1, %v1634_v44, 0.0  ;;  %v2396_v54 = vmul.f32 %v1634_v44, %v1634_v44 }
 0x246   : > { %v2186_v56 = vadd.f32 %v2185_v51, %v2184_v8  ;;  %v1439_v15 = vpop.f32.mrf.mxu2  ;;  %v3386_v8 = vld [vmem:[%s3772_s25 + $0x3d0] sm:$0xf]  ;;  %v1768_v34 = vpop.f32.mrf.mxu3  ;;  %v3391_v51 = vor.u32 %v3597_v27, %v3388_v37  ;;  %v3394_v27 = vld [vmem:[%s3772_s25 + $0x3e0] sm:$0xf]  ;;  %v3600_v37 = vld [vmem:[%s3772_s25 + $0x3e4] sm:$0xf0] }
 0x247   : > { %2006 = vst.msk [vmem:[%s3832_s7 + $0xcc] sm:$0xf] %vm1954_vm0, %v1877_v49  ;;  %v2574_v45 = vsel %vm2083_vm1, %v2396_v54, 0.0  ;;  %v4488_v43 = vadd.f32 %v1768_v34, %v1439_v15 }
 0x248   : > { %v2575_v58 = vadd.f32 %v2574_v45, %v2573_v35  ;;  %v3598_v35 = vld [vmem:[%s3772_s25 + $0x3d4] sm:$0xf0] }
 0x249   : > { %v1307_v1 = vpop.f32.mrf.mxu0  ;;  %5091 = vst [vmem:[#allocation8_spill] sm:$0xff] %v4488_v43  ;;  %v3387_v44 = vor.u32 %v3598_v35, %v3386_v8  ;;  %v1931_v55 = vpack.c.bf16 %v4488_v43, %v4488_v43 }
 0x24a   : > { %v1636_v6 = vpop.f32.mrf.mxu1 }
 0x24b   : > { %v1637_v13 = vadd.f32 %v1636_v6, %v1307_v1  ;;  %1481 = vmatmul.bf16.gmra.mxu2 %v3387_v44  ;;  %2060 = vst.msk [vmem:[%s3832_s7 + $0x1a4] sm:$0xf] %vm1954_vm0, %v1931_v55  ;;  %1810 = vmatmul.bf16.gmra.mxu3 %v3391_v51  ;;  %v3395_v55 = vor.u32 %v3600_v37, %v3394_v27 }
 0x24d   : > { %v1878_v20 = vpack.c.bf16 %v1637_v13, %v1637_v13  ;;  %v2187_v26 = vsel %vm2083_vm1, %v1637_v13, 0.0  ;;  %v2397_v31 = vmul.f32 %v1637_v13, %v1637_v13 }
 0x24e   : > { %v2188_v41 = vadd.f32 %v2187_v26, %v2186_v56  ;;  %v1442_v6 = vpop.f32.mrf.mxu2  ;;  %v1771_v13 = vpop.f32.mrf.mxu3 }
 0x24f   : > { %2007 = vst.msk [vmem:[%s3832_s7 + $0xd0] sm:$0xf] %vm1954_vm0, %v1878_v20  ;;  %v2576_v49 = vsel %vm2083_vm1, %v2397_v31, 0.0  ;;  %v4510_v8 = vadd.f32 %v1771_v13, %v1442_v6 }
 0x250   : > { %v4494_v54 = vadd.f32 %v2576_v49, %v2575_v58  ;;  %v3599_v49 = vld [vmem:[%s3772_s25 + $0x3e4] sm:$0xf] }
 0x251   : > { %v1309_v45 = vpop.f32.mrf.mxu0  ;;  %5092 = vst [vmem:[#allocation9_spill] sm:$0xff] %v4510_v8  ;;  %v1932_v31 = vpack.c.bf16 %v4510_v8, %v4510_v8 }
 0x252   : > { %v1638_v1 = vpop.f32.mrf.mxu1 }
 0x253   : > { %v4500_v56 = vadd.f32 %v1638_v1, %v1309_v45  ;;  %2061 = vst.msk [vmem:[%s3832_s7 + $0x1a8] sm:$0xf] %vm1954_vm0, %v1932_v31  ;;  %v3396_v45 = vld [vmem:[%s3772_s25 + $0x3e8] sm:$0xf0] }
 0x254   : > { %v3399_v1 = vor.u32 %v3599_v49, %v3396_v45 }
 0x255   : > { %v1879_v7 = vpack.c.bf16 %v4500_v56, %v4500_v56  ;;  %v2189_v58 = vsel %vm2083_vm1, %v4500_v56, 0.0 }
 0x256   : > { %v4506_v15 = vadd.f32 %v2189_v58, %v2188_v41  ;;  %v1444_v35 = vpop.f32.mrf.mxu2  ;;  %v1773_v44 = vpop.f32.mrf.mxu3 }
 0x257   : > { %2008 = vst.msk [vmem:[%s3832_s7 + $0xd4] sm:$0xf] %vm1954_vm0, %v1879_v7  ;;  %v4523_v51 = vadd.f32 %v1773_v44, %v1444_v35 }
 0x259   : > { %v1312_v20 = vpop.f32.mrf.mxu0  ;;  %5093 = vst [vmem:[#allocation10_spill] sm:$0xff] %v4523_v51  ;;  %v1933_v6 = vpack.c.bf16 %v4523_v51, %v4523_v51 }
 0x25a   : > { %v1641_v26 = vpop.f32.mrf.mxu1 }
 0x25b   : > { %v4514_v34 = vadd.f32 %v1641_v26, %v1312_v20  ;;  %1486 = vmatmul.bf16.gmra.mxu2 %v3395_v55  ;;  %2062 = vst.msk [vmem:[%s3832_s7 + $0x1ac] sm:$0xf] %vm1954_vm0, %v1933_v6  ;;  %1815 = vmatmul.bf16.gmra.mxu3 %v3399_v1  ;;  %v3402_v55 = vld [vmem:[%s3772_s25 + $0x3f0] sm:$0xf]  ;;  %v3602_v6 = vld [vmem:[%s3772_s25 + $0x3f4] sm:$0xf0] }
 0x25d   : > { %v1880_v41 = vpack.c.bf16 %v4514_v34, %v4514_v34 }
 0x25e   : > { %v1447_v20 = vpop.f32.mrf.mxu2  ;;  %v1776_v31 = vpop.f32.mrf.mxu3 }
 0x25f   : > { %2009 = vst.msk [vmem:[%s3832_s7 + $0xd8] sm:$0xf] %vm1954_vm0, %v1880_v41  ;;  %v4538_v35 = vadd.f32 %v1776_v31, %v1447_v20  ;;  %v3403_v20 = vor.u32 %v3602_v6, %v3402_v55 }
 0x261   : > { %v1314_v7 = vpop.f32.mrf.mxu0  ;;  %5094 = vst [vmem:[#allocation11_spill] sm:$0xff] %v4538_v35  ;;  %v1934_v44 = vpack.c.bf16 %v4538_v35, %v4538_v35 }
 0x262   : > { %v1643_v58 = vpop.f32.mrf.mxu1 }
 0x263   : > { %v4532_v13 = vadd.f32 %v1643_v58, %v1314_v7  ;;  %2063 = vst.msk [vmem:[%s3832_s7 + $0x1b0] sm:$0xf] %vm1954_vm0, %v1934_v44  ;;  %v3601_v7 = vld [vmem:[%s3772_s25 + $0x3f4] sm:$0xf] }
 0x265   : > { %v1881_v26 = vpack.c.bf16 %v4532_v13, %v4532_v13 }
 0x266   : > { %v1449_v49 = vpop.f32.mrf.mxu2  ;;  %v1778_v1 = vpop.f32.mrf.mxu3 }
 0x267   : > { %2010 = vst.msk [vmem:[%s3832_s7 + $0xdc] sm:$0xf] %vm1954_vm0, %v1881_v26  ;;  %v4551_v58 = vadd.f32 %v1778_v1, %v1449_v49  ;;  %v3404_v26 = vld [vmem:[%s3772_s25 + $0x3f8] sm:$0xf0] }
 0x268   : > { %v3407_v31 = vor.u32 %v3601_v7, %v3404_v26 }
 0x269   : > { %v1317_v27 = vpop.f32.mrf.mxu0  ;;  %5095 = vst [vmem:[#allocation12_spill] sm:$0xff] %v4551_v58 }
 0x26a   : > { %v1646_v41 = vpop.f32.mrf.mxu1 }
 0x26b   : > { %v4542_v37 = vadd.f32 %v1646_v41, %v1317_v27  ;;  %v1935_v27 = vpack.c.bf16 %v4551_v58, %v4551_v58  ;;  %1491 = vmatmul.bf16.gmra.mxu2 %v3403_v20  ;;  %1820 = vmatmul.bf16.gmra.mxu3 %v3407_v31 }
 0x26d   : > { %v1882_v45 = vpack.c.bf16 %v4542_v37, %v4542_v37  ;;  %2064 = vst.msk [vmem:[%s3832_s7 + $0x1b4] sm:$0xf] %vm1954_vm0, %v1935_v27 }
 0x26e   : > { %v1452_v51 = vpop.f32.mrf.mxu2  ;;  %v1781_v1 = vpop.f32.mrf.mxu3 }
 0x26f   : > { %2011 = vst.msk [vmem:[%s3832_s7 + $0xe0] sm:$0xf] %vm1954_vm0, %v1882_v45  ;;  %v4562_v55 = vadd.f32 %v1781_v1, %v1452_v51 }
 0x271   : > { %v1319_v41 = vpop.f32.mrf.mxu0  ;;  %5096 = vst [vmem:[#allocation13_spill] sm:$0xff] %v4562_v55  ;;  %v1936_v7 = vpack.c.bf16 %v4562_v55, %v4562_v55 }
 0x272   : > { %v1648_v44 = vpop.f32.mrf.mxu1 }
 0x273   : > { %v1649_v35 = vadd.f32 %v1648_v44, %v1319_v41  ;;  %2065 = vst.msk [vmem:[%s3832_s7 + $0x1b8] sm:$0xf] %vm1954_vm0, %v1936_v7 }
 0x275   : > { %v1883_v49 = vpack.c.bf16 %v1649_v35, %v1649_v35  ;;  %v2402_v63 = vmul.f32 %v1649_v35, %v1649_v35 }
 0x276   : > { %v1454_v26 = vpop.f32.mrf.mxu2  ;;  %v1783_v27 = vpop.f32.mrf.mxu3 }
 0x277   : > { %2012 = vst.msk [vmem:[%s3832_s7 + $0xe4] sm:$0xf] %vm1954_vm0, %v1883_v49  ;;  %v4568_v41 = vadd.f32 %v1783_v27, %v1454_v26 }
 0x279   : > { %v1322_v45 = vpop.f32.mrf.mxu0  ;;  %5097 = vst [vmem:[#allocation14_spill] sm:$0xff] %v4568_v41  ;;  %v1937_v51 = vpack.c.bf16 %v4568_v41, %v4568_v41  ;;  %v2398_v41 = vmul.f32 %v4500_v56, %v4500_v56  ;;  %v2191_v56 = vsel %vm2083_vm1, %v4514_v34, 0.0 }
 0x27a   : > { %v1651_v6 = vpop.f32.mrf.mxu1 }
 0x27b   : > { %v1652_v20 = vadd.f32 %v1651_v6, %v1322_v45  ;;  %2066 = vst.msk [vmem:[%s3832_s7 + $0x1bc] sm:$0xf] %vm1954_vm0, %v1937_v51 }
 0x27d   : > { %v1884_v31 = vpack.c.bf16 %v1652_v20, %v1652_v20  ;;  %v2403_v5 = vmul.f32 %v1652_v20, %v1652_v20 }
 0x27e   : > { %v1457_v55 = vpop.f32.mrf.mxu2  ;;  %v1786_v6 = vpop.f32.mrf.mxu3 }
 0x27f   : > { %2013 = vst.msk [vmem:[%s3832_s7 + $0xe8] sm:$0xf] %vm1954_vm0, %v1884_v31  ;;  %v4578_v58 = vadd.f32 %v1786_v6, %v1457_v55  ;;  %v2578_v6 = vsel %vm2083_vm1, %v2398_v41, 0.0  ;;  %v2588_v53 = vsel %vm2083_vm1, %v2403_v5, 0.0 }
 0x281   : > { %v1324_v44 = vpop.f32.mrf.mxu0  ;;  %5098 = vst [vmem:[#allocation15_spill] sm:$0xff] %v4578_v58  ;;  %v1938_v51 = vpack.c.bf16 %v4578_v58, %v4578_v58 }
 0x282   : > { %v1653_v49 = vpop.f32.mrf.mxu1 }
 0x283   : > { %v1654_v1 = vadd.f32 %v1653_v49, %v1324_v44  ;;  %2067 = vst.msk [vmem:[%s3832_s7 + $0x1c0] sm:$0xf] %vm1954_vm0, %v1938_v51  ;;  %v2401_v51 = vmul.f32 %v4542_v37, %v4542_v37 }
 0x285   : > { %v1885_v45 = vpack.c.bf16 %v1654_v1, %v1654_v1  ;;  %v2584_v38 = vsel %vm2083_vm1, %v2401_v51, 0.0 }
 0x286   : > { %v1459_v31 = vpop.f32.mrf.mxu2  ;;  %v1788_v44 = vpop.f32.mrf.mxu3 }
 0x287   : > { %2014 = vst.msk [vmem:[%s3832_s7 + $0xec] sm:$0xf] %vm1954_vm0, %v1885_v45  ;;  %v4584_v49 = vadd.f32 %v1788_v44, %v1459_v31  ;;  %v2399_v45 = vmul.f32 %v4514_v34, %v4514_v34  ;;  %v2192_v34 = vadd.f32 %v2191_v56, %v4506_v15  ;;  %v2586_v56 = vsel %vm2083_vm1, %v2402_v63, 0.0 }
 0x289   : > { %v1327_v7 = vpop.f32.mrf.mxu0  ;;  %5099 = vst [vmem:[#allocation16_spill] sm:$0xff] %v4584_v49  ;;  %v1939_v55 = vpack.c.bf16 %v4584_v49, %v4584_v49  ;;  %v2580_v44 = vsel %vm2083_vm1, %v2399_v45, 0.0  ;;  %v2579_v49 = vadd.f32 %v2578_v6, %v4494_v54  ;;  %v2404_v6 = vmul.f32 %v1654_v1, %v1654_v1 }
 0x28a   : > { %v1656_v26 = vpop.f32.mrf.mxu1 }
 0x28b   : > { %v1657_v27 = vadd.f32 %v1656_v26, %v1327_v7  ;;  %v2400_v7 = vmul.f32 %v4532_v13, %v4532_v13  ;;  %2068 = vst.msk [vmem:[%s3832_s7 + $0x1c4] sm:$0xf] %vm1954_vm0, %v1939_v55  ;;  %v2195_v55 = vsel %vm2083_vm1, %v4542_v37, 0.0  ;;  %v2581_v47 = vadd.f32 %v2580_v44, %v2579_v49 }
 0x28d   : > { %v1886_v8 = vpack.c.bf16 %v1657_v27, %v1657_v27  ;;  %v2582_v43 = vsel %vm2083_vm1, %v2400_v7, 0.0  ;;  %v2199_v7 = vsel %vm2083_vm1, %v1652_v20, 0.0  ;;  %v2405_v51 = vmul.f32 %v1657_v27, %v1657_v27 }
 0x28e   : > { %v1462_v58 = vpop.f32.mrf.mxu2  ;;  %v1791_v16 = vpop.f32.mrf.mxu3  ;;  %v2583_v54 = vadd.f32 %v2582_v43, %v2581_v47 }
 0x28f   : > { %2015 = vst.msk [vmem:[%s3832_s7 + $0xf0] sm:$0xf] %vm1954_vm0, %v1886_v8  ;;  %v2193_v8 = vsel %vm2083_vm1, %v4532_v13, 0.0 }
 0x290   : > { %v2194_v13 = vadd.f32 %v2193_v8, %v2192_v34  ;;  %v2585_v37 = vadd.f32 %v2584_v38, %v2583_v54  ;;  %v2201_v8 = vsel %vm2083_vm1, %v1654_v1, 0.0  ;;  %v2203_v38 = vsel %vm2083_vm1, %v1657_v27, 0.0 }
 0x291   : > { %v1329_v26 = vpop.f32.mrf.mxu0 }
 0x292   : > { %v1658_v31 = vpop.f32.mrf.mxu1  ;;  %v2196_v15 = vadd.f32 %v2195_v55, %v2194_v13  ;;  %v2587_v47 = vadd.f32 %v2586_v56, %v2585_v37  ;;  %v2590_v55 = vsel %vm2083_vm1, %v2404_v6, 0.0 }
 0x293   : > { %v1659_v41 = vadd.f32 %v1658_v31, %v1329_v26  ;;  %v2197_v26 = vsel %vm2083_vm1, %v1649_v35, 0.0  ;;  %v4619_v35 = vadd.f32 %v1791_v16, %v1462_v58  ;;  %v2592_v16 = vsel %vm2083_vm1, %v2405_v51, 0.0 }
 0x294   : > { %v2198_v31 = vadd.f32 %v2197_v26, %v2196_v15  ;;  %v2589_v1 = vadd.f32 %v2588_v53, %v2587_v47 }
 0x295   : > { %v1887_v45 = vpack.c.bf16 %v1659_v41, %v1659_v41  ;;  %v2406_v20 = vmul.f32 %v1659_v41, %v1659_v41  ;;  %v1940_v5 = vpack.c.bf16 %v4619_v35, %v4619_v35  ;;  %v2205_v58 = vsel %vm2083_vm1, %v1659_v41, 0.0 }
 0x296   : > { %v2200_v43 = vadd.f32 %v2199_v7, %v2198_v31  ;;  %v1464_v63 = vpop.f32.mrf.mxu2  ;;  %v1793_v13 = vpop.f32.mrf.mxu3  ;;  %v2591_v6 = vadd.f32 %v2590_v55, %v2589_v1  ;;  %v2409_v55 = vmul.f32 %v3930_v10, %v3930_v10  ;;  %v2410_v1 = vmul.f32 %v3936_v19, %v3936_v19 }
 0x297   : > { %2016 = vst.msk [vmem:[%s3832_s7 + $0xf4] sm:$0xf] %vm1954_vm0, %v1887_v45  ;;  %v4625_v54 = vadd.f32 %v1793_v13, %v1464_v63  ;;  %v2594_v53 = vsel %vm2083_vm1, %v2406_v20, 0.0  ;;  %v2211_v13 = vsel %vm2083_vm1, %v3930_v10, 0.0 }
 0x298   : > { %v2202_v26 = vadd.f32 %v2201_v8, %v2200_v43  ;;  %2069 = vst.msk [vmem:[%s3832_s7 + $0x1c8] sm:$0xf] %vm1954_vm0, %v1940_v5  ;;  %v2593_v37 = vadd.f32 %v2592_v16, %v2591_v6  ;;  %v2213_v6 = vsel %vm2083_vm1, %v3936_v19, 0.0  ;;  %v2602_v10 = vsel %vm2083_vm1, %v2410_v1, 0.0 }
 0x299   : > { %v1332_v49 = vpop.f32.mrf.mxu0  ;;  %v1941_v56 = vpack.c.bf16 %v4625_v54, %v4625_v54  ;;  %v2221_v1 = vsel %vm2083_vm1, %v3992_v33, 0.0 }
 0x29a   : > { %v1661_v44 = vpop.f32.mrf.mxu1  ;;  %v2204_v27 = vadd.f32 %v2203_v38, %v2202_v26  ;;  %v2595_v51 = vadd.f32 %v2594_v53, %v2593_v37  ;;  %v2412_v37 = vmul.f32 %v3964_v57, %v3964_v57 }
 0x29b   : > { %v1662_v34 = vadd.f32 %v1661_v44, %v1332_v49  ;;  %2070 = vst.msk [vmem:[%s3832_s7 + $0x1cc] sm:$0xf] %vm1954_vm0, %v1941_v56 }
 0x29c   : > { %v2206_v31 = vadd.f32 %v2205_v58, %v2204_v27  ;;  %v2411_v27 = vmul.f32 %v3958_v48, %v3958_v48 }
 0x29d   : > { %v1888_v45 = vpack.c.bf16 %v1662_v34, %v1662_v34  ;;  %v2407_v15 = vmul.f32 %v1662_v34, %v1662_v34  ;;  %v2207_v7 = vsel %vm2083_vm1, %v1662_v34, 0.0 }
 0x29e   : > { %v2208_v47 = vadd.f32 %v2207_v7, %v2206_v31  ;;  %v1467_v43 = vpop.f32.mrf.mxu2  ;;  %v1796_v20 = vpop.f32.mrf.mxu3  ;;  %v2215_v7 = vsel %vm2083_vm1, %v3958_v48, 0.0  ;;  %v2604_v19 = vsel %vm2083_vm1, %v2411_v27, 0.0 }
 0x29f   : > { %2017 = vst.msk [vmem:[%s3832_s7 + $0xf8] sm:$0xf] %vm1954_vm0, %v1888_v45  ;;  %v2596_v41 = vsel %vm2083_vm1, %v2407_v15, 0.0  ;;  %v2600_v15 = vsel %vm2083_vm1, %v2409_v55, 0.0  ;;  %v4660_v31 = vadd.f32 %v1796_v20, %v1467_v43 }
 0x2a0   : > { %v2597_v45 = vadd.f32 %v2596_v41, %v2595_v51  ;;  %v2413_v51 = vmul.f32 %v3986_v24, %v3986_v24 }
 0x2a1   : > { %v1334_v49 = vpop.f32.mrf.mxu0  ;;  %v1942_v48 = vpack.c.bf16 %v4660_v31, %v4660_v31 }
 0x2a2   : > { %v1663_v44 = vpop.f32.mrf.mxu1 }
 0x2a3   : > { %v1664_v8 = vadd.f32 %v1663_v44, %v1334_v49  ;;  %2071 = vst.msk [vmem:[%s3832_s7 + $0x1d0] sm:$0xf] %vm1954_vm0, %v1942_v48 }
 0x2a5   : > { %v1889_v63 = vpack.c.bf16 %v1664_v8, %v1664_v8  ;;  %v2209_v38 = vsel %vm2083_vm1, %v1664_v8, 0.0  ;;  %v2408_v34 = vmul.f32 %v1664_v8, %v1664_v8  ;;  %v2217_v8 = vsel %vm2083_vm1, %v3964_v57, 0.0 }
 0x2a6   : > { %v2210_v5 = vadd.f32 %v2209_v38, %v2208_v47  ;;  %v1469_v41 = vpop.f32.mrf.mxu2  ;;  %v1798_v47 = vpop.f32.mrf.mxu3  ;;  %v2606_v38 = vsel %vm2083_vm1, %v2412_v37, 0.0  ;;  %v2414_v57 = vmul.f32 %v3992_v33, %v3992_v33 }
 0x2a7   : > { %2018 = vst.msk [vmem:[%s3832_s7 + $0xfc] sm:$0xf] %vm1954_vm0, %v1889_v63  ;;  %v2598_v26 = vsel %vm2083_vm1, %v2408_v34, 0.0  ;;  %v4669_v43 = vadd.f32 %v1798_v47, %v1469_v41  ;;  %v2219_v34 = vsel %vm2083_vm1, %v3986_v24, 0.0  ;;  %v2419_v47 = vmul.f32 %v4070_v22, %v4070_v22 }
 0x2a8   : > { %v2212_v16 = vadd.f32 %v2211_v13, %v2210_v5  ;;  %v2599_v58 = vadd.f32 %v2598_v26, %v2597_v45  ;;  %v2608_v13 = vsel %vm2083_vm1, %v2413_v51, 0.0  ;;  %v2415_v26 = vmul.f32 %v4014_v0, %v4014_v0 }
 0x2a9   : > { %v1943_v5 = vpack.c.bf16 %v4669_v43, %v4669_v43 }
 0x2aa   : > { %v2214_v56 = vadd.f32 %v2213_v6, %v2212_v16  ;;  %v2601_v53 = vadd.f32 %v2600_v15, %v2599_v58  ;;  %v2610_v58 = vsel %vm2083_vm1, %v2414_v57, 0.0  ;;  %v2223_v15 = vsel %vm2083_vm1, %v4014_v0, 0.0 }
 0x2ab   : > { %2072 = vst.msk [vmem:[%s3832_s7 + $0x1d4] sm:$0xf] %vm1954_vm0, %v1943_v5  ;;  %v2416_v6 = vmul.f32 %v4020_v9, %v4020_v9  ;;  %v2612_v33 = vsel %vm2083_vm1, %v2415_v26, 0.0  ;;  %v2227_v0 = vsel %vm2083_vm1, %v4042_v42, 0.0 }
 0x2ac   : > { %v2216_v49 = vadd.f32 %v2215_v7, %v2214_v56  ;;  %v2603_v44 = vadd.f32 %v2602_v10, %v2601_v53  ;;  %v2225_v10 = vsel %vm2083_vm1, %v4020_v9, 0.0  ;;  %v2417_v7 = vmul.f32 %v4042_v42, %v4042_v42 }
 0x2ad   : > { %v2614_v41 = vsel %vm2083_vm1, %v2416_v6, 0.0  ;;  %v2229_v9 = vsel %vm2083_vm1, %v4048_v52, 0.0  ;;  %v2231_v42 = vsel %vm2083_vm1, %v4070_v22, 0.0  ;;  %v2235_v6 = vsel %vm2083_vm1, %v4098_v3, 0.0 }
 0x2ae   : > { %v2218_v55 = vadd.f32 %v2217_v8, %v2216_v49  ;;  %v2605_v63 = vadd.f32 %v2604_v19, %v2603_v44  ;;  %v1472_v53 = vpop.f32.mrf.mxu2  ;;  %v1801_v37 = vpop.f32.mrf.mxu3  ;;  %v2418_v19 = vmul.f32 %v4048_v52, %v4048_v52  ;;  %v2616_v48 = vsel %vm2083_vm1, %v2417_v7, 0.0 }
 0x2af   : > { %v4712_v57 = vadd.f32 %v1801_v37, %v1472_v53  ;;  %v2620_v52 = vsel %vm2083_vm1, %v2419_v47, 0.0  ;;  %v2423_v7 = vmul.f32 %v4126_v50, %v4126_v50 }
 0x2b0   : > { %v2220_v20 = vadd.f32 %v2219_v34, %v2218_v55  ;;  %v2607_v45 = vadd.f32 %v2606_v38, %v2605_v63  ;;  %v2618_v38 = vsel %vm2083_vm1, %v2418_v19, 0.0  ;;  %v2420_v34 = vmul.f32 %v4076_v32, %v4076_v32 }
 0x2b1   : > { %v1944_v22 = vpack.c.bf16 %v4712_v57, %v4712_v57 }
 0x2b2   : > { %v2222_v16 = vadd.f32 %v2221_v1, %v2220_v20  ;;  %v2609_v24 = vadd.f32 %v2608_v13, %v2607_v45  ;;  %v2233_v13 = vsel %vm2083_vm1, %v4076_v32, 0.0  ;;  %v2421_v1 = vmul.f32 %v4098_v3, %v4098_v3 }
 0x2b3   : > { %v2422_v32 = vmul.f32 %v4104_v14, %v4104_v14  ;;  %2073 = vst.msk [vmem:[%s3832_s7 + $0x1d8] sm:$0xf] %vm1954_vm0, %v1944_v22 }
 0x2b4   : > { %v2224_v27 = vadd.f32 %v2223_v15, %v2222_v16  ;;  %v2611_v56 = vadd.f32 %v2610_v58, %v2609_v24  ;;  %v2622_v15 = vsel %vm2083_vm1, %v2420_v34, 0.0 }
 0x2b6   : > { %v2226_v49 = vadd.f32 %v2225_v10, %v2224_v27  ;;  %v2613_v44 = vadd.f32 %v2612_v33, %v2611_v56  ;;  %v1474_v5 = vpop.f32.mrf.mxu2  ;;  %v1803_v26 = vpop.f32.mrf.mxu3  ;;  %v2624_v33 = vsel %vm2083_vm1, %v2421_v1, 0.0  ;;  %v2237_v10 = vsel %vm2083_vm1, %v4104_v14, 0.0 }
 0x2b7   : > { %v4721_v58 = vadd.f32 %v1803_v26, %v1474_v5  ;;  %v2628_v14 = vsel %vm2083_vm1, %v2423_v7, 0.0  ;;  %v2428_v1 = vmul.f32 %v4190_v40, %v4190_v40 }
 0x2b8   : > { %v2228_v8 = vadd.f32 %v2227_v0, %v2226_v49  ;;  %v2615_v51 = vadd.f32 %v2614_v41, %v2613_v44  ;;  %v2626_v49 = vsel %vm2083_vm1, %v2422_v32, 0.0  ;;  %v2239_v44 = vsel %vm2083_vm1, %v4126_v50, 0.0 }
 0x2b9   : > { %v1945_v53 = vpack.c.bf16 %v4721_v58, %v4721_v58  ;;  %v2424_v41 = vmul.f32 %v4132_v61, %v4132_v61  ;;  %v2243_v50 = vsel %vm2083_vm1, %v4154_v36, 0.0 }
 0x2ba   : > { %v2230_v55 = vadd.f32 %v2229_v9, %v2228_v8  ;;  %v2617_v63 = vadd.f32 %v2616_v48, %v2615_v51  ;;  %v2241_v51 = vsel %vm2083_vm1, %v4132_v61, 0.0  ;;  %v2425_v48 = vmul.f32 %v4154_v36, %v4154_v36 }
 0x2bb   : > { %2074 = vst.msk [vmem:[%s3832_s7 + $0x1dc] sm:$0xf] %vm1954_vm0, %v1945_v53  ;;  %v2245_v61 = vsel %vm2083_vm1, %v4160_v46, 0.0  ;;  %v2247_v36 = vsel %vm2083_vm1, %v4182_v23, 0.0 }
 0x2bc   : > { %v2232_v20 = vadd.f32 %v2231_v42, %v2230_v55  ;;  %v2619_v45 = vadd.f32 %v2618_v38, %v2617_v63  ;;  %v2630_v63 = vsel %vm2083_vm1, %v2424_v41, 0.0  ;;  %v2426_v38 = vmul.f32 %v4160_v46, %v4160_v46 }
 0x2bd   : > { %v2431_v41 = vmul.f32 %v4238_v4, %v4238_v4 }
 0x2be   : > { %v2234_v16 = vadd.f32 %v2233_v13, %v2232_v20  ;;  %v2621_v24 = vadd.f32 %v2620_v52, %v2619_v45  ;;  %v1477_v8 = vpop.f32.mrf.mxu2  ;;  %v1806_v9 = vpop.f32.mrf.mxu3  ;;  %v2632_v20 = vsel %vm2083_vm1, %v2425_v48, 0.0  ;;  %v2427_v45 = vmul.f32 %v4182_v23, %v4182_v23 }
 0x2bf   : > { %v2634_v13 = vsel %vm2083_vm1, %v2426_v38, 0.0  ;;  %v4764_v22 = vadd.f32 %v1806_v9, %v1477_v8  ;;  %v2255_v8 = vsel %vm2083_vm1, %v4238_v4, 0.0  ;;  %v2259_v4 = vsel %vm2083_vm1, %v4266_v62, 0.0 }
 0x2c0   : > { %v2236_v27 = vadd.f32 %v2235_v6, %v2234_v16  ;;  %v2623_v56 = vadd.f32 %v2622_v15, %v2621_v24  ;;  %v2636_v46 = vsel %vm2083_vm1, %v2427_v45, 0.0  ;;  %v2249_v15 = vsel %vm2083_vm1, %v4190_v40, 0.0 }
 0x2c1   : > { %v2429_v6 = vmul.f32 %v4210_v12, %v4210_v12  ;;  %v1946_v23 = vpack.c.bf16 %v4764_v22, %v4764_v22  ;;  %v2430_v40 = vmul.f32 %v4218_v30, %v4218_v30 }
 0x2c2   : > { %v2238_v37 = vadd.f32 %v2237_v10, %v2236_v27  ;;  %v2625_v3 = vadd.f32 %v2624_v33, %v2623_v56  ;;  %v2638_v33 = vsel %vm2083_vm1, %v2428_v1, 0.0  ;;  %v2251_v10 = vsel %vm2083_vm1, %v4210_v12, 0.0 }
 0x2c3   : > { %2075 = vst.msk [vmem:[%s3832_s7 + $0x1e0] sm:$0xf] %vm1954_vm0, %v1946_v23  ;;  %v2436_v1 = vmul.f32 %v4302_v17, %v4302_v17 }
 0x2c4   : > { %v2240_v0 = vadd.f32 %v2239_v44, %v2238_v37  ;;  %v2627_v19 = vadd.f32 %v2626_v49, %v2625_v3  ;;  %v2640_v49 = vsel %vm2083_vm1, %v2429_v6, 0.0  ;;  %v2253_v44 = vsel %vm2083_vm1, %v4218_v30, 0.0 }
 0x2c5   : > { %v2644_v30 = vsel %vm2083_vm1, %v2431_v41, 0.0  ;;  %v2437_v6 = vmul.f32 %v4322_v60, %v4322_v60 }
 0x2c6   : > { %v2242_v47 = vadd.f32 %v2241_v51, %v2240_v0  ;;  %v2629_v55 = vadd.f32 %v2628_v14, %v2627_v19  ;;  %v1479_v24 = vpop.f32.mrf.mxu2  ;;  %v1808_v32 = vpop.f32.mrf.mxu3  ;;  %v2642_v19 = vsel %vm2083_vm1, %v2430_v40, 0.0  ;;  %v2432_v14 = vmul.f32 %v4246_v25, %v4246_v25 }
 0x2c7   : > { %v4773_v53 = vadd.f32 %v1808_v32, %v1479_v24 }
 0x2c8   : > { %v2244_v42 = vadd.f32 %v2243_v50, %v2242_v47  ;;  %v2631_v34 = vadd.f32 %v2630_v63, %v2629_v55  ;;  %v2257_v47 = vsel %vm2083_vm1, %v4246_v25, 0.0  ;;  %v2433_v55 = vmul.f32 %v4266_v62, %v4266_v62 }
 0x2c9   : > { %v1947_v3 = vpack.c.bf16 %v4773_v53, %v4773_v53  ;;  %v2261_v25 = vsel %vm2083_vm1, %v4274_v18, 0.0  ;;  %v2263_v62 = vsel %vm2083_vm1, %v4294_v59, 0.0 }
 0x2ca   : > { %v2246_v5 = vadd.f32 %v2245_v61, %v2244_v42  ;;  %v2633_v52 = vadd.f32 %v2632_v20, %v2631_v34  ;;  %v2646_v42 = vsel %vm2083_vm1, %v2432_v14, 0.0  ;;  %v2434_v34 = vmul.f32 %v4274_v18, %v4274_v18 }
 0x2cb   : > { %2076 = vst.msk [vmem:[%s3832_s7 + $0x1e4] sm:$0xf] %vm1954_vm0, %v1947_v3  ;;  %v2648_v45 = vsel %vm2083_vm1, %v2433_v55, 0.0  ;;  %v2656_v3 = vsel %vm2083_vm1, %v2437_v6, 0.0 }
 0x2cc   : > { %v2248_v26 = vadd.f32 %v2247_v36, %v2246_v5  ;;  %v2635_v16 = vadd.f32 %v2634_v13, %v2633_v52  ;;  %v2435_v5 = vmul.f32 %v4294_v59, %v4294_v59  ;;  %v2650_v36 = vsel %vm2083_vm1, %v2434_v34, 0.0 }
 0x2cd   : > { %v2443_v34 = vmul.f32 %v4406_v28, %v4406_v28 }
 0x2ce   : > { %v2250_v27 = vadd.f32 %v2249_v15, %v2248_v26  ;;  %v2637_v56 = vadd.f32 %v2636_v46, %v2635_v16  ;;  %v1482_v9 = vpop.f32.mrf.mxu2  ;;  %v1811_v63 = vpop.f32.mrf.mxu3  ;;  %v2652_v18 = vsel %vm2083_vm1, %v2435_v5, 0.0  ;;  %v2265_v15 = vsel %vm2083_vm1, %v4302_v17, 0.0 }
 0x2cf   : > { %v4816_v26 = vadd.f32 %v1811_v63, %v1482_v9  ;;  %v2438_v17 = vmul.f32 %v4330_v21, %v4330_v21  ;;  %v2441_v9 = vmul.f32 %v4378_v11, %v4378_v11 }
 0x2d0   : > { %v2252_v7 = vadd.f32 %v2251_v10, %v2250_v27  ;;  %v2639_v37 = vadd.f32 %v2638_v33, %v2637_v56  ;;  %v2654_v33 = vsel %vm2083_vm1, %v2436_v1, 0.0  ;;  %v2267_v10 = vsel %vm2083_vm1, %v4322_v60, 0.0 }
 0x2d1   : > { %v1948_v59 = vpack.c.bf16 %v4816_v26, %v4816_v26 }
 0x2d2   : > { %v2254_v0 = vadd.f32 %v2253_v44, %v2252_v7  ;;  %v2641_v12 = vadd.f32 %v2640_v49, %v2639_v37  ;;  %v2269_v49 = vsel %vm2083_vm1, %v4330_v21, 0.0  ;;  %v2439_v44 = vmul.f32 %v4350_v2, %v4350_v2 }
 0x2d3   : > { %2077 = vst.msk [vmem:[%s3832_s7 + $0x1e8] sm:$0xf] %vm1954_vm0, %v1948_v59 }
 0x2d4   : > { %v2256_v51 = vadd.f32 %v2255_v8, %v2254_v0  ;;  %v2643_v48 = vadd.f32 %v2642_v19, %v2641_v12  ;;  %v2658_v0 = vsel %vm2083_vm1, %v2438_v17, 0.0  ;;  %v2271_v12 = vsel %vm2083_vm1, %v4350_v2, 0.0 }
 0x2d5   : > { %v2440_v19 = vmul.f32 %v4358_v29, %v4358_v29  ;;  %v2660_v21 = vsel %vm2083_vm1, %v2439_v44, 0.0  ;;  %v2275_v2 = vsel %vm2083_vm1, %v4378_v11, 0.0  ;;  %v2279_v11 = vsel %vm2083_vm1, %v4406_v28, 0.0 }
 0x2d6   : > { %v2258_v50 = vadd.f32 %v2257_v47, %v2256_v51  ;;  %v2645_v38 = vadd.f32 %v2644_v30, %v2643_v48  ;;  %v1484_v46 = vpop.f32.mrf.mxu2  ;;  %v1813_v23 = vpop.f32.mrf.mxu3  ;;  %v2273_v48 = vsel %vm2083_vm1, %v4358_v29, 0.0  ;;  %v2277_v29 = vsel %vm2083_vm1, %v4386_v39, 0.0 }
 0x2d7   : > { %v4825_v56 = vadd.f32 %v1813_v23, %v1484_v46  ;;  %v2662_v63 = vsel %vm2083_vm1, %v2440_v19, 0.0 }
 0x2d8   : > { %v2647_v20 = vadd.f32 %v2646_v42, %v2645_v38  ;;  %v2260_v61 = vadd.f32 %v2259_v4, %v2258_v50  ;;  %v2442_v50 = vmul.f32 %v4386_v39, %v4386_v39  ;;  %v2664_v4 = vsel %vm2083_vm1, %v2441_v9, 0.0 }
 0x2d9   : > { %v1949_v37 = vpack.c.bf16 %v4825_v56, %v4825_v56  ;;  %v2668_v39 = vsel %vm2083_vm1, %v2443_v34, 0.0 }
 0x2da   : > { %v2262_v52 = vadd.f32 %v2261_v25, %v2260_v61  ;;  %v2649_v13 = vadd.f32 %v2648_v45, %v2647_v20  ;;  %v2666_v45 = vsel %vm2083_vm1, %v2442_v50, 0.0  ;;  %v5100_v25 = vld [vmem:[#allocation2_spill] sm:$0xff]  ;;  %v5106_v50 = vld [vmem:[#allocation8_spill] sm:$0xff] }
 0x2db   : > { %2078 = vst.msk [vmem:[%s3832_s7 + $0x1ec] sm:$0xf] %vm1954_vm0, %v1949_v37  ;;  %v2444_v5 = vmul.f32 %v5100_v25, %v5100_v25  ;;  %v2281_v1 = vsel %vm2083_vm1, %v5100_v25, 0.0  ;;  %v5103_v37 = vld [vmem:[#allocation5_spill] sm:$0xff]  ;;  %v2293_v34 = vsel %vm2083_vm1, %v5106_v50, 0.0 }
 0x2dc   : > { %v2264_v16 = vadd.f32 %v2263_v62, %v2262_v52  ;;  %v2651_v24 = vadd.f32 %v2650_v36, %v2649_v13 }
 0x2dd   : > { %v2670_v59 = vsel %vm2083_vm1, %v2444_v5, 0.0 }
 0x2de   : > { %v2266_v32 = vadd.f32 %v2265_v15, %v2264_v16  ;;  %v2653_v27 = vadd.f32 %v2652_v18, %v2651_v24  ;;  %v1487_v51 = vpop.f32.mrf.mxu2  ;;  %v1816_v30 = vpop.f32.mrf.mxu3  ;;  %v5101_v16 = vld [vmem:[#allocation3_spill] sm:$0xff] }
 0x2df   : > { %v4868_v52 = vadd.f32 %v1816_v30, %v1487_v51  ;;  %v2445_v24 = vmul.f32 %v5101_v16, %v5101_v16  ;;  %v2283_v23 = vsel %vm2083_vm1, %v5101_v16, 0.0 }
 0x2e0   : > { %v2268_v40 = vadd.f32 %v2267_v10, %v2266_v32  ;;  %v2655_v7 = vadd.f32 %v2654_v33, %v2653_v27  ;;  %v5102_v32 = vld [vmem:[#allocation4_spill] sm:$0xff] }
 0x2e1   : > { %v1950_v28 = vpack.c.bf16 %v4868_v52, %v4868_v52  ;;  %v2446_v27 = vmul.f32 %v5102_v32, %v5102_v32 }
 0x2e2   : > { %v2270_v41 = vadd.f32 %v2269_v49, %v2268_v40  ;;  %v2657_v60 = vadd.f32 %v2656_v3, %v2655_v7  ;;  %v2672_v40 = vsel %vm2083_vm1, %v2445_v24, 0.0  ;;  %v2285_v7 = vsel %vm2083_vm1, %v5102_v32, 0.0 }
 0x2e3   : > { %2079 = vst.msk [vmem:[%s3832_s7 + $0x1f0] sm:$0xf] %vm1954_vm0, %v1950_v28  ;;  %v2447_v3 = vmul.f32 %v5103_v37, %v5103_v37 }
 0x2e4   : > { %v2272_v8 = vadd.f32 %v2271_v12, %v2270_v41  ;;  %v2659_v14 = vadd.f32 %v2658_v0, %v2657_v60  ;;  %v2674_v41 = vsel %vm2083_vm1, %v2446_v27, 0.0  ;;  %v2287_v60 = vsel %vm2083_vm1, %v5103_v37, 0.0  ;;  %v5104_v0 = vld [vmem:[#allocation6_spill] sm:$0xff] }
 0x2e5   : > { %v2448_v12 = vmul.f32 %v5104_v0, %v5104_v0  ;;  %v2676_v51 = vsel %vm2083_vm1, %v2447_v3, 0.0 }
 0x2e6   : > { %v2274_v47 = vadd.f32 %v2273_v48, %v2272_v8  ;;  %v2661_v55 = vadd.f32 %v2660_v21, %v2659_v14  ;;  %v1489_v62 = vpop.f32.mrf.mxu2  ;;  %v1818_v46 = vpop.f32.mrf.mxu3  ;;  %v2289_v21 = vsel %vm2083_vm1, %v5104_v0, 0.0  ;;  %v5105_v48 = vld [vmem:[#allocation7_spill] sm:$0xff] }
 0x2e7   : > { %v4877_v6 = vadd.f32 %v1818_v46, %v1489_v62  ;;  %v2449_v9 = vmul.f32 %v5105_v48, %v5105_v48  ;;  %v5109_v46 = vld [vmem:[#allocation11_spill] sm:$0xff] }
 0x2e8   : > { %v2276_v38 = vadd.f32 %v2275_v2, %v2274_v47  ;;  %v2663_v42 = vadd.f32 %v2662_v63, %v2661_v55  ;;  %v2678_v63 = vsel %vm2083_vm1, %v2448_v12, 0.0  ;;  %v2291_v2 = vsel %vm2083_vm1, %v5105_v48, 0.0 }
 0x2e9   : > { %v1951_v17 = vpack.c.bf16 %v4877_v6, %v4877_v6 }
 0x2ea   : > { %v2278_v20 = vadd.f32 %v2277_v29, %v2276_v38  ;;  %v2665_v61 = vadd.f32 %v2664_v4, %v2663_v42  ;;  %v2450_v38 = vmul.f32 %v5106_v50, %v5106_v50  ;;  %v2680_v29 = vsel %vm2083_vm1, %v2449_v9, 0.0 }
 0x2eb   : > { %2080 = vst.msk [vmem:[%s3832_s7 + $0x1f4] sm:$0xf] %vm1954_vm0, %v1951_v17  ;;  %v5110_v17 = vld [vmem:[#allocation12_spill] sm:$0xff] }
 0x2ec   : > { %v2280_v13 = vadd.f32 %v2279_v11, %v2278_v20  ;;  %v2667_v36 = vadd.f32 %v2666_v45, %v2665_v61  ;;  %v5107_v20 = vld [vmem:[#allocation9_spill] sm:$0xff]  ;;  %v2682_v25 = vsel %vm2083_vm1, %v2450_v38, 0.0 }
 0x2ed   : > { %v2451_v61 = vmul.f32 %v5107_v20, %v5107_v20  ;;  %v2295_v5 = vsel %vm2083_vm1, %v5107_v20, 0.0 }
 0x2ee   : > { %v2282_v18 = vadd.f32 %v2281_v1, %v2280_v13  ;;  %v2669_v15 = vadd.f32 %v2668_v39, %v2667_v36  ;;  %v1492_v14 = vpop.f32.mrf.mxu2  ;;  %v1821_v30 = vpop.f32.mrf.mxu3  ;;  %v5108_v13 = vld [vmem:[#allocation10_spill] sm:$0xff] }
 0x2ef   : > { %v2452_v36 = vmul.f32 %v5108_v13, %v5108_v13  ;;  %v4920_v62 = vadd.f32 %v1821_v30, %v1492_v14  ;;  %v2684_v24 = vsel %vm2083_vm1, %v2451_v61, 0.0  ;;  %v2297_v28 = vsel %vm2083_vm1, %v5108_v13, 0.0  ;;  %v5112_v14 = vld [vmem:[#allocation14_spill] sm:$0xff] }
 0x2f0   : > { %v2284_v33 = vadd.f32 %v2283_v23, %v2282_v18  ;;  %v2671_v10 = vadd.f32 %v2670_v59, %v2669_v15  ;;  %v2453_v18 = vmul.f32 %v5109_v46, %v5109_v46  ;;  %v2305_v30 = vsel %vm2083_vm1, %v5112_v14, 0.0 }
 0x2f1   : > { %v1952_v15 = vpack.c.bf16 %v4920_v62, %v4920_v62  ;;  %v2311_v13 = vsel %vm2083_vm1, %v4619_v35, 0.0 }
 0x2f2   : > { %v2286_v49 = vadd.f32 %v2285_v7, %v2284_v33  ;;  %v2673_v44 = vadd.f32 %v2672_v40, %v2671_v10  ;;  %v2686_v33 = vsel %vm2083_vm1, %v2452_v36, 0.0  ;;  %v2299_v10 = vsel %vm2083_vm1, %v5109_v46, 0.0 }
 0x2f3   : > { %v2454_v40 = vmul.f32 %v5110_v17, %v5110_v17  ;;  %2081 = vst.msk [vmem:[%s3832_s7 + $0x1f8] sm:$0xf] %vm1954_vm0, %v1952_v15  ;;  %v2460_v36 = vmul.f32 %v4625_v54, %v4625_v54 }
 0x2f4   : > { %v2288_v19 = vadd.f32 %v2287_v60, %v2286_v49  ;;  %v2675_v8 = vadd.f32 %v2674_v41, %v2673_v44  ;;  %v2688_v49 = vsel %vm2083_vm1, %v2453_v18, 0.0  ;;  %v2301_v44 = vsel %vm2083_vm1, %v5110_v17, 0.0  ;;  %v5111_v41 = vld [vmem:[#allocation13_spill] sm:$0xff] }
 0x2f5   : > { %v2455_v60 = vmul.f32 %v5111_v41, %v5111_v41  ;;  %v2702_v15 = vsel %vm2083_vm1, %v2460_v36, 0.0 }
 0x2f6   : > { %v2290_v47 = vadd.f32 %v2289_v21, %v2288_v19  ;;  %v2677_v55 = vadd.f32 %v2676_v51, %v2675_v8  ;;  %v1494_v16 = vpop.f32.mrf.mxu2  ;;  %v1823_v59 = vpop.f32.mrf.mxu3  ;;  %v2690_v19 = vsel %vm2083_vm1, %v2454_v40, 0.0  ;;  %v2303_v8 = vsel %vm2083_vm1, %v5111_v41, 0.0 }
 0x2f7   : > { %v4929_v27 = vadd.f32 %v1823_v59, %v1494_v16  ;;  %v2456_v51 = vmul.f32 %v5112_v14, %v5112_v14  ;;  %v2692_v9 = vsel %vm2083_vm1, %v2455_v60, 0.0  ;;  %v2462_v59 = vmul.f32 %v4669_v43, %v4669_v43 }
 0x2f8   : > { %v2292_v42 = vadd.f32 %v2291_v2, %v2290_v47  ;;  %v2679_v4 = vadd.f32 %v2678_v63, %v2677_v55  ;;  %v5113_v47 = vld [vmem:[#allocation15_spill] sm:$0xff]  ;;  %v2465_v41 = vmul.f32 %v4764_v22, %v4764_v22 }
 0x2f9   : > { %v1953_v3 = vpack.c.bf16 %v4929_v27, %v4929_v27  ;;  %v2457_v55 = vmul.f32 %v5113_v47, %v5113_v47  ;;  %v2694_v50 = vsel %vm2083_vm1, %v2456_v51, 0.0  ;;  %v2307_v38 = vsel %vm2083_vm1, %v5113_v47, 0.0 }
 0x2fa   : > { %v2294_v45 = vadd.f32 %v2293_v34, %v2292_v42  ;;  %v2681_v11 = vadd.f32 %v2680_v29, %v2679_v4  ;;  %v5114_v42 = vld [vmem:[#allocation16_spill] sm:$0xff]  ;;  %v2712_v51 = vsel %vm2083_vm1, %v2465_v41, 0.0  ;;  %v2468_v47 = vmul.f32 %v4825_v56, %v4825_v56 }
 0x2fb   : > { %2082 = vst.msk [vmem:[%s3832_s7 + $0x1fc] sm:$0xf] %vm1954_vm0, %v1953_v3  ;;  %v2458_v4 = vmul.f32 %v5114_v42, %v5114_v42  ;;  %v2696_v20 = vsel %vm2083_vm1, %v2457_v55, 0.0  ;;  %v2309_v61 = vsel %vm2083_vm1, %v5114_v42, 0.0 }
 0x2fc   : > { %v2296_v39 = vadd.f32 %v2295_v5, %v2294_v45  ;;  %v2683_v1 = vadd.f32 %v2682_v25, %v2681_v11  ;;  %v2459_v45 = vmul.f32 %v4619_v35, %v4619_v35  ;;  %v2315_v35 = vsel %vm2083_vm1, %v4660_v31, 0.0 }
 0x2fd   : > { %v2698_v5 = vsel %vm2083_vm1, %v2458_v4, 0.0  ;;  %v2718_v4 = vsel %vm2083_vm1, %v2468_v47, 0.0 }
 0x2fe   : > { %v2298_v23 = vadd.f32 %v2297_v28, %v2296_v39  ;;  %v2685_v32 = vadd.f32 %v2684_v24, %v2683_v1  ;;  %v2700_v16 = vsel %vm2083_vm1, %v2459_v45, 0.0  ;;  %v2313_v24 = vsel %vm2083_vm1, %v4625_v54, 0.0 }
 0x2ff   : > { %v2461_v28 = vmul.f32 %v4660_v31, %v4660_v31  ;;  %v2317_v54 = vsel %vm2083_vm1, %v4669_v43, 0.0  ;;  %v2319_v31 = vsel %vm2083_vm1, %v4712_v57, 0.0  ;;  %v2321_v43 = vsel %vm2083_vm1, %v4721_v58, 0.0 }
 0x300   : > { %v2300_v7 = vadd.f32 %v2299_v10, %v2298_v23  ;;  %v2687_v37 = vadd.f32 %v2686_v33, %v2685_v32  ;;  %v2463_v10 = vmul.f32 %v4712_v57, %v4712_v57  ;;  %v2323_v57 = vsel %vm2083_vm1, %v4764_v22, 0.0 }
 0x301   : > { %v2704_v33 = vsel %vm2083_vm1, %v2461_v28, 0.0  ;;  %v2327_v22 = vsel %vm2083_vm1, %v4816_v26, 0.0  ;;  %v2471_v45 = vmul.f32 %v4920_v62, %v4920_v62 }
 0x302   : > { %v2302_v0 = vadd.f32 %v2301_v44, %v2300_v7  ;;  %v2689_v12 = vadd.f32 %v2688_v49, %v2687_v37  ;;  %v2706_v7 = vsel %vm2083_vm1, %v2462_v59, 0.0  ;;  %v2464_v37 = vmul.f32 %v4721_v58, %v4721_v58 }
 0x303   : > { %v2708_v44 = vsel %vm2083_vm1, %v2463_v10, 0.0  ;;  %v2325_v58 = vsel %vm2083_vm1, %v4773_v53, 0.0 }
 0x304   : > { %v2304_v21 = vadd.f32 %v2303_v8, %v2302_v0  ;;  %v2691_v48 = vadd.f32 %v2690_v19, %v2689_v12  ;;  %v2710_v12 = vsel %vm2083_vm1, %v2464_v37, 0.0  ;;  %v2466_v19 = vmul.f32 %v4773_v53, %v4773_v53 }
 0x305   : > { %v2329_v53 = vsel %vm2083_vm1, %v4825_v56, 0.0  ;;  %v2333_v56 = vsel %vm2083_vm1, %v4877_v6, 0.0 }
 0x306   : > { %v2306_v63 = vadd.f32 %v2305_v30, %v2304_v21  ;;  %v2693_v2 = vadd.f32 %v2692_v9, %v2691_v48  ;;  %v2467_v21 = vmul.f32 %v4816_v26, %v4816_v26  ;;  %v2714_v30 = vsel %vm2083_vm1, %v2466_v19, 0.0 }
 0x307   : > { %v2331_v26 = vsel %vm2083_vm1, %v4868_v52, 0.0 }
 0x308   : > { %v2308_v29 = vadd.f32 %v2307_v38, %v2306_v63  ;;  %v2695_v34 = vadd.f32 %v2694_v50, %v2693_v2  ;;  %v2716_v2 = vsel %vm2083_vm1, %v2467_v21, 0.0  ;;  %v2469_v50 = vmul.f32 %v4868_v52, %v4868_v52 }
 0x309   : > { %v2335_v52 = vsel %vm2083_vm1, %v4920_v62, 0.0 }
 0x30a   : > { %v2697_v11 = vadd.f32 %v2696_v20, %v2695_v34  ;;  %v2310_v25 = vadd.f32 %v2309_v61, %v2308_v29  ;;  %v2470_v29 = vmul.f32 %v4877_v6, %v4877_v6  ;;  %v2720_v61 = vsel %vm2083_vm1, %v2469_v50, 0.0 }
 0x30b   : > { %v2337_v6 = vsel %vm2083_vm1, %v4929_v27, 0.0 }
 0x30c   : > { %v2699_v39 = vadd.f32 %v2698_v5, %v2697_v11  ;;  %v2312_v1 = vadd.f32 %v2311_v13, %v2310_v25  ;;  %v2722_v5 = vsel %vm2083_vm1, %v2470_v29, 0.0  ;;  %v2472_v13 = vmul.f32 %v4929_v27, %v4929_v27 }
 0x30e   : > { %v2701_v46 = vadd.f32 %v2700_v16, %v2699_v39  ;;  %v2314_v18 = vadd.f32 %v2313_v24, %v2312_v1  ;;  %v2724_v1 = vsel %vm2083_vm1, %v2471_v45, 0.0  ;;  %v2726_v28 = vsel %vm2083_vm1, %v2472_v13, 0.0 }
 0x310   : > { %v2703_v23 = vadd.f32 %v2702_v15, %v2701_v46  ;;  %v2316_v32 = vadd.f32 %v2315_v35, %v2314_v18  ;;  %v2734_v35 = vlaneseq }
 0x312   : > { %v2705_v17 = vadd.f32 %v2704_v33, %v2703_v23  ;;  %v2318_v40 = vadd.f32 %v2317_v54, %v2316_v32  ;;  %v2735_v54 = vshrl.u32 %v2734_v35, 7 }
 0x314   : > { %v2707_v3 = vadd.f32 %v2706_v7, %v2705_v17  ;;  %v2320_v49 = vadd.f32 %v2319_v31, %v2318_v40  ;;  %vm2737_vm2 = vcmp.eq.s32.totalorder %v2735_v54, 1  ;;  %vm2736_vm3 = vcmp.eq.s32.totalorder %v2735_v54, 0 }
 0x316   : > { %v2709_v60 = vadd.f32 %v2708_v44, %v2707_v3  ;;  %v2322_v0 = vadd.f32 %v2321_v43, %v2320_v49 }
 0x318   : > { %v2711_v8 = vadd.f32 %v2710_v12, %v2709_v60  ;;  %v2324_v14 = vadd.f32 %v2323_v57, %v2322_v0 }
 0x31a   : > { %v2713_v48 = vadd.f32 %v2712_v51, %v2711_v8  ;;  %v2326_v9 = vadd.f32 %v2325_v58, %v2324_v14 }
 0x31c   : > { %v2715_v55 = vadd.f32 %v2714_v30, %v2713_v48  ;;  %v2328_v63 = vadd.f32 %v2327_v22, %v2326_v9 }
 0x31e   : > { %v2717_v38 = vadd.f32 %v2716_v2, %v2715_v55  ;;  %v2330_v42 = vadd.f32 %v2329_v53, %v2328_v63 }
 0x320   : > { %v2719_v34 = vadd.f32 %v2718_v4, %v2717_v38  ;;  %v2332_v20 = vadd.f32 %v2331_v26, %v2330_v42 }
 0x322   : > { %v2721_v11 = vadd.f32 %v2720_v61, %v2719_v34  ;;  %v2334_v25 = vadd.f32 %v2333_v56, %v2332_v20 }
 0x324   : > { %v2723_v36 = vadd.f32 %v2722_v5, %v2721_v11  ;;  %v2336_v39 = vadd.f32 %v2335_v52, %v2334_v25 }
 0x326   : > { %v2725_v16 = vadd.f32 %v2724_v1, %v2723_v36  ;;  %v2338_v24 = vadd.f32 %v2337_v6, %v2336_v39 }
 0x328   : > { %v2339_v46 = vrot.slane %v2338_v24, 4  ;;  %v2727_v18 = vadd.f32 %v2726_v28, %v2725_v16 }
 0x32a   : > { %v2340_v15 = vadd.f32 %v2339_v46, %v2338_v24  ;;  %v2728_v62 = vrot.slane %v2727_v18, 4 }
 0x32c   : > { %v2341_v59 = vrot.slane %v2340_v15, 2  ;;  %v2729_v23 = vadd.f32 %v2728_v62, %v2727_v18 }
 0x32e   : > { %v2342_v32 = vadd.f32 %v2341_v59, %v2340_v15  ;;  %v2730_v33 = vrot.slane %v2729_v23, 2 }
 0x330   : > { %v2731_v10 = vadd.f32 %v2730_v33, %v2729_v23  ;;  %v2343_v17 = vrot.slane %v2342_v32, 1 }
 0x332   : > { %v2732_v27 = vrot.slane %v2731_v10, 1  ;;  %v2344_v7 = vadd.f32 %v2343_v17, %v2342_v32 }
 0x334   : > { %v2733_v40 = vadd.f32 %v2732_v27, %v2731_v10 }
 0x336   : > { %v2738_v31 = vsel %vm2737_vm2, %v2733_v40, 0.0 }
 0x337   : > { %v2739_v37 = vsel %vm2736_vm3, %v2344_v7, %v2738_v31 }
 0x338   : > { %2740 = vst.msk [vmem:[%s271_s10] sm:$0xff] %vm2083_vm1, %v2739_v37 }
 0x339 PF: > { %s14_s14 = sadd.s32 1, %s3681_s14   ;;  %s5115_s12 = smov %s3677_s13 }
 0x33a   : > { %p11_p6 = scmp.ge.s32.totalorder %s14_s14, 4   ;;  %s5116_s13 = smov %s5118_s15 }
 0x33c   :  { %13 = sbr.rel (!%p11_p6) target bundleno = 2 (0x2), region = 73 }

// kernel: f.3
= control target key start
LH: loop header
LB: loop body
LE: loop exit
PB: predicated region body
PF: predicated region fallthrough
CT: control target
= control target key end

     0   :  { %s2732_s0 = inlined_call_operand.vmem [shape: bf16[256,128], index: 0, kind: input, shape index: {}]   ;;  %s2733_s1 = inlined_call_operand.vmem [shape: bf16[256,128], index: 1, kind: input, shape index: {}]   ;;  %s2734_s2 = inlined_call_operand.vmem [shape: bf16[256,128], index: 2, kind: input, shape index: {}]   ;;  %s2735_s3 = inlined_call_operand.vmem [shape: bf16[256,128], index: 3, kind: input, shape index: {}]   ;;  %s2736_s4 = inlined_call_operand.vmem [shape: bf16[256,128], index: 4, kind: input, shape index: {}]   ;;  %s2737_s5 = inlined_call_operand.vmem [shape: bf16[256,128], index: 5, kind: input, shape index: {}]   ;;  %s2738_s6 = inlined_call_operand.vmem [shape: bf16[256,128], index: 6, kind: input, shape index: {}]   ;;  %s2739_s7 = inlined_call_operand.vmem [shape: bf16[256,128], index: 7, kind: input, shape index: {}]   ;;  %s2740_s8 = inlined_call_operand.vmem [shape: bf16[256,128], index: 8, kind: input, shape index: {}]   ;;  %s2741_s9 = inlined_call_operand.vmem [shape: bf16[256,128], index: 9, kind: output, shape index: {}]  }
   0x1   :  { %v1381_v0 = vld [vmem:[%s2732_s0] sm:$0xff]   ;;  %v2036_v20 = vld [vmem:[%s2732_s0 + $0x8] sm:$0xff]   ;;  %v2037_v61 = vld [vmem:[%s2732_s0 + $0x10] sm:$0xff]  }
   0x2   :  { %v1445_v1 = vld [vmem:[%s2733_s1] sm:$0xff]   ;;  %v1382_v3 = vunpack.c.l.bf16 %v1381_v0  ;;  %v1383_v4 = vunpack.c.h.bf16 %v1381_v0  ;;  %v2051_v25 = vld [vmem:[%s2733_s1 + $0x8] sm:$0xff]   ;;  %v1386_v34 = vunpack.c.l.bf16 %v2036_v20  ;;  %v1387_v35 = vunpack.c.h.bf16 %v2036_v20 }
   0x3   :  { %v1509_v2 = vld [vmem:[%s2734_s2] sm:$0xff]   ;;  %v1446_v5 = vunpack.c.l.bf16 %v1445_v1  ;;  %v1447_v6 = vunpack.c.h.bf16 %v1445_v1  ;;  %v2066_v30 = vld [vmem:[%s2734_s2 + $0x8] sm:$0xff]   ;;  %v1450_v38 = vunpack.c.l.bf16 %v2051_v25  ;;  %v1451_v39 = vunpack.c.h.bf16 %v2051_v25  ;;  %v2097_v25 = vld [vmem:[%s2736_s4 + $0x10] sm:$0xff]  }
   0x4   :  { %v1573_v7 = vld [vmem:[%s2735_s3] sm:$0xff]   ;;  %v1510_v10 = vunpack.c.l.bf16 %v1509_v2  ;;  %v1511_v11 = vunpack.c.h.bf16 %v1509_v2  ;;  %v2081_v31 = vld [vmem:[%s2735_s3 + $0x8] sm:$0xff]   ;;  %v1514_v42 = vunpack.c.l.bf16 %v2066_v30  ;;  %v1515_v43 = vunpack.c.h.bf16 %v2066_v30  ;;  %v2112_v30 = vld [vmem:[%s2737_s5 + $0x10] sm:$0xff]  }
   0x5   :  { %v1637_v8 = vld [vmem:[%s2736_s4] sm:$0xff]   ;;  %v1574_v12 = vunpack.c.l.bf16 %v1573_v7  ;;  %v160_v15 = vmax.f32 %v1382_v3, %v1446_v5  ;;  %v161_v16 = vmax.f32 %v1383_v4, %v1447_v6  ;;  %v1575_v17 = vunpack.c.h.bf16 %v1573_v7  ;;  %v2096_v40 = vld [vmem:[%s2736_s4 + $0x8] sm:$0xff]   ;;  %v2052_v6 = vld [vmem:[%s2733_s1 + $0x10] sm:$0xff]  }
   0x6   :  { %v1701_v9 = vld [vmem:[%s2737_s5] sm:$0xff]   ;;  %v1638_v18 = vunpack.c.l.bf16 %v1637_v8  ;;  %v1639_v21 = vunpack.c.h.bf16 %v1637_v8  ;;  %v2111_v41 = vld [vmem:[%s2737_s5 + $0x8] sm:$0xff]   ;;  %v1578_v44 = vunpack.c.l.bf16 %v2081_v31  ;;  %v1579_v45 = vunpack.c.h.bf16 %v2081_v31  ;;  %v2067_v7 = vld [vmem:[%s2734_s2 + $0x10] sm:$0xff]  }
   0x7   :  { %v1765_v13 = vld [vmem:[%s2738_s6] sm:$0xff]   ;;  %v1702_v22 = vunpack.c.l.bf16 %v1701_v9  ;;  %v1703_v23 = vunpack.c.h.bf16 %v1701_v9  ;;  %v320_v26 = vmax.f32 %v160_v15, %v1510_v10  ;;  %v321_v27 = vmax.f32 %v161_v16, %v1511_v11  ;;  %v2126_v50 = vld [vmem:[%s2738_s6 + $0x8] sm:$0xff]   ;;  %v2082_v16 = vld [vmem:[%s2735_s3 + $0x10] sm:$0xff]  }
   0x8   :  { %v2260_v14 = vld [vmem:[%s2739_s7] sm:$0xff]   ;;  %v1766_v24 = vunpack.c.l.bf16 %v1765_v13  ;;  %v1767_v28 = vunpack.c.h.bf16 %v1765_v13  ;;  %v162_v48 = vmax.f32 %v1386_v34, %v1450_v38  ;;  %v163_v49 = vmax.f32 %v1387_v35, %v1451_v39  ;;  %v2141_v51 = vld [vmem:[%s2739_s7 + $0x8] sm:$0xff]  }
   0x9   :  { %v2265_v19 = vld [vmem:[%s2740_s8] sm:$0xff]   ;;  %v1830_v29 = vunpack.c.l.bf16 %v2260_v14  ;;  %v1831_v32 = vunpack.c.h.bf16 %v2260_v14  ;;  %v480_v36 = vmax.f32 %v320_v26, %v1574_v12  ;;  %v481_v37 = vmax.f32 %v321_v27, %v1575_v17  ;;  %v2156_v60 = vld [vmem:[%s2740_s8 + $0x8] sm:$0xff]  }
   0xa   :  { %v1894_v33 = vunpack.c.l.bf16 %v2265_v19  ;;  %v1895_v52 = vunpack.c.h.bf16 %v2265_v19  ;;  %v1642_v53 = vunpack.c.l.bf16 %v2096_v40  ;;  %v1643_v54 = vunpack.c.h.bf16 %v2096_v40  ;;  %v2142_v40 = vld [vmem:[%s2739_s7 + $0x10] sm:$0xff]  }
   0xb   :  { %v640_v46 = vmax.f32 %v480_v36, %v1638_v18  ;;  %v641_v47 = vmax.f32 %v481_v37, %v1639_v21  ;;  %v1706_v55 = vunpack.c.l.bf16 %v2111_v41  ;;  %v322_v58 = vmax.f32 %v162_v48, %v1514_v42 }
   0xc   :  { %v323_v59 = vmax.f32 %v163_v49, %v1515_v43  ;;  %v1707_v62 = vunpack.c.h.bf16 %v2111_v41  ;;  %v1770_v63 = vunpack.c.l.bf16 %v2126_v50  ;;  %v1771_v0 = vunpack.c.h.bf16 %v2126_v50 }
   0xd   :  { %v800_v56 = vmax.f32 %v640_v46, %v1702_v22  ;;  %v801_v57 = vmax.f32 %v641_v47, %v1703_v23  ;;  %v1834_v1 = vunpack.c.l.bf16 %v2141_v51  ;;  %v482_v4 = vmax.f32 %v322_v58, %v1578_v44  ;;  %v2038_v46 = vld [vmem:[%s2732_s0 + $0x18] sm:$0xff]  }
   0xe   :  { %v483_v5 = vmax.f32 %v323_v59, %v1579_v45  ;;  %v1835_v8 = vunpack.c.h.bf16 %v2141_v51  ;;  %v1898_v9 = vunpack.c.l.bf16 %v2156_v60  ;;  %v1390_v10 = vunpack.c.l.bf16 %v2037_v61  ;;  %v2157_v45 = vld [vmem:[%s2740_s8 + $0x10] sm:$0xff]   ;;  %v2053_v51 = vld [vmem:[%s2733_s1 + $0x18] sm:$0xff]  }
   0xf   :  { %v960_v2 = vmax.f32 %v800_v56, %v1766_v24  ;;  %v961_v3 = vmax.f32 %v801_v57, %v1767_v28  ;;  %v1391_v11 = vunpack.c.h.bf16 %v2037_v61  ;;  %v642_v14 = vmax.f32 %v482_v4, %v1642_v53  ;;  %v2068_v56 = vld [vmem:[%s2734_s2 + $0x18] sm:$0xff]  }
  0x10   :  { %v643_v15 = vmax.f32 %v483_v5, %v1643_v54  ;;  %v1454_v17 = vunpack.c.l.bf16 %v2052_v6  ;;  %v1455_v18 = vunpack.c.h.bf16 %v2052_v6  ;;  %v1518_v19 = vunpack.c.l.bf16 %v2067_v7  ;;  %v2083_v61 = vld [vmem:[%s2735_s3 + $0x18] sm:$0xff]  }
  0x11   :  { %v1120_v12 = vmax.f32 %v960_v2, %v1830_v29  ;;  %v1121_v13 = vmax.f32 %v961_v3, %v1831_v32  ;;  %v1519_v20 = vunpack.c.h.bf16 %v2067_v7  ;;  %v802_v23 = vmax.f32 %v642_v14, %v1706_v55  ;;  %v2098_v2 = vld [vmem:[%s2736_s4 + $0x18] sm:$0xff]  }
  0x12   :  { %v803_v24 = vmax.f32 %v643_v15, %v1707_v62  ;;  %v164_v26 = vmax.f32 %v1390_v10, %v1454_v17  ;;  %v165_v27 = vmax.f32 %v1391_v11, %v1455_v18  ;;  %v1582_v28 = vunpack.c.l.bf16 %v2082_v16  ;;  %v2113_v7 = vld [vmem:[%s2737_s5 + $0x18] sm:$0xff]  }
  0x13   :  { %v1280_v21 = vmax.f32 %v1120_v12, %v1894_v33  ;;  %v1281_v22 = vmax.f32 %v1121_v13, %v1895_v52  ;;  %v1583_v29 = vunpack.c.h.bf16 %v2082_v16  ;;  %v962_v32 = vmax.f32 %v802_v23, %v1770_v63  ;;  %v2127_v33 = vld [vmem:[%s2738_s6 + $0x10] sm:$0xff]   ;;  %v2128_v12 = vld [vmem:[%s2738_s6 + $0x18] sm:$0xff]  }
  0x14   :  { %v963_v34 = vmax.f32 %v803_v24, %v1771_v0  ;;  %v1899_v35 = vunpack.c.h.bf16 %v2156_v60  ;;  %v324_v36 = vmax.f32 %v164_v26, %v1518_v19  ;;  %v325_v37 = vmax.f32 %v165_v27, %v1519_v20  ;;  %v2143_v17 = vld [vmem:[%s2739_s7 + $0x18] sm:$0xff]   ;;  %v2039_v27 = vld [vmem:[%s2732_s0 + $0x20] sm:$0xff]  }
  0x15   :  { %v1959_v31 = vpack.c.bf16 %v1281_v22, %v1280_v21  ;;  %v1646_v38 = vunpack.c.l.bf16 %v2097_v25  ;;  %v1647_v39 = vunpack.c.h.bf16 %v2097_v25  ;;  %v1122_v41 = vmax.f32 %v962_v32, %v1834_v1  ;;  %v2158_v22 = vld [vmem:[%s2740_s8 + $0x18] sm:$0xff]   ;;  %v2054_v32 = vld [vmem:[%s2733_s1 + $0x20] sm:$0xff]  }
  0x16   :  { %v1123_v42 = vmax.f32 %v963_v34, %v1835_v8  ;;  %v1710_v43 = vunpack.c.l.bf16 %v2112_v30  ;;  %v1711_v44 = vunpack.c.h.bf16 %v2112_v30  ;;  %v484_v47 = vmax.f32 %v324_v36, %v1582_v28  ;;  %v2069_v34 = vld [vmem:[%s2734_s2 + $0x20] sm:$0xff]  }
  0x17   :  { %1960 = vst [vmem:[%s2741_s9] sm:$0xff] %v1959_v31   ;;  %v485_v48 = vmax.f32 %v325_v37, %v1583_v29  ;;  %v1774_v49 = vunpack.c.l.bf16 %v2127_v33  ;;  %v1775_v50 = vunpack.c.h.bf16 %v2127_v33  ;;  %v1282_v52 = vmax.f32 %v1122_v41, %v1898_v9 }
  0x18   :  { %v1283_v53 = vmax.f32 %v1123_v42, %v1899_v35  ;;  %v1838_v54 = vunpack.c.l.bf16 %v2142_v40  ;;  %v1839_v55 = vunpack.c.h.bf16 %v2142_v40  ;;  %v644_v57 = vmax.f32 %v484_v47, %v1646_v38  ;;  %v2084_v42 = vld [vmem:[%s2735_s3 + $0x20] sm:$0xff]  }
  0x19   :  { %v645_v58 = vmax.f32 %v485_v48, %v1647_v39  ;;  %v1902_v59 = vunpack.c.l.bf16 %v2157_v45  ;;  %v1394_v60 = vunpack.c.l.bf16 %v2038_v46  ;;  %v1395_v63 = vunpack.c.h.bf16 %v2038_v46  ;;  %v2099_v47 = vld [vmem:[%s2736_s4 + $0x20] sm:$0xff]  }
  0x1a   :  { %v1964_v62 = vpack.c.bf16 %v1283_v53, %v1282_v52  ;;  %v1458_v0 = vunpack.c.l.bf16 %v2053_v51  ;;  %v1459_v1 = vunpack.c.h.bf16 %v2053_v51  ;;  %v804_v3 = vmax.f32 %v644_v57, %v1710_v43  ;;  %v2114_v52 = vld [vmem:[%s2737_s5 + $0x20] sm:$0xff]  }
  0x1b   :  { %v805_v4 = vmax.f32 %v645_v58, %v1711_v44  ;;  %v1522_v5 = vunpack.c.l.bf16 %v2068_v56  ;;  %v1523_v6 = vunpack.c.h.bf16 %v2068_v56  ;;  %v1586_v10 = vunpack.c.l.bf16 %v2083_v61  ;;  %v2129_v57 = vld [vmem:[%s2738_s6 + $0x20] sm:$0xff]  }
  0x1c   :  { %2171 = vst [vmem:[%s2741_s9 + $0x8] sm:$0xff] %v1964_v62   ;;  %v166_v8 = vmax.f32 %v1394_v60, %v1458_v0  ;;  %v167_v9 = vmax.f32 %v1395_v63, %v1459_v1  ;;  %v1587_v11 = vunpack.c.h.bf16 %v2083_v61  ;;  %v964_v13 = vmax.f32 %v804_v3, %v1774_v49  ;;  %v2144_v62 = vld [vmem:[%s2739_s7 + $0x20] sm:$0xff]  }
  0x1d   :  { %v965_v14 = vmax.f32 %v805_v4, %v1775_v50  ;;  %v1903_v15 = vunpack.c.h.bf16 %v2157_v45  ;;  %v1650_v16 = vunpack.c.l.bf16 %v2098_v2  ;;  %v1651_v20 = vunpack.c.h.bf16 %v2098_v2  ;;  %v2159_v3 = vld [vmem:[%s2740_s8 + $0x20] sm:$0xff]   ;;  %v2040_v4 = vld [vmem:[%s2732_s0 + $0x28] sm:$0xff]  }
  0x1e   :  { %v326_v18 = vmax.f32 %v166_v8, %v1522_v5  ;;  %v327_v19 = vmax.f32 %v167_v9, %v1523_v6  ;;  %v1714_v21 = vunpack.c.l.bf16 %v2113_v7  ;;  %v1124_v23 = vmax.f32 %v964_v13, %v1838_v54  ;;  %v2055_v9 = vld [vmem:[%s2733_s1 + $0x28] sm:$0xff]  }
  0x1f   :  { %v1125_v24 = vmax.f32 %v965_v14, %v1839_v55  ;;  %v1715_v25 = vunpack.c.h.bf16 %v2113_v7  ;;  %v1778_v26 = vunpack.c.l.bf16 %v2128_v12  ;;  %v1779_v30 = vunpack.c.h.bf16 %v2128_v12  ;;  %v2070_v14 = vld [vmem:[%s2734_s2 + $0x28] sm:$0xff]  }
  0x20   :  { %v486_v28 = vmax.f32 %v326_v18, %v1586_v10  ;;  %v487_v29 = vmax.f32 %v327_v19, %v1587_v11  ;;  %v1842_v31 = vunpack.c.l.bf16 %v2143_v17  ;;  %v1284_v35 = vmax.f32 %v1124_v23, %v1902_v59  ;;  %v2085_v19 = vld [vmem:[%s2735_s3 + $0x28] sm:$0xff]  }
  0x21   :  { %v1285_v33 = vmax.f32 %v1125_v24, %v1903_v15  ;;  %v1843_v36 = vunpack.c.h.bf16 %v2143_v17  ;;  %v1906_v37 = vunpack.c.l.bf16 %v2158_v22  ;;  %v1398_v40 = vunpack.c.l.bf16 %v2039_v27  ;;  %v2100_v24 = vld [vmem:[%s2736_s4 + $0x28] sm:$0xff]  }
  0x22   :  { %v646_v38 = vmax.f32 %v486_v28, %v1650_v16  ;;  %v647_v39 = vmax.f32 %v487_v29, %v1651_v20  ;;  %v1399_v41 = vunpack.c.h.bf16 %v2039_v27  ;;  %v1462_v44 = vunpack.c.l.bf16 %v2054_v32 }
  0x23   :  { %v1969_v43 = vpack.c.bf16 %v1285_v33, %v1284_v35  ;;  %v1463_v45 = vunpack.c.h.bf16 %v2054_v32  ;;  %v1526_v46 = vunpack.c.l.bf16 %v2069_v34  ;;  %v1907_v50 = vunpack.c.h.bf16 %v2158_v22  ;;  %v2130_v35 = vld [vmem:[%s2738_s6 + $0x28] sm:$0xff]  }
  0x24   :  { %v806_v48 = vmax.f32 %v646_v38, %v1714_v21  ;;  %v807_v49 = vmax.f32 %v647_v39, %v1715_v25  ;;  %v1527_v51 = vunpack.c.h.bf16 %v2069_v34  ;;  %v168_v53 = vmax.f32 %v1398_v40, %v1462_v44  ;;  %v2115_v34 = vld [vmem:[%s2737_s5 + $0x28] sm:$0xff]  }
  0x25   :  { %2172 = vst [vmem:[%s2741_s9 + $0x10] sm:$0xff] %v1969_v43   ;;  %v169_v54 = vmax.f32 %v1399_v41, %v1463_v45  ;;  %v1590_v55 = vunpack.c.l.bf16 %v2084_v42  ;;  %v1591_v56 = vunpack.c.h.bf16 %v2084_v42  ;;  %v1654_v60 = vunpack.c.l.bf16 %v2099_v47  ;;  %v2145_v43 = vld [vmem:[%s2739_s7 + $0x28] sm:$0xff]  }
  0x26   :  { %v966_v58 = vmax.f32 %v806_v48, %v1778_v26  ;;  %v967_v59 = vmax.f32 %v807_v49, %v1779_v30  ;;  %v1655_v61 = vunpack.c.h.bf16 %v2099_v47  ;;  %v328_v63 = vmax.f32 %v168_v53, %v1526_v46  ;;  %v2418_v44 = vld [vmem:[%s2740_s8 + $0x28] sm:$0xff]   ;;  %v2041_v49 = vld [vmem:[%s2732_s0 + $0x30] sm:$0xff]  }
  0x27   :  { %v329_v0 = vmax.f32 %v169_v54, %v1527_v51  ;;  %v1718_v1 = vunpack.c.l.bf16 %v2114_v52  ;;  %v1719_v2 = vunpack.c.h.bf16 %v2114_v52  ;;  %v1782_v7 = vunpack.c.l.bf16 %v2129_v57  ;;  %v2056_v54 = vld [vmem:[%s2733_s1 + $0x30] sm:$0xff]  }
  0x28   :  { %v1126_v5 = vmax.f32 %v966_v58, %v1842_v31  ;;  %v1127_v6 = vmax.f32 %v967_v59, %v1843_v36  ;;  %v1783_v8 = vunpack.c.h.bf16 %v2129_v57  ;;  %v488_v10 = vmax.f32 %v328_v63, %v1590_v55  ;;  %v2071_v59 = vld [vmem:[%s2734_s2 + $0x30] sm:$0xff]  }
  0x29   :  { %v489_v11 = vmax.f32 %v329_v0, %v1591_v56  ;;  %v1846_v12 = vunpack.c.l.bf16 %v2144_v62  ;;  %v1847_v13 = vunpack.c.h.bf16 %v2144_v62  ;;  %v1910_v17 = vunpack.c.l.bf16 %v2159_v3  ;;  %v2086_v0 = vld [vmem:[%s2735_s3 + $0x30] sm:$0xff]  }
  0x2a   :  { %v1286_v15 = vmax.f32 %v1126_v5, %v1906_v37  ;;  %v1287_v16 = vmax.f32 %v1127_v6, %v1907_v50  ;;  %v1402_v18 = vunpack.c.l.bf16 %v2040_v4  ;;  %v648_v20 = vmax.f32 %v488_v10, %v1654_v60  ;;  %v2101_v5 = vld [vmem:[%s2736_s4 + $0x30] sm:$0xff]  }
  0x2b   :  { %v649_v21 = vmax.f32 %v489_v11, %v1655_v61  ;;  %v1403_v22 = vunpack.c.h.bf16 %v2040_v4  ;;  %v1466_v23 = vunpack.c.l.bf16 %v2055_v9  ;;  %v1467_v26 = vunpack.c.h.bf16 %v2055_v9 }
  0x2c   :  { %v1974_v25 = vpack.c.bf16 %v1287_v16, %v1286_v15  ;;  %v1530_v27 = vunpack.c.l.bf16 %v2070_v14  ;;  %v1531_v28 = vunpack.c.h.bf16 %v2070_v14  ;;  %v808_v29 = vmax.f32 %v648_v20, %v1718_v1  ;;  %v2116_v14 = vld [vmem:[%s2737_s5 + $0x30] sm:$0xff]  }
  0x2d   :  { %v809_v30 = vmax.f32 %v649_v21, %v1719_v2  ;;  %v170_v31 = vmax.f32 %v1402_v18, %v1466_v23  ;;  %v1594_v32 = vunpack.c.l.bf16 %v2085_v19  ;;  %v1911_v33 = vunpack.c.h.bf16 %v2159_v3  ;;  %v2131_v15 = vld [vmem:[%s2738_s6 + $0x30] sm:$0xff]  }
  0x2e   :  { %2173 = vst [vmem:[%s2741_s9 + $0x18] sm:$0xff] %v1974_v25   ;;  %v171_v36 = vmax.f32 %v1403_v22, %v1467_v26  ;;  %v1595_v37 = vunpack.c.h.bf16 %v2085_v19  ;;  %v1658_v38 = vunpack.c.l.bf16 %v2100_v24  ;;  %v968_v39 = vmax.f32 %v808_v29, %v1782_v7  ;;  %v2161_v25 = vld [vmem:[%s2740_s8 + $0x30] sm:$0xff]  }
  0x2f   :  { %v969_v40 = vmax.f32 %v809_v30, %v1783_v8  ;;  %v330_v41 = vmax.f32 %v170_v31, %v1530_v27  ;;  %v1659_v42 = vunpack.c.h.bf16 %v2100_v24  ;;  %v1722_v46 = vunpack.c.l.bf16 %v2115_v34  ;;  %v2146_v24 = vld [vmem:[%s2739_s7 + $0x30] sm:$0xff]   ;;  %v2042_v30 = vld [vmem:[%s2732_s0 + $0x38] sm:$0xff]  }
  0x30   :  { %v331_v45 = vmax.f32 %v171_v36, %v1531_v28  ;;  %v1723_v47 = vunpack.c.h.bf16 %v2115_v34  ;;  %v1786_v48 = vunpack.c.l.bf16 %v2130_v35  ;;  %v1128_v50 = vmax.f32 %v968_v39, %v1846_v12  ;;  %v2072_v36 = vld [vmem:[%s2734_s2 + $0x38] sm:$0xff]  }
  0x31   :  { %v1129_v51 = vmax.f32 %v969_v40, %v1847_v13  ;;  %v490_v52 = vmax.f32 %v330_v41, %v1594_v32  ;;  %v1787_v53 = vunpack.c.h.bf16 %v2130_v35  ;;  %v1850_v56 = vunpack.c.l.bf16 %v2145_v43 }
  0x32   :  { %v491_v55 = vmax.f32 %v331_v45, %v1595_v37  ;;  %v1851_v57 = vunpack.c.h.bf16 %v2145_v43  ;;  %v1914_v58 = vunpack.c.l.bf16 %v2418_v44  ;;  %v1288_v60 = vmax.f32 %v1128_v50, %v1910_v17  ;;  %v2087_v45 = vld [vmem:[%s2735_s3 + $0x38] sm:$0xff]  }
  0x33   :  { %v1289_v61 = vmax.f32 %v1129_v51, %v1911_v33  ;;  %v650_v62 = vmax.f32 %v490_v52, %v1658_v38  ;;  %v1406_v63 = vunpack.c.l.bf16 %v2041_v49  ;;  %v1407_v2 = vunpack.c.h.bf16 %v2041_v49  ;;  %v2057_v33 = vld [vmem:[%s2733_s1 + $0x38] sm:$0xff]  }
  0x34   :  { %v651_v1 = vmax.f32 %v491_v55, %v1659_v42  ;;  %v1470_v3 = vunpack.c.l.bf16 %v2056_v54  ;;  %v1471_v4 = vunpack.c.h.bf16 %v2056_v54  ;;  %v1534_v8 = vunpack.c.l.bf16 %v2071_v59  ;;  %v2102_v50 = vld [vmem:[%s2736_s4 + $0x38] sm:$0xff]  }
  0x35   :  { %v1979_v6 = vpack.c.bf16 %v1289_v61, %v1288_v60  ;;  %v810_v7 = vmax.f32 %v650_v62, %v1722_v46  ;;  %v1535_v9 = vunpack.c.h.bf16 %v2071_v59  ;;  %v1598_v13 = vunpack.c.l.bf16 %v2086_v0  ;;  %v2117_v55 = vld [vmem:[%s2737_s5 + $0x38] sm:$0xff]  }
  0x36   :  { %v811_v10 = vmax.f32 %v651_v1, %v1723_v47  ;;  %v172_v11 = vmax.f32 %v1406_v63, %v1470_v3  ;;  %v173_v12 = vmax.f32 %v1407_v2, %v1471_v4  ;;  %v1915_v17 = vunpack.c.h.bf16 %v2418_v44  ;;  %v2132_v60 = vld [vmem:[%s2738_s6 + $0x38] sm:$0xff]  }
  0x37   :  { %2174 = vst [vmem:[%s2741_s9 + $0x20] sm:$0xff] %v1979_v6   ;;  %v970_v16 = vmax.f32 %v810_v7, %v1786_v48  ;;  %v1599_v18 = vunpack.c.h.bf16 %v2086_v0  ;;  %v1662_v19 = vunpack.c.l.bf16 %v2101_v5  ;;  %v1663_v23 = vunpack.c.h.bf16 %v2101_v5  ;;  %v2147_v1 = vld [vmem:[%s2739_s7 + $0x38] sm:$0xff]  }
  0x38   :  { %v971_v20 = vmax.f32 %v811_v10, %v1787_v53  ;;  %v332_v21 = vmax.f32 %v172_v11, %v1534_v8  ;;  %v333_v22 = vmax.f32 %v173_v12, %v1535_v9  ;;  %v1726_v27 = vunpack.c.l.bf16 %v2116_v14  ;;  %v2162_v6 = vld [vmem:[%s2740_s8 + $0x38] sm:$0xff]   ;;  %v2043_v11 = vld [vmem:[%s2732_s0 + $0x40] sm:$0xff]  }
  0x39   :  { %v1130_v26 = vmax.f32 %v970_v16, %v1850_v56  ;;  %v1727_v28 = vunpack.c.h.bf16 %v2116_v14  ;;  %v1790_v29 = vunpack.c.l.bf16 %v2131_v15  ;;  %v1791_v35 = vunpack.c.h.bf16 %v2131_v15  ;;  %v2058_v16 = vld [vmem:[%s2733_s1 + $0x40] sm:$0xff]  }
  0x3a   :  { %v1131_v31 = vmax.f32 %v971_v20, %v1851_v57  ;;  %v492_v32 = vmax.f32 %v332_v21, %v1598_v13  ;;  %v493_v34 = vmax.f32 %v333_v22, %v1599_v18  ;;  %v1854_v38 = vunpack.c.l.bf16 %v2146_v24 }
  0x3b   :  { %v1290_v37 = vmax.f32 %v1130_v26, %v1914_v58  ;;  %v1855_v39 = vunpack.c.h.bf16 %v2146_v24  ;;  %v1918_v40 = vunpack.c.l.bf16 %v2161_v25  ;;  %v1410_v44 = vunpack.c.l.bf16 %v2042_v30  ;;  %v2088_v26 = vld [vmem:[%s2735_s3 + $0x40] sm:$0xff]  }
  0x3c   :  { %v1291_v41 = vmax.f32 %v1131_v31, %v1915_v17  ;;  %v652_v42 = vmax.f32 %v492_v32, %v1662_v19  ;;  %v653_v43 = vmax.f32 %v493_v34, %v1663_v23  ;;  %v1411_v46 = vunpack.c.h.bf16 %v2042_v30  ;;  %v2073_v17 = vld [vmem:[%s2734_s2 + $0x40] sm:$0xff]  }
  0x3d   :  { %v1474_v47 = vunpack.c.l.bf16 %v2057_v33  ;;  %v1475_v48 = vunpack.c.h.bf16 %v2057_v33  ;;  %v1538_v49 = vunpack.c.l.bf16 %v2072_v36  ;;  %v1539_v54 = vunpack.c.h.bf16 %v2072_v36  ;;  %v2103_v31 = vld [vmem:[%s2736_s4 + $0x40] sm:$0xff]  }
  0x3e   :  { %v1984_v51 = vpack.c.bf16 %v1291_v41, %v1290_v37  ;;  %v812_v52 = vmax.f32 %v652_v42, %v1726_v27  ;;  %v813_v53 = vmax.f32 %v653_v43, %v1727_v28  ;;  %v1602_v58 = vunpack.c.l.bf16 %v2087_v45  ;;  %v2118_v36 = vld [vmem:[%s2737_s5 + $0x40] sm:$0xff]  }
  0x3f   :  { %v174_v56 = vmax.f32 %v1410_v44, %v1474_v47  ;;  %v175_v57 = vmax.f32 %v1411_v46, %v1475_v48  ;;  %v1603_v59 = vunpack.c.h.bf16 %v2087_v45  ;;  %v1919_v63 = vunpack.c.h.bf16 %v2161_v25  ;;  %v2133_v41 = vld [vmem:[%s2738_s6 + $0x40] sm:$0xff]  }
  0x40   :  { %2175 = vst [vmem:[%s2741_s9 + $0x28] sm:$0xff] %v1984_v51   ;;  %v972_v61 = vmax.f32 %v812_v52, %v1790_v29  ;;  %v973_v62 = vmax.f32 %v813_v53, %v1791_v35  ;;  %v1666_v0 = vunpack.c.l.bf16 %v2102_v50  ;;  %v1667_v4 = vunpack.c.h.bf16 %v2102_v50  ;;  %v2148_v46 = vld [vmem:[%s2739_s7 + $0x40] sm:$0xff]   ;;  %v2044_v52 = vld [vmem:[%s2732_s0 + $0x48] sm:$0xff]  }
  0x41   :  { %v334_v2 = vmax.f32 %v174_v56, %v1538_v49  ;;  %v335_v3 = vmax.f32 %v175_v57, %v1539_v54  ;;  %v1730_v5 = vunpack.c.l.bf16 %v2117_v55  ;;  %v1731_v9 = vunpack.c.h.bf16 %v2117_v55  ;;  %v2163_v51 = vld [vmem:[%s2740_s8 + $0x40] sm:$0xff]   ;;  %v2059_v57 = vld [vmem:[%s2733_s1 + $0x48] sm:$0xff]  }
  0x42   :  { %v1132_v7 = vmax.f32 %v972_v61, %v1854_v38  ;;  %v1133_v8 = vmax.f32 %v973_v62, %v1855_v39  ;;  %v1794_v10 = vunpack.c.l.bf16 %v2132_v60  ;;  %v1795_v14 = vunpack.c.h.bf16 %v2132_v60  ;;  %v2074_v62 = vld [vmem:[%s2734_s2 + $0x48] sm:$0xff]  }
  0x43   :  { %v494_v12 = vmax.f32 %v334_v2, %v1602_v58  ;;  %v495_v13 = vmax.f32 %v335_v3, %v1603_v59  ;;  %v1858_v15 = vunpack.c.l.bf16 %v2147_v1  ;;  %v1859_v20 = vunpack.c.h.bf16 %v2147_v1  ;;  %v2089_v3 = vld [vmem:[%s2735_s3 + $0x48] sm:$0xff]  }
  0x44   :  { %v1292_v18 = vmax.f32 %v1132_v7, %v1918_v40  ;;  %v1293_v19 = vmax.f32 %v1133_v8, %v1919_v63  ;;  %v1922_v21 = vunpack.c.l.bf16 %v2162_v6  ;;  %v1414_v24 = vunpack.c.l.bf16 %v2043_v11  ;;  %v2104_v8 = vld [vmem:[%s2736_s4 + $0x48] sm:$0xff]  }
  0x45   :  { %v654_v22 = vmax.f32 %v494_v12, %v1666_v0  ;;  %v655_v23 = vmax.f32 %v495_v13, %v1667_v4  ;;  %v1415_v25 = vunpack.c.h.bf16 %v2043_v11  ;;  %v1478_v28 = vunpack.c.l.bf16 %v2058_v16 }
  0x46   :  { %v1989_v27 = vpack.c.bf16 %v1293_v19, %v1292_v18  ;;  %v1479_v29 = vunpack.c.h.bf16 %v2058_v16  ;;  %v1542_v30 = vunpack.c.l.bf16 %v2073_v17  ;;  %v1923_v35 = vunpack.c.h.bf16 %v2162_v6  ;;  %v2134_v18 = vld [vmem:[%s2738_s6 + $0x48] sm:$0xff]  }
  0x47   :  { %v814_v32 = vmax.f32 %v654_v22, %v1730_v5  ;;  %v815_v34 = vmax.f32 %v655_v23, %v1731_v9  ;;  %v1543_v33 = vunpack.c.h.bf16 %v2073_v17  ;;  %v176_v37 = vmax.f32 %v1414_v24, %v1478_v28  ;;  %v2119_v17 = vld [vmem:[%s2737_s5 + $0x48] sm:$0xff]  }
  0x48   :  { %2176 = vst [vmem:[%s2741_s9 + $0x30] sm:$0xff] %v1989_v27   ;;  %v177_v38 = vmax.f32 %v1415_v25, %v1479_v29  ;;  %v1606_v39 = vunpack.c.l.bf16 %v2088_v26  ;;  %v1607_v40 = vunpack.c.h.bf16 %v2088_v26  ;;  %v1670_v44 = vunpack.c.l.bf16 %v2103_v31  ;;  %v2149_v27 = vld [vmem:[%s2739_s7 + $0x48] sm:$0xff]  }
  0x49   :  { %v974_v42 = vmax.f32 %v814_v32, %v1794_v10  ;;  %v975_v43 = vmax.f32 %v815_v34, %v1795_v14  ;;  %v1671_v45 = vunpack.c.h.bf16 %v2103_v31  ;;  %v336_v47 = vmax.f32 %v176_v37, %v1542_v30  ;;  %v2542_v28 = vld [vmem:[%s2740_s8 + $0x48] sm:$0xff]   ;;  %v2045_v34 = vld [vmem:[%s2732_s0 + $0x50] sm:$0xff]  }
  0x4a   :  { %v337_v48 = vmax.f32 %v177_v38, %v1543_v33  ;;  %v1734_v49 = vunpack.c.l.bf16 %v2118_v36  ;;  %v1735_v50 = vunpack.c.h.bf16 %v2118_v36  ;;  %v1798_v55 = vunpack.c.l.bf16 %v2133_v41  ;;  %v2060_v38 = vld [vmem:[%s2733_s1 + $0x50] sm:$0xff]  }
  0x4b   :  { %v1134_v53 = vmax.f32 %v974_v42, %v1858_v15  ;;  %v1135_v54 = vmax.f32 %v975_v43, %v1859_v20  ;;  %v1799_v56 = vunpack.c.h.bf16 %v2133_v41  ;;  %v496_v58 = vmax.f32 %v336_v47, %v1606_v39  ;;  %v2075_v43 = vld [vmem:[%s2734_s2 + $0x50] sm:$0xff]  }
  0x4c   :  { %v497_v59 = vmax.f32 %v337_v48, %v1607_v40  ;;  %v1862_v60 = vunpack.c.l.bf16 %v2148_v46  ;;  %v1863_v61 = vunpack.c.h.bf16 %v2148_v46  ;;  %v1926_v1 = vunpack.c.l.bf16 %v2163_v51  ;;  %v2090_v48 = vld [vmem:[%s2735_s3 + $0x50] sm:$0xff]  }
  0x4d   :  { %v1294_v63 = vmax.f32 %v1134_v53, %v1922_v21  ;;  %v1295_v0 = vmax.f32 %v1135_v54, %v1923_v35  ;;  %v1418_v2 = vunpack.c.l.bf16 %v2044_v52  ;;  %v656_v4 = vmax.f32 %v496_v58, %v1670_v44  ;;  %v2105_v53 = vld [vmem:[%s2736_s4 + $0x50] sm:$0xff]  }
  0x4e   :  { %v657_v5 = vmax.f32 %v497_v59, %v1671_v45  ;;  %v1419_v6 = vunpack.c.h.bf16 %v2044_v52  ;;  %v1482_v7 = vunpack.c.l.bf16 %v2059_v57  ;;  %v1483_v10 = vunpack.c.h.bf16 %v2059_v57 }
  0x4f   :  { %v1994_v9 = vpack.c.bf16 %v1295_v0, %v1294_v63  ;;  %v1546_v11 = vunpack.c.l.bf16 %v2074_v62  ;;  %v1547_v12 = vunpack.c.h.bf16 %v2074_v62  ;;  %v816_v13 = vmax.f32 %v656_v4, %v1734_v49  ;;  %v2120_v62 = vld [vmem:[%s2737_s5 + $0x50] sm:$0xff]  }
  0x50   :  { %v817_v14 = vmax.f32 %v657_v5, %v1735_v50  ;;  %v178_v15 = vmax.f32 %v1418_v2, %v1482_v7  ;;  %v1610_v16 = vunpack.c.l.bf16 %v2089_v3  ;;  %v1927_v19 = vunpack.c.h.bf16 %v2163_v51  ;;  %v2135_v63 = vld [vmem:[%s2738_s6 + $0x50] sm:$0xff]  }
  0x51   :  { %2177 = vst [vmem:[%s2741_s9 + $0x38] sm:$0xff] %v1994_v9   ;;  %v179_v20 = vmax.f32 %v1419_v6, %v1483_v10  ;;  %v1611_v21 = vunpack.c.h.bf16 %v2089_v3  ;;  %v1674_v22 = vunpack.c.l.bf16 %v2104_v8  ;;  %v976_v23 = vmax.f32 %v816_v13, %v1798_v55  ;;  %v2165_v9 = vld [vmem:[%s2740_s8 + $0x50] sm:$0xff]  }
  0x52   :  { %v977_v24 = vmax.f32 %v817_v14, %v1799_v56  ;;  %v338_v25 = vmax.f32 %v178_v15, %v1546_v11  ;;  %v1675_v26 = vunpack.c.h.bf16 %v2104_v8  ;;  %v1738_v30 = vunpack.c.l.bf16 %v2119_v17  ;;  %v2150_v8 = vld [vmem:[%s2739_s7 + $0x50] sm:$0xff]   ;;  %v2046_v14 = vld [vmem:[%s2732_s0 + $0x58] sm:$0xff]  }
  0x53   :  { %v339_v29 = vmax.f32 %v179_v20, %v1547_v12  ;;  %v1739_v31 = vunpack.c.h.bf16 %v2119_v17  ;;  %v1802_v32 = vunpack.c.l.bf16 %v2134_v18  ;;  %v1136_v35 = vmax.f32 %v976_v23, %v1862_v60  ;;  %v2076_v20 = vld [vmem:[%s2734_s2 + $0x58] sm:$0xff]  }
  0x54   :  { %v1137_v33 = vmax.f32 %v977_v24, %v1863_v61  ;;  %v498_v36 = vmax.f32 %v338_v25, %v1610_v16  ;;  %v1803_v37 = vunpack.c.h.bf16 %v2134_v18  ;;  %v1866_v40 = vunpack.c.l.bf16 %v2149_v27 }
  0x55   :  { %v499_v39 = vmax.f32 %v339_v29, %v1611_v21  ;;  %v1867_v41 = vunpack.c.h.bf16 %v2149_v27  ;;  %v1930_v42 = vunpack.c.l.bf16 %v2542_v28  ;;  %v1296_v44 = vmax.f32 %v1136_v35, %v1926_v1  ;;  %v2091_v29 = vld [vmem:[%s2735_s3 + $0x58] sm:$0xff]  }
  0x56   :  { %v1297_v45 = vmax.f32 %v1137_v33, %v1927_v19  ;;  %v658_v46 = vmax.f32 %v498_v36, %v1674_v22  ;;  %v1422_v47 = vunpack.c.l.bf16 %v2045_v34  ;;  %v1423_v50 = vunpack.c.h.bf16 %v2045_v34  ;;  %v2061_v19 = vld [vmem:[%s2733_s1 + $0x58] sm:$0xff]  }
  0x57   :  { %v659_v49 = vmax.f32 %v499_v39, %v1675_v26  ;;  %v1486_v51 = vunpack.c.l.bf16 %v2060_v38  ;;  %v1487_v52 = vunpack.c.h.bf16 %v2060_v38  ;;  %v1550_v56 = vunpack.c.l.bf16 %v2075_v43  ;;  %v2106_v35 = vld [vmem:[%s2736_s4 + $0x58] sm:$0xff]  }
  0x58   :  { %v1999_v54 = vpack.c.bf16 %v1297_v45, %v1296_v44  ;;  %v818_v55 = vmax.f32 %v658_v46, %v1738_v30  ;;  %v1551_v57 = vunpack.c.h.bf16 %v2075_v43  ;;  %v1614_v61 = vunpack.c.l.bf16 %v2090_v48  ;;  %v2121_v39 = vld [vmem:[%s2737_s5 + $0x58] sm:$0xff]  }
  0x59   :  { %v819_v58 = vmax.f32 %v659_v49, %v1739_v31  ;;  %v180_v59 = vmax.f32 %v1422_v47, %v1486_v51  ;;  %v181_v60 = vmax.f32 %v1423_v50, %v1487_v52  ;;  %v1931_v1 = vunpack.c.h.bf16 %v2542_v28  ;;  %v2136_v44 = vld [vmem:[%s2738_s6 + $0x58] sm:$0xff]  }
  0x5a   :  { %2178 = vst [vmem:[%s2741_s9 + $0x40] sm:$0xff] %v1999_v54   ;;  %v978_v0 = vmax.f32 %v818_v55, %v1802_v32  ;;  %v1615_v2 = vunpack.c.h.bf16 %v2090_v48  ;;  %v1678_v3 = vunpack.c.l.bf16 %v2105_v53  ;;  %v1679_v7 = vunpack.c.h.bf16 %v2105_v53  ;;  %v2151_v49 = vld [vmem:[%s2739_s7 + $0x58] sm:$0xff]  }
  0x5b   :  { %v979_v4 = vmax.f32 %v819_v58, %v1803_v37  ;;  %v340_v5 = vmax.f32 %v180_v59, %v1550_v56  ;;  %v341_v6 = vmax.f32 %v181_v60, %v1551_v57  ;;  %v1742_v11 = vunpack.c.l.bf16 %v2120_v62  ;;  %v2166_v54 = vld [vmem:[%s2740_s8 + $0x58] sm:$0xff]   ;;  %v2047_v59 = vld [vmem:[%s2732_s0 + $0x60] sm:$0xff]  }
  0x5c   :  { %v1138_v10 = vmax.f32 %v978_v0, %v1866_v40  ;;  %v1743_v12 = vunpack.c.h.bf16 %v2120_v62  ;;  %v1806_v13 = vunpack.c.l.bf16 %v2135_v63  ;;  %v1807_v18 = vunpack.c.h.bf16 %v2135_v63  ;;  %v2062_v0 = vld [vmem:[%s2733_s1 + $0x60] sm:$0xff]  }
  0x5d   :  { %v1139_v15 = vmax.f32 %v979_v4, %v1867_v41  ;;  %v500_v16 = vmax.f32 %v340_v5, %v1614_v61  ;;  %v501_v17 = vmax.f32 %v341_v6, %v1615_v2  ;;  %v1870_v22 = vunpack.c.l.bf16 %v2150_v8 }
  0x5e   :  { %v1298_v21 = vmax.f32 %v1138_v10, %v1930_v42  ;;  %v1871_v23 = vunpack.c.h.bf16 %v2150_v8  ;;  %v1934_v24 = vunpack.c.l.bf16 %v2165_v9  ;;  %v1426_v28 = vunpack.c.l.bf16 %v2046_v14  ;;  %v2092_v10 = vld [vmem:[%s2735_s3 + $0x60] sm:$0xff]  }
  0x5f   :  { %v1299_v25 = vmax.f32 %v1139_v15, %v1931_v1  ;;  %v660_v26 = vmax.f32 %v500_v16, %v1678_v3  ;;  %v661_v27 = vmax.f32 %v501_v17, %v1679_v7  ;;  %v1427_v30 = vunpack.c.h.bf16 %v2046_v14  ;;  %v2077_v1 = vld [vmem:[%s2734_s2 + $0x60] sm:$0xff]  }
  0x60   :  { %v1490_v31 = vunpack.c.l.bf16 %v2061_v19  ;;  %v1491_v32 = vunpack.c.h.bf16 %v2061_v19  ;;  %v1554_v34 = vunpack.c.l.bf16 %v2076_v20  ;;  %v1555_v38 = vunpack.c.h.bf16 %v2076_v20  ;;  %v2107_v15 = vld [vmem:[%s2736_s4 + $0x60] sm:$0xff]  }
  0x61   :  { %v2004_v33 = vpack.c.bf16 %v1299_v25, %v1298_v21  ;;  %v820_v36 = vmax.f32 %v660_v26, %v1742_v11  ;;  %v821_v37 = vmax.f32 %v661_v27, %v1743_v12  ;;  %v1618_v42 = vunpack.c.l.bf16 %v2091_v29  ;;  %v2122_v20 = vld [vmem:[%s2737_s5 + $0x60] sm:$0xff]  }
  0x62   :  { %v182_v40 = vmax.f32 %v1426_v28, %v1490_v31  ;;  %v183_v41 = vmax.f32 %v1427_v30, %v1491_v32  ;;  %v1619_v43 = vunpack.c.h.bf16 %v2091_v29  ;;  %v1935_v47 = vunpack.c.h.bf16 %v2165_v9  ;;  %v2137_v25 = vld [vmem:[%s2738_s6 + $0x60] sm:$0xff]  }
  0x63   :  { %2179 = vst [vmem:[%s2741_s9 + $0x48] sm:$0xff] %v2004_v33   ;;  %v980_v45 = vmax.f32 %v820_v36, %v1806_v13  ;;  %v981_v46 = vmax.f32 %v821_v37, %v1807_v18  ;;  %v1682_v48 = vunpack.c.l.bf16 %v2106_v35  ;;  %v1683_v52 = vunpack.c.h.bf16 %v2106_v35  ;;  %v2152_v30 = vld [vmem:[%s2739_s7 + $0x60] sm:$0xff]   ;;  %v2048_v36 = vld [vmem:[%s2732_s0 + $0x68] sm:$0xff]  }
  0x64   :  { %v342_v50 = vmax.f32 %v182_v40, %v1554_v34  ;;  %v343_v51 = vmax.f32 %v183_v41, %v1555_v38  ;;  %v1746_v53 = vunpack.c.l.bf16 %v2121_v39  ;;  %v1747_v57 = vunpack.c.h.bf16 %v2121_v39  ;;  %v2167_v33 = vld [vmem:[%s2740_s8 + $0x60] sm:$0xff]   ;;  %v2063_v41 = vld [vmem:[%s2733_s1 + $0x68] sm:$0xff]  }
  0x65   :  { %v1140_v55 = vmax.f32 %v980_v45, %v1870_v22  ;;  %v1141_v56 = vmax.f32 %v981_v46, %v1871_v23  ;;  %v1810_v58 = vunpack.c.l.bf16 %v2136_v44  ;;  %v1811_v62 = vunpack.c.h.bf16 %v2136_v44  ;;  %v2078_v46 = vld [vmem:[%s2734_s2 + $0x68] sm:$0xff]  }
  0x66   :  { %v502_v60 = vmax.f32 %v342_v50, %v1618_v42  ;;  %v503_v61 = vmax.f32 %v343_v51, %v1619_v43  ;;  %v1874_v63 = vunpack.c.l.bf16 %v2151_v49  ;;  %v1875_v4 = vunpack.c.h.bf16 %v2151_v49  ;;  %v2093_v51 = vld [vmem:[%s2735_s3 + $0x68] sm:$0xff]  }
  0x67   :  { %v1300_v2 = vmax.f32 %v1140_v55, %v1934_v24  ;;  %v1301_v3 = vmax.f32 %v1141_v56, %v1935_v47  ;;  %v1938_v5 = vunpack.c.l.bf16 %v2166_v54  ;;  %v1430_v8 = vunpack.c.l.bf16 %v2047_v59  ;;  %v2108_v56 = vld [vmem:[%s2736_s4 + $0x68] sm:$0xff]  }
  0x68   :  { %v662_v6 = vmax.f32 %v502_v60, %v1682_v48  ;;  %v663_v7 = vmax.f32 %v503_v61, %v1683_v52  ;;  %v1431_v9 = vunpack.c.h.bf16 %v2047_v59  ;;  %v1494_v12 = vunpack.c.l.bf16 %v2062_v0 }
  0x69   :  { %v2009_v11 = vpack.c.bf16 %v1301_v3, %v1300_v2  ;;  %v1495_v13 = vunpack.c.h.bf16 %v2062_v0  ;;  %v1558_v14 = vunpack.c.l.bf16 %v2077_v1  ;;  %v1939_v18 = vunpack.c.h.bf16 %v2166_v54  ;;  %v2138_v2 = vld [vmem:[%s2738_s6 + $0x68] sm:$0xff]  }
  0x6a   :  { %v822_v16 = vmax.f32 %v662_v6, %v1746_v53  ;;  %v823_v17 = vmax.f32 %v663_v7, %v1747_v57  ;;  %v1559_v19 = vunpack.c.h.bf16 %v2077_v1  ;;  %v184_v21 = vmax.f32 %v1430_v8, %v1494_v12  ;;  %v2123_v1 = vld [vmem:[%s2737_s5 + $0x68] sm:$0xff]  }
  0x6b   :  { %2180 = vst [vmem:[%s2741_s9 + $0x50] sm:$0xff] %v2009_v11   ;;  %v185_v22 = vmax.f32 %v1431_v9, %v1495_v13  ;;  %v1622_v23 = vunpack.c.l.bf16 %v2092_v10  ;;  %v1623_v24 = vunpack.c.h.bf16 %v2092_v10  ;;  %v1686_v28 = vunpack.c.l.bf16 %v2107_v15  ;;  %v2153_v11 = vld [vmem:[%s2739_s7 + $0x68] sm:$0xff]  }
  0x6c   :  { %v982_v26 = vmax.f32 %v822_v16, %v1810_v58  ;;  %v983_v27 = vmax.f32 %v823_v17, %v1811_v62  ;;  %v1687_v29 = vunpack.c.h.bf16 %v2107_v15  ;;  %v344_v31 = vmax.f32 %v184_v21, %v1558_v14  ;;  %v2168_v12 = vld [vmem:[%s2740_s8 + $0x68] sm:$0xff]   ;;  %v2049_v17 = vld [vmem:[%s2732_s0 + $0x70] sm:$0xff]  }
  0x6d   :  { %v345_v32 = vmax.f32 %v185_v22, %v1559_v19  ;;  %v1750_v34 = vunpack.c.l.bf16 %v2122_v20  ;;  %v1751_v35 = vunpack.c.h.bf16 %v2122_v20  ;;  %v1814_v39 = vunpack.c.l.bf16 %v2137_v25  ;;  %v2064_v22 = vld [vmem:[%s2733_s1 + $0x70] sm:$0xff]  }
  0x6e   :  { %v1142_v37 = vmax.f32 %v982_v26, %v1874_v63  ;;  %v1143_v38 = vmax.f32 %v983_v27, %v1875_v4  ;;  %v1815_v40 = vunpack.c.h.bf16 %v2137_v25  ;;  %v504_v42 = vmax.f32 %v344_v31, %v1622_v23  ;;  %v2079_v27 = vld [vmem:[%s2734_s2 + $0x70] sm:$0xff]  }
  0x6f   :  { %v505_v43 = vmax.f32 %v345_v32, %v1623_v24  ;;  %v1878_v44 = vunpack.c.l.bf16 %v2152_v30  ;;  %v1879_v45 = vunpack.c.h.bf16 %v2152_v30  ;;  %v1942_v49 = vunpack.c.l.bf16 %v2167_v33  ;;  %v2094_v32 = vld [vmem:[%s2735_s3 + $0x70] sm:$0xff]  }
  0x70   :  { %v1302_v47 = vmax.f32 %v1142_v37, %v1938_v5  ;;  %v1303_v48 = vmax.f32 %v1143_v38, %v1939_v18  ;;  %v1434_v50 = vunpack.c.l.bf16 %v2048_v36  ;;  %v664_v52 = vmax.f32 %v504_v42, %v1686_v28  ;;  %v2109_v37 = vld [vmem:[%s2736_s4 + $0x70] sm:$0xff]  }
  0x71   :  { %v665_v53 = vmax.f32 %v505_v43, %v1687_v29  ;;  %v1435_v54 = vunpack.c.h.bf16 %v2048_v36  ;;  %v1498_v55 = vunpack.c.l.bf16 %v2063_v41  ;;  %v1499_v58 = vunpack.c.h.bf16 %v2063_v41 }
  0x72   :  { %v2014_v57 = vpack.c.bf16 %v1303_v48, %v1302_v47  ;;  %v1562_v59 = vunpack.c.l.bf16 %v2078_v46  ;;  %v1563_v60 = vunpack.c.h.bf16 %v2078_v46  ;;  %v824_v61 = vmax.f32 %v664_v52, %v1750_v34  ;;  %v2124_v46 = vld [vmem:[%s2737_s5 + $0x70] sm:$0xff]  }
  0x73   :  { %v825_v62 = vmax.f32 %v665_v53, %v1751_v35  ;;  %v186_v63 = vmax.f32 %v1434_v50, %v1498_v55  ;;  %v1626_v0 = vunpack.c.l.bf16 %v2093_v51  ;;  %v1943_v3 = vunpack.c.h.bf16 %v2167_v33 }
  0x74   :  { %2181 = vst [vmem:[%s2741_s9 + $0x58] sm:$0xff] %v2014_v57   ;;  %v187_v4 = vmax.f32 %v1435_v54, %v1499_v58  ;;  %v1627_v5 = vunpack.c.h.bf16 %v2093_v51  ;;  %v1690_v6 = vunpack.c.l.bf16 %v2108_v56  ;;  %v984_v7 = vmax.f32 %v824_v61, %v1814_v39  ;;  %v2139_v51 = vld [vmem:[%s2738_s6 + $0x70] sm:$0xff]  }
  0x75   :  { %v985_v8 = vmax.f32 %v825_v62, %v1815_v40  ;;  %v346_v9 = vmax.f32 %v186_v63, %v1562_v59  ;;  %v1691_v10 = vunpack.c.h.bf16 %v2108_v56  ;;  %v1754_v14 = vunpack.c.l.bf16 %v2123_v1  ;;  %v2154_v56 = vld [vmem:[%s2739_s7 + $0x70] sm:$0xff]  }
  0x76   :  { %v347_v13 = vmax.f32 %v187_v4, %v1563_v60  ;;  %v1755_v15 = vunpack.c.h.bf16 %v2123_v1  ;;  %v1818_v16 = vunpack.c.l.bf16 %v2138_v2  ;;  %v1144_v18 = vmax.f32 %v984_v7, %v1878_v44  ;;  %v2050_v60 = vld [vmem:[%s2732_s0 + $0x78] sm:$0xff]  }
  0x77   :  { %v1145_v19 = vmax.f32 %v985_v8, %v1879_v45  ;;  %v506_v20 = vmax.f32 %v346_v9, %v1626_v0  ;;  %v1819_v21 = vunpack.c.h.bf16 %v2138_v2  ;;  %v1882_v24 = vunpack.c.l.bf16 %v2153_v11  ;;  %v2065_v1 = vld [vmem:[%s2733_s1 + $0x78] sm:$0xff]  }
  0x78   :  { %v507_v23 = vmax.f32 %v347_v13, %v1627_v5  ;;  %v1883_v25 = vunpack.c.h.bf16 %v2153_v11  ;;  %v1946_v26 = vunpack.c.l.bf16 %v2168_v12  ;;  %v1304_v28 = vmax.f32 %v1144_v18, %v1942_v49  ;;  %v2080_v2 = vld [vmem:[%s2734_s2 + $0x78] sm:$0xff]  }
  0x79   :  { %v1305_v29 = vmax.f32 %v1145_v19, %v1943_v3  ;;  %v666_v30 = vmax.f32 %v506_v20, %v1690_v6  ;;  %v1438_v31 = vunpack.c.l.bf16 %v2049_v17  ;;  %v1439_v35 = vunpack.c.h.bf16 %v2049_v17  ;;  %v2095_v11 = vld [vmem:[%s2735_s3 + $0x78] sm:$0xff]  }
  0x7a   :  { %v667_v34 = vmax.f32 %v507_v23, %v1691_v10  ;;  %v1502_v33 = vunpack.c.l.bf16 %v2064_v22  ;;  %v1503_v36 = vunpack.c.h.bf16 %v2064_v22  ;;  %v1566_v40 = vunpack.c.l.bf16 %v2079_v27 }
  0x7b   :  { %v2019_v38 = vpack.c.bf16 %v1305_v29, %v1304_v28  ;;  %v826_v39 = vmax.f32 %v666_v30, %v1754_v14  ;;  %v1567_v41 = vunpack.c.h.bf16 %v2079_v27  ;;  %v1630_v45 = vunpack.c.l.bf16 %v2094_v32  ;;  %v2125_v30 = vld [vmem:[%s2737_s5 + $0x78] sm:$0xff]  }
  0x7c   :  { %v827_v42 = vmax.f32 %v667_v34, %v1755_v15  ;;  %v188_v43 = vmax.f32 %v1438_v31, %v1502_v33  ;;  %v189_v44 = vmax.f32 %v1439_v35, %v1503_v36  ;;  %v1947_v48 = vunpack.c.h.bf16 %v2168_v12  ;;  %v2169_v12 = vld [vmem:[%s2740_s8 + $0x70] sm:$0xff]  }
  0x7d   :  { %2182 = vst [vmem:[%s2741_s9 + $0x60] sm:$0xff] %v2019_v38   ;;  %v986_v47 = vmax.f32 %v826_v39, %v1818_v16  ;;  %v1631_v49 = vunpack.c.h.bf16 %v2094_v32  ;;  %v1694_v50 = vunpack.c.l.bf16 %v2109_v37  ;;  %v1695_v55 = vunpack.c.h.bf16 %v2109_v37  ;;  %v2140_v37 = vld [vmem:[%s2738_s6 + $0x78] sm:$0xff]  }
  0x7e   :  { %v987_v52 = vmax.f32 %v827_v42, %v1819_v21  ;;  %v348_v53 = vmax.f32 %v188_v43, %v1566_v40  ;;  %v349_v54 = vmax.f32 %v189_v44, %v1567_v41  ;;  %v1758_v58 = vunpack.c.l.bf16 %v2124_v46  ;;  %v2110_v21 = vld [vmem:[%s2736_s4 + $0x78] sm:$0xff]  }
  0x7f   :  { %v1146_v57 = vmax.f32 %v986_v47, %v1882_v24  ;;  %v1759_v59 = vunpack.c.h.bf16 %v2124_v46  ;;  %v1822_v0 = vunpack.c.l.bf16 %v2139_v51  ;;  %v1823_v4 = vunpack.c.h.bf16 %v2139_v51  ;;  %v2155_v44 = vld [vmem:[%s2739_s7 + $0x78] sm:$0xff]  }
  0x80   :  { %v1147_v61 = vmax.f32 %v987_v52, %v1883_v25  ;;  %v508_v62 = vmax.f32 %v348_v53, %v1630_v45  ;;  %v509_v63 = vmax.f32 %v349_v54, %v1631_v49  ;;  %v1886_v5 = vunpack.c.l.bf16 %v2154_v56 }
  0x81   :  { %v1306_v3 = vmax.f32 %v1146_v57, %v1946_v26  ;;  %v1887_v6 = vunpack.c.h.bf16 %v2154_v56  ;;  %v1442_v10 = vunpack.c.l.bf16 %v2050_v60  ;;  %v1443_v13 = vunpack.c.h.bf16 %v2050_v60 }
  0x82   :  { %v1307_v7 = vmax.f32 %v1147_v61, %v1947_v48  ;;  %v668_v8 = vmax.f32 %v508_v62, %v1694_v50  ;;  %v669_v9 = vmax.f32 %v509_v63, %v1695_v55  ;;  %v1506_v14 = vunpack.c.l.bf16 %v2065_v1  ;;  %v2170_v50 = vld [vmem:[%s2740_s8 + $0x78] sm:$0xff]  }
  0x83   :  { %v1507_v15 = vunpack.c.h.bf16 %v2065_v1  ;;  %v1570_v16 = vunpack.c.l.bf16 %v2080_v2  ;;  %v1571_v20 = vunpack.c.h.bf16 %v2080_v2  ;;  %v1634_v24 = vunpack.c.l.bf16 %v2095_v11 }
  0x84   :  { %v2024_v17 = vpack.c.bf16 %v1307_v7, %v1306_v3  ;;  %v828_v18 = vmax.f32 %v668_v8, %v1758_v58  ;;  %v829_v19 = vmax.f32 %v669_v9, %v1759_v59  ;;  %v190_v22 = vmax.f32 %v1442_v10, %v1506_v14 }
  0x85   :  { %v191_v23 = vmax.f32 %v1443_v13, %v1507_v15  ;;  %v1635_v25 = vunpack.c.h.bf16 %v2095_v11  ;;  %v1950_v28 = vunpack.c.l.bf16 %v2169_v12  ;;  %v1951_v29 = vunpack.c.h.bf16 %v2169_v12 }
  0x86   :  { %2183 = vst [vmem:[%s2741_s9 + $0x68] sm:$0xff] %v2024_v17   ;;  %v988_v26 = vmax.f32 %v828_v18, %v1822_v0  ;;  %v989_v27 = vmax.f32 %v829_v19, %v1823_v4  ;;  %v350_v31 = vmax.f32 %v190_v22, %v1570_v16  ;;  %v1698_v34 = vunpack.c.l.bf16 %v2110_v21 }
  0x87   :  { %v351_v32 = vmax.f32 %v191_v23, %v1571_v20  ;;  %v1699_v35 = vunpack.c.h.bf16 %v2110_v21  ;;  %v1762_v40 = vunpack.c.l.bf16 %v2125_v30  ;;  %v1763_v41 = vunpack.c.h.bf16 %v2125_v30 }
  0x88   :  { %v1148_v33 = vmax.f32 %v988_v26, %v1886_v5  ;;  %v1149_v36 = vmax.f32 %v989_v27, %v1887_v6  ;;  %v510_v38 = vmax.f32 %v350_v31, %v1634_v24  ;;  %v1826_v47 = vunpack.c.l.bf16 %v2140_v37 }
  0x89   :  { %v511_v39 = vmax.f32 %v351_v32, %v1635_v25  ;;  %v1827_v48 = vunpack.c.h.bf16 %v2140_v37  ;;  %v1890_v53 = vunpack.c.l.bf16 %v2155_v44  ;;  %v1891_v54 = vunpack.c.h.bf16 %v2155_v44 }
  0x8a   :  { %v1308_v42 = vmax.f32 %v1148_v33, %v1950_v28  ;;  %v1309_v43 = vmax.f32 %v1149_v36, %v1951_v29  ;;  %v670_v45 = vmax.f32 %v510_v38, %v1698_v34  ;;  %v1954_v57 = vunpack.c.l.bf16 %v2170_v50 }
  0x8b   :  { %v671_v46 = vmax.f32 %v511_v39, %v1699_v35  ;;  %v1955_v58 = vunpack.c.h.bf16 %v2170_v50 }
  0x8c   :  { %v2029_v49 = vpack.c.bf16 %v1309_v43, %v1308_v42  ;;  %v830_v51 = vmax.f32 %v670_v45, %v1762_v40 }
  0x8d   :  { %v831_v52 = vmax.f32 %v671_v46, %v1763_v41 }
  0x8e   :  { %2184 = vst [vmem:[%s2741_s9 + $0x70] sm:$0xff] %v2029_v49   ;;  %v990_v55 = vmax.f32 %v830_v51, %v1826_v47 }
  0x8f   :  { %v991_v56 = vmax.f32 %v831_v52, %v1827_v48 }
  0x90   :  { %v1150_v59 = vmax.f32 %v990_v55, %v1890_v53 }
  0x91   :  { %v1151_v60 = vmax.f32 %v991_v56, %v1891_v54 }
  0x92   :  { %v1310_v61 = vmax.f32 %v1150_v59, %v1954_v57 }
  0x93   :  { %v1311_v62 = vmax.f32 %v1151_v60, %v1955_v58 }
  0x95   :  { %v2034_v63 = vpack.c.bf16 %v1311_v62, %v1310_v61 }
  0x97   :  { %2185 = vst [vmem:[%s2741_s9 + $0x78] sm:$0xff] %v2034_v63  }

</bundles_post_ra>
